<compile_context>
chip_gen: v7x
topology: tpu7x:2x2x1
jax: 0.10.0
libtpu: 0.0.40
codegen_flags: <defaults>
</compile_context>

<pallas_src>
import functools

import jax
import jax.numpy as jnp
from jax.experimental import pallas as pl
from jax.experimental.pallas import tpu as pltpu


DIM = 256
NUM_CLASSES = 7
CLASS_PAD = 128   # lane-dense head output; only the first NUM_CLASSES cols valid
EDGE_ALIGN = 128  # edge lists are lane-padded (sentinel -1) to a multiple of this


# ----------------------------------------------------------------------------
# Fused forward kernel
# ----------------------------------------------------------------------------
def _fused_net_kernel(
    x_ref, e1_ref, e2_ref, i1_ref, i2_ref,
    g11w_ref, g12w_ref, g1b_ref, m1w1_ref, m1b1_ref, m1w2_ref, m1b2_ref,
    g21w_ref, g22w_ref, g2b_ref, m2w1_ref, m2b1_ref, m2w2_ref, m2b2_ref,
    hw1_ref, hb1_ref, hw2_ref, hb2_ref,
    o_ref):
  f32 = jnp.float32
  n = x_ref.shape[0]
  g = o_ref.shape[0]

  def dot(a, b):
    return jnp.dot(a, b, preferred_element_type=f32)

  def build_adjacency(e_ref):
    """Returns (dinv * (A + I_remaining), dinv) from the raw padded edge list.

    One-hot encodes dst/src against a node iota and forms A[dst, src] with a
    single NT MXU contraction over the edge lanes (duplicate edges sum; padded
    lanes carry sentinel -1 and never match a node id).  Self loops are added
    only for nodes that do not already have one (PyG add_remaining_self_loops).
    The symmetric normalization D^-1/2 (A+I) D^-1/2 is applied later as
    (dinv*A) @ (dinv*X), avoiding any transpose of dinv.
    """
    ei = e_ref[...]                                   # (2, E) int32
    src = ei[0:1, :]                                  # (1, E)
    dst = ei[1:2, :]                                  # (1, E)
    node = jax.lax.broadcasted_iota(jnp.int32, (n, ei.shape[1]), 0)
    od = jnp.where(dst == node, 1.0, 0.0).astype(f32)    # od[i, e]   = [dst[e] == i]
    osrc = jnp.where(src == node, 1.0, 0.0).astype(f32)  # osrc[j, e] = [src[e] == j]
    # a[i, j] = #edges j -> i  (contract over edge lanes; NT dot, q@k^T style)
    a = jax.lax.dot_general(od, osrc, (((1,), (1,)), ((), ())),
                            preferred_element_type=f32)
    eye = jnp.where(
        jax.lax.broadcasted_iota(jnp.int32, (n, n), 0)
        == jax.lax.broadcasted_iota(jnp.int32, (n, n), 1), 1.0, 0.0).astype(f32)
    diag = jnp.sum(a * eye, axis=1, keepdims=True)        # existing self loops
    a = a + eye * jnp.where(diag > 0.0, 0.0, 1.0)          # add_remaining_self_loops
    dinv = jax.lax.rsqrt(jnp.sum(a, axis=1, keepdims=True))  # deg >= 1 always
    return dinv * a, dinv

  def mean_pool(i_ref):
    idx = i_ref[...]                                  # (1, n) int32
    gid = jax.lax.broadcasted_iota(jnp.int32, (g, n), 0)
    onehot = jnp.where(idx == gid, 1.0, 0.0).astype(f32)
    counts = jnp.sum(onehot, axis=1, keepdims=True)
    return onehot / jnp.maximum(counts, 1.0)

  a1, dinv1 = build_adjacency(e1_ref)
  a2, dinv2 = build_adjacency(e2_ref)

  def layer(x, gw1, gw2, gb, mw1, mb1, mw2, mb2):
    # GCN pair, reassociated: relu(((dinv*A) @ (dinv*X)) @ W + b) per branch.
    ax1 = dot(a1, dinv1 * x)
    ax2 = dot(a2, dinv2 * x)
    xcat = jnp.concatenate([dot(ax1, gw1), dot(ax2, gw2)], axis=-1)
    xcat = jnp.maximum(xcat + gb, 0.0)
    # MLP on the lane-concat of both branches: one K = 2*dim MXU dot.
    h = jnp.maximum(dot(xcat, mw1) + mb1, 0.0)
    return dot(h, mw2) + mb2

  x = layer(x_ref[...], g11w_ref[...], g12w_ref[...], g1b_ref[...],
            m1w1_ref[...], m1b1_ref[...], m1w2_ref[...], m1b2_ref[...])
  x = layer(x, g21w_ref[...], g22w_ref[...], g2b_ref[...],
            m2w1_ref[...], m2b1_ref[...], m2w2_ref[...], m2b2_ref[...])

  # scatter(..., 'mean') as mean-pooling matmuls; lane-concat feeds the head.
  gcat = jnp.concatenate([dot(mean_pool(i1_ref), x),
                          dot(mean_pool(i2_ref), x)], axis=-1)
  h = jnp.maximum(dot(gcat, hw1_ref[...]) + hb1_ref[...], 0.0)

  # Head 2nd layer is lane-padded to CLASS_PAD columns; padded columns carry a
  # -1e30 bias so they contribute nothing to log_softmax and the output store
  # stays lane-dense (no masked vst).
  logits = dot(h, hw2_ref[...]) + hb2_ref[...]
  m = jnp.max(logits, axis=-1, keepdims=True)
  lse = m + jnp.log(jnp.sum(jnp.exp(logits - m), axis=-1, keepdims=True))
  o_ref[...] = logits - lse


def net_forward(params, x, edge_index_1, edge_index_2, index_1, index_2,
                num_groups, num_classes=NUM_CLASSES):
  n, din = x.shape
  dim = params["mlp1_b1"].shape[-1]
  c_pad = params["head_w2"].shape[-1]
  g = num_groups

  def pad_edges(ei):
    e = ei.shape[1]
    e_pad = ((e + EDGE_ALIGN - 1) // EDGE_ALIGN) * EDGE_ALIGN
    return jnp.pad(ei.astype(jnp.int32), ((0, 0), (0, e_pad - e)),
                   constant_values=-1)

  e1 = pad_edges(edge_index_1)
  e2 = pad_edges(edge_index_2)
  i1 = index_1.reshape(1, n).astype(jnp.int32)
  i2 = index_2.reshape(1, n).astype(jnp.int32)

  inputs = (x.astype(jnp.float32), e1, e2, i1, i2,
            params["gcn11_w"], params["gcn12_w"], params["gcn1_b"],
            params["mlp1_w1"], params["mlp1_b1"],
            params["mlp1_w2"], params["mlp1_b2"],
            params["gcn21_w"], params["gcn22_w"], params["gcn2_b"],
            params["mlp2_w1"], params["mlp2_b1"],
            params["mlp2_w2"], params["mlp2_b2"],
            params["head_w1"], params["head_b1"],
            params["head_w2"], params["head_b2"])

  e_pad = e1.shape[1]
  mm = lambda m_, k_, n_: 2 * m_ * k_ * n_
  flops = (2 * mm(n, e_pad, n)                          # adjacency one-hot contractions
           + 2 * mm(n, n, din) + 2 * mm(n, din, dim)    # layer-1 GCN pair
           + mm(n, 2 * dim, dim) + mm(n, dim, dim)      # mlp_1
           + 2 * mm(n, n, dim) + 2 * mm(n, dim, dim)    # layer-2 GCN pair
           + mm(n, 2 * dim, dim) + mm(n, dim, dim)      # mlp_2
           + 2 * mm(g, n, dim)                          # mean pooling
           + mm(g, 2 * dim, dim) + mm(g, dim, c_pad))   # head
  bytes_accessed = (sum(int(a.size) * a.dtype.itemsize for a in inputs)
                    + g * c_pad * 4)

  vmem = pl.BlockSpec(memory_space=pltpu.MemorySpace.VMEM)
  out = pl.pallas_call(
      _fused_net_kernel,
      out_shape=jax.ShapeDtypeStruct((g, c_pad), jnp.float32),
      in_specs=[vmem] * len(inputs),
      out_specs=vmem,
      cost_estimate=pl.CostEstimate(flops=flops,
                                    transcendentals=g * c_pad + 2 * n,
                                    bytes_accessed=bytes_accessed),
  )(*inputs)
  return out[:, :num_classes]


# ----------------------------------------------------------------------------
# Pure-JAX reference (same math, HIGHEST-precision dots) for validation
# ----------------------------------------------------------------------------
def reference_forward(params, x, edge_index_1, edge_index_2, index_1, index_2,
                      num_groups, num_classes=NUM_CLASSES):
  hp = jax.lax.Precision.HIGHEST
  rdot = lambda a, b: jnp.dot(a, b, precision=hp)
  n = x.shape[0]

  def a_hat(ei):
    src, dst = ei[0], ei[1]
    a = jnp.zeros((n, n), jnp.float32).at[dst, src].add(1.0)
    diag = jnp.diagonal(a)
    a = a + jnp.diag(jnp.where(diag > 0.0, 0.0, 1.0))   # add_remaining_self_loops
    deg = a.sum(axis=1)
    dinv = 1.0 / jnp.sqrt(deg)
    return a * dinv[:, None] * dinv[None, :]

  def pool(idx):
    oh = (idx[None, :] == jnp.arange(num_groups)[:, None]).astype(jnp.float32)
    cnt = jnp.maximum(oh.sum(axis=1, keepdims=True), 1.0)
    return oh / cnt

  a1, a2 = a_hat(edge_index_1), a_hat(edge_index_2)
  p1, p2 = pool(index_1), pool(index_2)

  def layer(xx, gw1, gw2, gb, mw1, mb1, mw2, mb2):
    xc = jnp.concatenate([rdot(rdot(a1, xx), gw1),
                          rdot(rdot(a2, xx), gw2)], axis=-1)
    xc = jnp.maximum(xc + gb, 0.0)
    h = jnp.maximum(rdot(xc, mw1) + mb1, 0.0)
    return rdot(h, mw2) + mb2

  xx = layer(x.astype(jnp.float32),
             params["gcn11_w"], params["gcn12_w"], params["gcn1_b"],
             params["mlp1_w1"], params["mlp1_b1"],
             params["mlp1_w2"], params["mlp1_b2"])
  xx = layer(xx, params["gcn21_w"], params["gcn22_w"], params["gcn2_b"],
             params["mlp2_w1"], params["mlp2_b1"],
             params["mlp2_w2"], params["mlp2_b2"])

  gcat = jnp.concatenate([rdot(p1, xx), rdot(p2, xx)], axis=-1)
  h = jnp.maximum(rdot(gcat, params["head_w1"]) + params["head_b1"], 0.0)
  logits = (rdot(h, params["head_w2"][:, :num_classes])
            + params["head_b2"][:, :num_classes])
  return jax.nn.log_softmax(logits, axis=-1)


# ----------------------------------------------------------------------------
# Parameters (Linear: normal weights, zero bias, matching Net._init_weights
# structure; demo weights are scaled by 1/sqrt(fan_in) so the numerical
# cross-check is well conditioned — the kernel itself is init-agnostic).
# ----------------------------------------------------------------------------
def init_params(key, input_dim, dim, num_classes, class_pad):
  ks = jax.random.split(key, 10)
  rnd = lambda k, shp: (jax.random.normal(k, shp, jnp.float32)
                        / jnp.sqrt(jnp.float32(shp[0])))
  p = {}
  p["gcn11_w"] = rnd(ks[0], (input_dim, dim))
  p["gcn12_w"] = rnd(ks[1], (input_dim, dim))
  p["gcn1_b"] = jnp.zeros((1, 2 * dim), jnp.float32)
  p["gcn21_w"] = rnd(ks[2], (dim, dim))
  p["gcn22_w"] = rnd(ks[3], (dim, dim))
  p["gcn2_b"] = jnp.zeros((1, 2 * dim), jnp.float32)
  p["mlp1_w1"] = rnd(ks[4], (2 * dim, dim))
  p["mlp1_b1"] = jnp.zeros((1, dim), jnp.float32)
  p["mlp1_w2"] = rnd(ks[5], (dim, dim))
  p["mlp1_b2"] = jnp.zeros((1, dim), jnp.float32)
  p["mlp2_w1"] = rnd(ks[6], (2 * dim, dim))
  p["mlp2_b1"] = jnp.zeros((1, dim), jnp.float32)
  p["mlp2_w2"] = rnd(ks[7], (dim, dim))
  p["mlp2_b2"] = jnp.zeros((1, dim), jnp.float32)
  p["head_w1"] = rnd(ks[8], (2 * dim, dim))
  p["head_b1"] = jnp.zeros((1, dim), jnp.float32)
  # Head 2nd layer lane-padded to class_pad: zero weight columns and -1e30
  # bias columns beyond num_classes (they vanish under log_softmax).
  w2 = rnd(ks[9], (dim, num_classes))
  p["head_w2"] = jnp.zeros((dim, class_pad), jnp.float32).at[:, :num_classes].set(w2)
  p["head_b2"] = jnp.full((1, class_pad), -1e30, jnp.float32).at[:, :num_classes].set(0.0)
  return p


if __name__ == "__main__":
  N, INPUT_DIM, G, E = 16, 8, 4, 40

  key = jax.random.PRNGKey(0)
  k_x, k_e1, k_e2, k_p = jax.random.split(key, 4)

  # data.x
  x = jax.random.normal(k_x, (N, INPUT_DIM), jnp.float32)
  # data.edge_index_1 / edge_index_2
  edge_index_1 = jax.random.randint(k_e1, (2, E), 0, N, jnp.int32)
  edge_index_2 = jax.random.randint(k_e2, (2, E), 0, N, jnp.int32)
  # data.index_1 / index_2 (every group non-empty)
  index_1 = jnp.arange(N, dtype=jnp.int32) % G
  index_2 = jnp.arange(N, dtype=jnp.int32) // (N // G)

  params = init_params(k_p, INPUT_DIM, DIM, NUM_CLASSES, CLASS_PAD)

  run = jax.jit(functools.partial(net_forward, num_groups=G))
  out = jax.block_until_ready(
      run(params, x, edge_index_1, edge_index_2, index_1, index_2))

  ref_fn = jax.jit(functools.partial(reference_forward, num_groups=G))
  ref = jax.block_until_ready(
      ref_fn(params, x, edge_index_1, edge_index_2, index_1, index_2))

  assert out.shape == (G, NUM_CLASSES) and out.dtype == jnp.float32
  assert bool(jnp.all(jnp.isfinite(out)))
  # rows of log_softmax should exp-sum to 1
  assert bool(jnp.all(jnp.abs(jnp.sum(jnp.exp(out), axis=1) - 1.0) < 1e-3))
  # kernel vs pure-JAX reference (loose tol: MXU f32 matmul precision modes)
  assert float(jnp.max(jnp.abs(out - ref))) < 5e-2
  print("KERNEL_OK")
</pallas_src>

<mosaic_0001>
module attributes {stable_mosaic.version = 11 : i64} {
  func.func @_fused_net_kernel(%arg0: memref<16x8xf32, #tpu.memory_space<vmem>>, %arg1: memref<2x128xi32, #tpu.memory_space<vmem>>, %arg2: memref<2x128xi32, #tpu.memory_space<vmem>>, %arg3: memref<1x16xi32, #tpu.memory_space<vmem>>, %arg4: memref<1x16xi32, #tpu.memory_space<vmem>>, %arg5: memref<8x256xf32, #tpu.memory_space<vmem>>, %arg6: memref<8x256xf32, #tpu.memory_space<vmem>>, %arg7: memref<1x512xf32, #tpu.memory_space<vmem>>, %arg8: memref<512x256xf32, #tpu.memory_space<vmem>>, %arg9: memref<1x256xf32, #tpu.memory_space<vmem>>, %arg10: memref<256x256xf32, #tpu.memory_space<vmem>>, %arg11: memref<1x256xf32, #tpu.memory_space<vmem>>, %arg12: memref<256x256xf32, #tpu.memory_space<vmem>>, %arg13: memref<256x256xf32, #tpu.memory_space<vmem>>, %arg14: memref<1x512xf32, #tpu.memory_space<vmem>>, %arg15: memref<512x256xf32, #tpu.memory_space<vmem>>, %arg16: memref<1x256xf32, #tpu.memory_space<vmem>>, %arg17: memref<256x256xf32, #tpu.memory_space<vmem>>, %arg18: memref<1x256xf32, #tpu.memory_space<vmem>>, %arg19: memref<512x256xf32, #tpu.memory_space<vmem>>, %arg20: memref<1x256xf32, #tpu.memory_space<vmem>>, %arg21: memref<256x128xf32, #tpu.memory_space<vmem>>, %arg22: memref<1x128xf32, #tpu.memory_space<vmem>>, %arg23: memref<4x128xf32, #tpu.memory_space<vmem>>) attributes {dimension_semantics = [], scalar_prefetch = 0 : i64, scratch_operands = 0 : i64, tpu.core_type = #tpu.core_type<tc>} {
    %c0 = arith.constant 0 : index
    %c0_0 = arith.constant 0 : index
    %0 = vector.load %arg1[%c0, %c0_0] : memref<2x128xi32, #tpu.memory_space<vmem>>, vector<2x128xi32>
    %1 = vector.extract_strided_slice %0 {offsets = [0, 0], sizes = [1, 128], strides = [1, 1]} : vector<2x128xi32> to vector<1x128xi32>
    %2 = vector.extract_strided_slice %0 {offsets = [1, 0], sizes = [1, 128], strides = [1, 1]} : vector<2x128xi32> to vector<1x128xi32>
    %3 = tpu.iota {dimensions = array<i32: 0>} : vector<16x128xi32>
    %4 = vector.broadcast %2 : vector<1x128xi32> to vector<16x128xi32>
    %5 = arith.cmpi eq, %4, %3 : vector<16x128xi32>
    %cst = arith.constant 1.000000e+00 : f32
    %cst_1 = arith.constant 0.000000e+00 : f32
    %6 = vector.broadcast %cst : f32 to vector<16x128xf32>
    %7 = vector.broadcast %cst_1 : f32 to vector<16x128xf32>
    %8 = arith.select %5, %6, %7 : vector<16x128xi1>, vector<16x128xf32>
    %9 = vector.broadcast %1 : vector<1x128xi32> to vector<16x128xi32>
    %10 = arith.cmpi eq, %9, %3 : vector<16x128xi32>
    %cst_2 = arith.constant 1.000000e+00 : f32
    %cst_3 = arith.constant 0.000000e+00 : f32
    %11 = vector.broadcast %cst_2 : f32 to vector<16x128xf32>
    %12 = vector.broadcast %cst_3 : f32 to vector<16x128xf32>
    %13 = arith.select %10, %11, %12 : vector<16x128xi1>, vector<16x128xf32>
    %cst_4 = arith.constant dense<0.000000e+00> : vector<16x16xf32>
    %14 = tpu.matmul %8, %13, %cst_4 {dimension_numbers = #tpu.dot_dimension_numbers<[1], [1], [0], [0], [0, 0, 1, 0], [], []>} : vector<16x128xf32>, vector<16x128xf32>, vector<16x16xf32> -> vector<16x16xf32>
    %15 = tpu.iota {dimensions = array<i32: 0>} : vector<16x16xi32>
    %16 = tpu.iota {dimensions = array<i32: 1>} : vector<16x16xi32>
    %17 = arith.cmpi eq, %15, %16 : vector<16x16xi32>
    %cst_5 = arith.constant 1.000000e+00 : f32
    %cst_6 = arith.constant 0.000000e+00 : f32
    %18 = vector.broadcast %cst_5 : f32 to vector<16x16xf32>
    %19 = vector.broadcast %cst_6 : f32 to vector<16x16xf32>
    %20 = arith.select %17, %18, %19 : vector<16x16xi1>, vector<16x16xf32>
    %21 = arith.mulf %14, %20 : vector<16x16xf32>
    %cst_7 = arith.constant dense<0.000000e+00> : vector<16xf32>
    %22 = vector.multi_reduction <add>, %21, %cst_7 [1] : vector<16x16xf32> to vector<16xf32>
    %23 = vector.shape_cast %22 : vector<16xf32> to vector<16x1xf32>
    %cst_8 = arith.constant 0.000000e+00 : f32
    %24 = vector.broadcast %cst_8 : f32 to vector<16x1xf32>
    %25 = arith.cmpf ogt, %23, %24 : vector<16x1xf32>
    %cst_9 = arith.constant 0.000000e+00 : f32
    %cst_10 = arith.constant 1.000000e+00 : f32
    %26 = vector.broadcast %cst_9 : f32 to vector<16x1xf32>
    %27 = vector.broadcast %cst_10 : f32 to vector<16x1xf32>
    %28 = arith.select %25, %26, %27 : vector<16x1xi1>, vector<16x1xf32>
    %29 = vector.broadcast %28 : vector<16x1xf32> to vector<16x16xf32>
    %30 = arith.mulf %20, %29 : vector<16x16xf32>
    %31 = arith.addf %14, %30 : vector<16x16xf32>
    %cst_11 = arith.constant dense<0.000000e+00> : vector<16xf32>
    %32 = vector.multi_reduction <add>, %31, %cst_11 [1] : vector<16x16xf32> to vector<16xf32>
    %33 = vector.shape_cast %32 : vector<16xf32> to vector<16x1xf32>
    %34 = math.rsqrt %33 : vector<16x1xf32>
    %35 = vector.broadcast %34 : vector<16x1xf32> to vector<16x16xf32>
    %36 = arith.mulf %35, %31 : vector<16x16xf32>
    %c0_12 = arith.constant 0 : index
    %c0_13 = arith.constant 0 : index
    %37 = vector.load %arg2[%c0_12, %c0_13] : memref<2x128xi32, #tpu.memory_space<vmem>>, vector<2x128xi32>
    %38 = vector.extract_strided_slice %37 {offsets = [0, 0], sizes = [1, 128], strides = [1, 1]} : vector<2x128xi32> to vector<1x128xi32>
    %39 = vector.extract_strided_slice %37 {offsets = [1, 0], sizes = [1, 128], strides = [1, 1]} : vector<2x128xi32> to vector<1x128xi32>
    %40 = tpu.iota {dimensions = array<i32: 0>} : vector<16x128xi32>
    %41 = vector.broadcast %39 : vector<1x128xi32> to vector<16x128xi32>
    %42 = arith.cmpi eq, %41, %40 : vector<16x128xi32>
    %cst_14 = arith.constant 1.000000e+00 : f32
    %cst_15 = arith.constant 0.000000e+00 : f32
    %43 = vector.broadcast %cst_14 : f32 to vector<16x128xf32>
    %44 = vector.broadcast %cst_15 : f32 to vector<16x128xf32>
    %45 = arith.select %42, %43, %44 : vector<16x128xi1>, vector<16x128xf32>
    %46 = vector.broadcast %38 : vector<1x128xi32> to vector<16x128xi32>
    %47 = arith.cmpi eq, %46, %40 : vector<16x128xi32>
    %cst_16 = arith.constant 1.000000e+00 : f32
    %cst_17 = arith.constant 0.000000e+00 : f32
    %48 = vector.broadcast %cst_16 : f32 to vector<16x128xf32>
    %49 = vector.broadcast %cst_17 : f32 to vector<16x128xf32>
    %50 = arith.select %47, %48, %49 : vector<16x128xi1>, vector<16x128xf32>
    %cst_18 = arith.constant dense<0.000000e+00> : vector<16x16xf32>
    %51 = tpu.matmul %45, %50, %cst_18 {dimension_numbers = #tpu.dot_dimension_numbers<[1], [1], [0], [0], [0, 0, 1, 0], [], []>} : vector<16x128xf32>, vector<16x128xf32>, vector<16x16xf32> -> vector<16x16xf32>
    %52 = tpu.iota {dimensions = array<i32: 0>} : vector<16x16xi32>
    %53 = tpu.iota {dimensions = array<i32: 1>} : vector<16x16xi32>
    %54 = arith.cmpi eq, %52, %53 : vector<16x16xi32>
    %cst_19 = arith.constant 1.000000e+00 : f32
    %cst_20 = arith.constant 0.000000e+00 : f32
    %55 = vector.broadcast %cst_19 : f32 to vector<16x16xf32>
    %56 = vector.broadcast %cst_20 : f32 to vector<16x16xf32>
    %57 = arith.select %54, %55, %56 : vector<16x16xi1>, vector<16x16xf32>
    %58 = arith.mulf %51, %57 : vector<16x16xf32>
    %cst_21 = arith.constant dense<0.000000e+00> : vector<16xf32>
    %59 = vector.multi_reduction <add>, %58, %cst_21 [1] : vector<16x16xf32> to vector<16xf32>
    %60 = vector.shape_cast %59 : vector<16xf32> to vector<16x1xf32>
    %cst_22 = arith.constant 0.000000e+00 : f32
    %61 = vector.broadcast %cst_22 : f32 to vector<16x1xf32>
    %62 = arith.cmpf ogt, %60, %61 : vector<16x1xf32>
    %cst_23 = arith.constant 0.000000e+00 : f32
    %cst_24 = arith.constant 1.000000e+00 : f32
    %63 = vector.broadcast %cst_23 : f32 to vector<16x1xf32>
    %64 = vector.broadcast %cst_24 : f32 to vector<16x1xf32>
    %65 = arith.select %62, %63, %64 : vector<16x1xi1>, vector<16x1xf32>
    %66 = vector.broadcast %65 : vector<16x1xf32> to vector<16x16xf32>
    %67 = arith.mulf %57, %66 : vector<16x16xf32>
    %68 = arith.addf %51, %67 : vector<16x16xf32>
    %cst_25 = arith.constant dense<0.000000e+00> : vector<16xf32>
    %69 = vector.multi_reduction <add>, %68, %cst_25 [1] : vector<16x16xf32> to vector<16xf32>
    %70 = vector.shape_cast %69 : vector<16xf32> to vector<16x1xf32>
    %71 = math.rsqrt %70 : vector<16x1xf32>
    %72 = vector.broadcast %71 : vector<16x1xf32> to vector<16x16xf32>
    %73 = arith.mulf %72, %68 : vector<16x16xf32>
    %c0_26 = arith.constant 0 : index
    %c0_27 = arith.constant 0 : index
    %74 = vector.load %arg0[%c0_26, %c0_27] : memref<16x8xf32, #tpu.memory_space<vmem>>, vector<16x8xf32>
    %c0_28 = arith.constant 0 : index
    %c0_29 = arith.constant 0 : index
    %75 = vector.load %arg5[%c0_28, %c0_29] : memref<8x256xf32, #tpu.memory_space<vmem>>, vector<8x256xf32>
    %c0_30 = arith.constant 0 : index
    %c0_31 = arith.constant 0 : index
    %76 = vector.load %arg6[%c0_30, %c0_31] : memref<8x256xf32, #tpu.memory_space<vmem>>, vector<8x256xf32>
    %c0_32 = arith.constant 0 : index
    %c0_33 = arith.constant 0 : index
    %77 = vector.load %arg7[%c0_32, %c0_33] : memref<1x512xf32, #tpu.memory_space<vmem>>, vector<1x512xf32>
    %c0_34 = arith.constant 0 : index
    %c0_35 = arith.constant 0 : index
    %78 = vector.load %arg8[%c0_34, %c0_35] : memref<512x256xf32, #tpu.memory_space<vmem>>, vector<512x256xf32>
    %c0_36 = arith.constant 0 : index
    %c0_37 = arith.constant 0 : index
    %79 = vector.load %arg9[%c0_36, %c0_37] : memref<1x256xf32, #tpu.memory_space<vmem>>, vector<1x256xf32>
    %c0_38 = arith.constant 0 : index
    %c0_39 = arith.constant 0 : index
    %80 = vector.load %arg10[%c0_38, %c0_39] : memref<256x256xf32, #tpu.memory_space<vmem>>, vector<256x256xf32>
    %c0_40 = arith.constant 0 : index
    %c0_41 = arith.constant 0 : index
    %81 = vector.load %arg11[%c0_40, %c0_41] : memref<1x256xf32, #tpu.memory_space<vmem>>, vector<1x256xf32>
    %82 = vector.broadcast %34 : vector<16x1xf32> to vector<16x8xf32>
    %83 = arith.mulf %82, %74 : vector<16x8xf32>
    %cst_42 = arith.constant dense<0.000000e+00> : vector<16x8xf32>
    %84 = tpu.matmul %36, %83, %cst_42 {dimension_numbers = #tpu.dot_dimension_numbers<[1], [0], [0], [1], [0, 0, 1, 1], [], []>} : vector<16x16xf32>, vector<16x8xf32>, vector<16x8xf32> -> vector<16x8xf32>
    %85 = vector.broadcast %71 : vector<16x1xf32> to vector<16x8xf32>
    %86 = arith.mulf %85, %74 : vector<16x8xf32>
    %cst_43 = arith.constant dense<0.000000e+00> : vector<16x8xf32>
    %87 = tpu.matmul %73, %86, %cst_43 {dimension_numbers = #tpu.dot_dimension_numbers<[1], [0], [0], [1], [0, 0, 1, 1], [], []>} : vector<16x16xf32>, vector<16x8xf32>, vector<16x8xf32> -> vector<16x8xf32>
    %cst_44 = arith.constant dense<0.000000e+00> : vector<16x256xf32>
    %88 = tpu.matmul %84, %75, %cst_44 {dimension_numbers = #tpu.dot_dimension_numbers<[1], [0], [0], [1], [0, 0, 1, 1], [], []>} : vector<16x8xf32>, vector<8x256xf32>, vector<16x256xf32> -> vector<16x256xf32>
    %cst_45 = arith.constant dense<0.000000e+00> : vector<16x256xf32>
    %89 = tpu.matmul %87, %76, %cst_45 {dimension_numbers = #tpu.dot_dimension_numbers<[1], [0], [0], [1], [0, 0, 1, 1], [], []>} : vector<16x8xf32>, vector<8x256xf32>, vector<16x256xf32> -> vector<16x256xf32>
    %90 = tpu.concatenate %88, %89 in 1 : vector<16x256xf32>, vector<16x256xf32> -> vector<16x512xf32>
    %91 = vector.broadcast %77 : vector<1x512xf32> to vector<16x512xf32>
    %92 = arith.addf %90, %91 : vector<16x512xf32>
    %cst_46 = arith.constant 0.000000e+00 : f32
    %93 = vector.broadcast %cst_46 : f32 to vector<16x512xf32>
    %94 = arith.maximumf %92, %93 : vector<16x512xf32>
    %cst_47 = arith.constant dense<0.000000e+00> : vector<16x256xf32>
    %95 = tpu.matmul %94, %78, %cst_47 {dimension_numbers = #tpu.dot_dimension_numbers<[1], [0], [0], [1], [0, 0, 1, 1], [], []>} : vector<16x512xf32>, vector<512x256xf32>, vector<16x256xf32> -> vector<16x256xf32>
    %96 = vector.broadcast %79 : vector<1x256xf32> to vector<16x256xf32>
    %97 = arith.addf %95, %96 : vector<16x256xf32>
    %cst_48 = arith.constant 0.000000e+00 : f32
    %98 = vector.broadcast %cst_48 : f32 to vector<16x256xf32>
    %99 = arith.maximumf %97, %98 : vector<16x256xf32>
    %cst_49 = arith.constant dense<0.000000e+00> : vector<16x256xf32>
    %100 = tpu.matmul %99, %80, %cst_49 {dimension_numbers = #tpu.dot_dimension_numbers<[1], [0], [0], [1], [0, 0, 1, 1], [], []>} : vector<16x256xf32>, vector<256x256xf32>, vector<16x256xf32> -> vector<16x256xf32>
    %101 = vector.broadcast %81 : vector<1x256xf32> to vector<16x256xf32>
    %102 = arith.addf %100, %101 : vector<16x256xf32>
    %c0_50 = arith.constant 0 : index
    %c0_51 = arith.constant 0 : index
    %103 = vector.load %arg12[%c0_50, %c0_51] : memref<256x256xf32, #tpu.memory_space<vmem>>, vector<256x256xf32>
    %c0_52 = arith.constant 0 : index
    %c0_53 = arith.constant 0 : index
    %104 = vector.load %arg13[%c0_52, %c0_53] : memref<256x256xf32, #tpu.memory_space<vmem>>, vector<256x256xf32>
    %c0_54 = arith.constant 0 : index
    %c0_55 = arith.constant 0 : index
    %105 = vector.load %arg14[%c0_54, %c0_55] : memref<1x512xf32, #tpu.memory_space<vmem>>, vector<1x512xf32>
    %c0_56 = arith.constant 0 : index
    %c0_57 = arith.constant 0 : index
    %106 = vector.load %arg15[%c0_56, %c0_57] : memref<512x256xf32, #tpu.memory_space<vmem>>, vector<512x256xf32>
    %c0_58 = arith.constant 0 : index
    %c0_59 = arith.constant 0 : index
    %107 = vector.load %arg16[%c0_58, %c0_59] : memref<1x256xf32, #tpu.memory_space<vmem>>, vector<1x256xf32>
    %c0_60 = arith.constant 0 : index
    %c0_61 = arith.constant 0 : index
    %108 = vector.load %arg17[%c0_60, %c0_61] : memref<256x256xf32, #tpu.memory_space<vmem>>, vector<256x256xf32>
    %c0_62 = arith.constant 0 : index
    %c0_63 = arith.constant 0 : index
    %109 = vector.load %arg18[%c0_62, %c0_63] : memref<1x256xf32, #tpu.memory_space<vmem>>, vector<1x256xf32>
    %110 = vector.broadcast %34 : vector<16x1xf32> to vector<16x256xf32>
    %111 = arith.mulf %110, %102 : vector<16x256xf32>
    %cst_64 = arith.constant dense<0.000000e+00> : vector<16x256xf32>
    %112 = tpu.matmul %36, %111, %cst_64 {dimension_numbers = #tpu.dot_dimension_numbers<[1], [0], [0], [1], [0, 0, 1, 1], [], []>} : vector<16x16xf32>, vector<16x256xf32>, vector<16x256xf32> -> vector<16x256xf32>
    %113 = vector.broadcast %71 : vector<16x1xf32> to vector<16x256xf32>
    %114 = arith.mulf %113, %102 : vector<16x256xf32>
    %cst_65 = arith.constant dense<0.000000e+00> : vector<16x256xf32>
    %115 = tpu.matmul %73, %114, %cst_65 {dimension_numbers = #tpu.dot_dimension_numbers<[1], [0], [0], [1], [0, 0, 1, 1], [], []>} : vector<16x16xf32>, vector<16x256xf32>, vector<16x256xf32> -> vector<16x256xf32>
    %cst_66 = arith.constant dense<0.000000e+00> : vector<16x256xf32>
    %116 = tpu.matmul %112, %103, %cst_66 {dimension_numbers = #tpu.dot_dimension_numbers<[1], [0], [0], [1], [0, 0, 1, 1], [], []>} : vector<16x256xf32>, vector<256x256xf32>, vector<16x256xf32> -> vector<16x256xf32>
    %cst_67 = arith.constant dense<0.000000e+00> : vector<16x256xf32>
    %117 = tpu.matmul %115, %104, %cst_67 {dimension_numbers = #tpu.dot_dimension_numbers<[1], [0], [0], [1], [0, 0, 1, 1], [], []>} : vector<16x256xf32>, vector<256x256xf32>, vector<16x256xf32> -> vector<16x256xf32>
    %118 = tpu.concatenate %116, %117 in 1 : vector<16x256xf32>, vector<16x256xf32> -> vector<16x512xf32>
    %119 = vector.broadcast %105 : vector<1x512xf32> to vector<16x512xf32>
    %120 = arith.addf %118, %119 : vector<16x512xf32>
    %cst_68 = arith.constant 0.000000e+00 : f32
    %121 = vector.broadcast %cst_68 : f32 to vector<16x512xf32>
    %122 = arith.maximumf %120, %121 : vector<16x512xf32>
    %cst_69 = arith.constant dense<0.000000e+00> : vector<16x256xf32>
    %123 = tpu.matmul %122, %106, %cst_69 {dimension_numbers = #tpu.dot_dimension_numbers<[1], [0], [0], [1], [0, 0, 1, 1], [], []>} : vector<16x512xf32>, vector<512x256xf32>, vector<16x256xf32> -> vector<16x256xf32>
    %124 = vector.broadcast %107 : vector<1x256xf32> to vector<16x256xf32>
    %125 = arith.addf %123, %124 : vector<16x256xf32>
    %cst_70 = arith.constant 0.000000e+00 : f32
    %126 = vector.broadcast %cst_70 : f32 to vector<16x256xf32>
    %127 = arith.maximumf %125, %126 : vector<16x256xf32>
    %cst_71 = arith.constant dense<0.000000e+00> : vector<16x256xf32>
    %128 = tpu.matmul %127, %108, %cst_71 {dimension_numbers = #tpu.dot_dimension_numbers<[1], [0], [0], [1], [0, 0, 1, 1], [], []>} : vector<16x256xf32>, vector<256x256xf32>, vector<16x256xf32> -> vector<16x256xf32>
    %129 = vector.broadcast %109 : vector<1x256xf32> to vector<16x256xf32>
    %130 = arith.addf %128, %129 : vector<16x256xf32>
    %c0_72 = arith.constant 0 : index
    %c0_73 = arith.constant 0 : index
    %131 = vector.load %arg3[%c0_72, %c0_73] : memref<1x16xi32, #tpu.memory_space<vmem>>, vector<1x16xi32>
    %132 = tpu.iota {dimensions = array<i32: 0>} : vector<4x16xi32>
    %133 = vector.broadcast %131 : vector<1x16xi32> to vector<4x16xi32>
    %134 = arith.cmpi eq, %133, %132 : vector<4x16xi32>
    %cst_74 = arith.constant 1.000000e+00 : f32
    %cst_75 = arith.constant 0.000000e+00 : f32
    %135 = vector.broadcast %cst_74 : f32 to vector<4x16xf32>
    %136 = vector.broadcast %cst_75 : f32 to vector<4x16xf32>
    %137 = arith.select %134, %135, %136 : vector<4x16xi1>, vector<4x16xf32>
    %cst_76 = arith.constant dense<0.000000e+00> : vector<4xf32>
    %138 = vector.multi_reduction <add>, %137, %cst_76 [1] : vector<4x16xf32> to vector<4xf32>
    %139 = vector.shape_cast %138 : vector<4xf32> to vector<4x1xf32>
    %cst_77 = arith.constant 1.000000e+00 : f32
    %140 = vector.broadcast %cst_77 : f32 to vector<4x1xf32>
    %141 = arith.maximumf %139, %140 : vector<4x1xf32>
    %142 = vector.broadcast %141 : vector<4x1xf32> to vector<4x16xf32>
    %143 = arith.divf %137, %142 : vector<4x16xf32>
    %cst_78 = arith.constant dense<0.000000e+00> : vector<4x256xf32>
    %144 = tpu.matmul %143, %130, %cst_78 {dimension_numbers = #tpu.dot_dimension_numbers<[1], [0], [0], [1], [0, 0, 1, 1], [], []>} : vector<4x16xf32>, vector<16x256xf32>, vector<4x256xf32> -> vector<4x256xf32>
    %c0_79 = arith.constant 0 : index
    %c0_80 = arith.constant 0 : index
    %145 = vector.load %arg4[%c0_79, %c0_80] : memref<1x16xi32, #tpu.memory_space<vmem>>, vector<1x16xi32>
    %146 = tpu.iota {dimensions = array<i32: 0>} : vector<4x16xi32>
    %147 = vector.broadcast %145 : vector<1x16xi32> to vector<4x16xi32>
    %148 = arith.cmpi eq, %147, %146 : vector<4x16xi32>
    %cst_81 = arith.constant 1.000000e+00 : f32
    %cst_82 = arith.constant 0.000000e+00 : f32
    %149 = vector.broadcast %cst_81 : f32 to vector<4x16xf32>
    %150 = vector.broadcast %cst_82 : f32 to vector<4x16xf32>
    %151 = arith.select %148, %149, %150 : vector<4x16xi1>, vector<4x16xf32>
    %cst_83 = arith.constant dense<0.000000e+00> : vector<4xf32>
    %152 = vector.multi_reduction <add>, %151, %cst_83 [1] : vector<4x16xf32> to vector<4xf32>
    %153 = vector.shape_cast %152 : vector<4xf32> to vector<4x1xf32>
    %cst_84 = arith.constant 1.000000e+00 : f32
    %154 = vector.broadcast %cst_84 : f32 to vector<4x1xf32>
    %155 = arith.maximumf %153, %154 : vector<4x1xf32>
    %156 = vector.broadcast %155 : vector<4x1xf32> to vector<4x16xf32>
    %157 = arith.divf %151, %156 : vector<4x16xf32>
    %cst_85 = arith.constant dense<0.000000e+00> : vector<4x256xf32>
    %158 = tpu.matmul %157, %130, %cst_85 {dimension_numbers = #tpu.dot_dimension_numbers<[1], [0], [0], [1], [0, 0, 1, 1], [], []>} : vector<4x16xf32>, vector<16x256xf32>, vector<4x256xf32> -> vector<4x256xf32>
    %159 = tpu.concatenate %144, %158 in 1 : vector<4x256xf32>, vector<4x256xf32> -> vector<4x512xf32>
    %c0_86 = arith.constant 0 : index
    %c0_87 = arith.constant 0 : index
    %160 = vector.load %arg19[%c0_86, %c0_87] : memref<512x256xf32, #tpu.memory_space<vmem>>, vector<512x256xf32>
    %cst_88 = arith.constant dense<0.000000e+00> : vector<4x256xf32>
    %161 = tpu.matmul %159, %160, %cst_88 {dimension_numbers = #tpu.dot_dimension_numbers<[1], [0], [0], [1], [0, 0, 1, 1], [], []>} : vector<4x512xf32>, vector<512x256xf32>, vector<4x256xf32> -> vector<4x256xf32>
    %c0_89 = arith.constant 0 : index
    %c0_90 = arith.constant 0 : index
    %162 = vector.load %arg20[%c0_89, %c0_90] : memref<1x256xf32, #tpu.memory_space<vmem>>, vector<1x256xf32>
    %163 = vector.broadcast %162 : vector<1x256xf32> to vector<4x256xf32>
    %164 = arith.addf %161, %163 : vector<4x256xf32>
    %cst_91 = arith.constant 0.000000e+00 : f32
    %165 = vector.broadcast %cst_91 : f32 to vector<4x256xf32>
    %166 = arith.maximumf %164, %165 : vector<4x256xf32>
    %c0_92 = arith.constant 0 : index
    %c0_93 = arith.constant 0 : index
    %167 = vector.load %arg21[%c0_92, %c0_93] : memref<256x128xf32, #tpu.memory_space<vmem>>, vector<256x128xf32>
    %cst_94 = arith.constant dense<0.000000e+00> : vector<4x128xf32>
    %168 = tpu.matmul %166, %167, %cst_94 {dimension_numbers = #tpu.dot_dimension_numbers<[1], [0], [0], [1], [0, 0, 1, 1], [], []>} : vector<4x256xf32>, vector<256x128xf32>, vector<4x128xf32> -> vector<4x128xf32>
    %c0_95 = arith.constant 0 : index
    %c0_96 = arith.constant 0 : index
    %169 = vector.load %arg22[%c0_95, %c0_96] : memref<1x128xf32, #tpu.memory_space<vmem>>, vector<1x128xf32>
    %170 = vector.broadcast %169 : vector<1x128xf32> to vector<4x128xf32>
    %171 = arith.addf %168, %170 : vector<4x128xf32>
    %cst_97 = arith.constant dense<0xFF800000> : vector<4xf32>
    %172 = vector.multi_reduction <maximumf>, %171, %cst_97 [1] : vector<4x128xf32> to vector<4xf32>
    %173 = vector.shape_cast %172 : vector<4xf32> to vector<4x1xf32>
    %174 = vector.broadcast %173 : vector<4x1xf32> to vector<4x128xf32>
    %175 = arith.subf %171, %174 : vector<4x128xf32>
    %176 = math.exp %175 : vector<4x128xf32>
    %cst_98 = arith.constant dense<0.000000e+00> : vector<4xf32>
    %177 = vector.multi_reduction <add>, %176, %cst_98 [1] : vector<4x128xf32> to vector<4xf32>
    %178 = vector.shape_cast %177 : vector<4xf32> to vector<4x1xf32>
    %179 = math.log %178 : vector<4x1xf32>
    %180 = arith.addf %173, %179 : vector<4x1xf32>
    %181 = vector.broadcast %180 : vector<4x1xf32> to vector<4x128xf32>
    %182 = arith.subf %171, %181 : vector<4x128xf32>
    %c0_99 = arith.constant 0 : index
    %c0_100 = arith.constant 0 : index
    %183 = vector.load %arg23[%c0_99, %c0_100] : memref<4x128xf32, #tpu.memory_space<vmem>>, vector<4x128xf32>
    tpu.vector_store %arg23[%c0_99, %c0_100], %182 {strides = array<i32>} : memref<4x128xf32, #tpu.memory_space<vmem>>, vector<4x128xf32>,
    return
  }
}

</mosaic_0001>

<bundles_post_ra>
// kernel: net_forward.1
= control target key start
LH: loop header
LB: loop body
LE: loop exit
PB: predicated region body
PF: predicated region fallthrough
CT: control target
= control target key end

     0   :  { %s4346_s0 = inlined_call_operand.vmem [shape: f32[16,8], index: 0, kind: input, shape index: {}]   ;;  %s4347_s1 = inlined_call_operand.vmem [shape: s32[2,128], index: 1, kind: input, shape index: {}]   ;;  %s4348_s2 = inlined_call_operand.vmem [shape: s32[2,128], index: 2, kind: input, shape index: {}]   ;;  %s4349_s3 = inlined_call_operand.vmem [shape: s32[1,16], index: 3, kind: input, shape index: {}]   ;;  %s4350_s4 = inlined_call_operand.vmem [shape: s32[1,16], index: 4, kind: input, shape index: {}]   ;;  %s4351_s5 = inlined_call_operand.vmem [shape: f32[8,256], index: 5, kind: input, shape index: {}]   ;;  %s4352_s6 = inlined_call_operand.vmem [shape: f32[8,256], index: 6, kind: input, shape index: {}]   ;;  %s4353_s7 = inlined_call_operand.vmem [shape: f32[1,512], index: 7, kind: input, shape index: {}]   ;;  %s4354_s8 = inlined_call_operand.hbm [shape: f32[512,256], index: 8, kind: input, shape index: {}]   ;;  %s4355_s9 = inlined_call_operand.vmem [shape: f32[1,256], index: 9, kind: input, shape index: {}]   ;;  %s4356_s10 = inlined_call_operand.hbm [shape: f32[256,256], index: 10, kind: input, shape index: {}]   ;;  %s4357_s11 = inlined_call_operand.vmem [shape: f32[1,256], index: 11, kind: input, shape index: {}]   ;;  %s4358_s12 = inlined_call_operand.hbm [shape: f32[256,256], index: 12, kind: input, shape index: {}]   ;;  %s4359_s13 = inlined_call_operand.hbm [shape: f32[256,256], index: 13, kind: input, shape index: {}]   ;;  %s4360_s14 = inlined_call_operand.vmem [shape: f32[1,512], index: 14, kind: input, shape index: {}]   ;;  %s4361_s15 = inlined_call_operand.hbm [shape: f32[512,256], index: 15, kind: input, shape index: {}]   ;;  %s4362_s16 = inlined_call_operand.vmem [shape: f32[1,256], index: 16, kind: input, shape index: {}]   ;;  %s4363_s17 = inlined_call_operand.hbm [shape: f32[256,256], index: 17, kind: input, shape index: {}]   ;;  %s4364_s18 = inlined_call_operand.vmem [shape: f32[1,256], index: 18, kind: input, shape index: {}]   ;;  %s4365_s19 = inlined_call_operand.hbm [shape: f32[512,256], index: 19, kind: input, shape index: {}]   ;;  %s4366_s20 = inlined_call_operand.vmem [shape: f32[1,256], index: 20, kind: input, shape index: {}]   ;;  %s4367_s21 = inlined_call_operand.hbm [shape: f32[256,128], index: 21, kind: input, shape index: {}]   ;;  %s4368_s22 = inlined_call_operand.vmem [shape: f32[1,128], index: 22, kind: input, shape index: {}]   ;;  %s4369_s23 = inlined_call_operand.hbm [shape: f32[4,128], index: 23, kind: output, shape index: {}]  }
   0x1   :  { %4373 = sst [smem:[#allocation23_spill]] %s4346_s0 }
   0x2   :  { %4374 = sst [smem:[#allocation24_spill]] %s4347_s1 }
   0x3   :  { %4375 = sst [smem:[#allocation25_spill]] %s4348_s2 }
   0x4   :  { %4376 = sst [smem:[#allocation26_spill]] %s4349_s3 }
   0x5   :  { %4377 = sst [smem:[#allocation27_spill]] %s4350_s4 }
   0x6   :  { %4378 = sst [smem:[#allocation28_spill]] %s4351_s5 }
   0x7   :  { %4379 = sst [smem:[#allocation29_spill]] %s4352_s6 }
   0x8   :  { %4380 = sst [smem:[#allocation30_spill]] %s4353_s7 }
   0x9   :  { %28 = vsyncpa [#allocation3], 0 }
   0xa   :  { %29 = vsyncpa [#allocation6], 0 }
   0xb   :  { %30 = vsyncpa [#allocation9], 0 }
   0xc   :  { %31 = vsyncpa [#allocation12], 0 }
   0xd   :  { %32 = vsyncpa [#allocation15], 0 }
   0xe   :  { %33 = vsyncpa [#allocation4], 0  ;;  %s3863_s4 = smov [#allocation5]   ;;  %s3864_s24 = smov [#allocation8]  }
   0xf   :  { %s69_s30 = sshll.u32 %s3863_s4, 4  ;;  %s95_s25 = sshll.u32 %s3864_s24, 4  ;;  %s70_s30 = int_to_ptr.vmem [resolvable:$true] %s69_s30  ;;  %s3999_s25 = int_to_ptr.vmem [resolvable:$true] %s95_s25 }
  0x10   :  { %s3653_s26 = scalar_lea.hbm %s4356_s10, 8192 }
  0x11   :  { %p3654_p0 = scmp.ne.s32.totalorder %s4356_s10, %s3653_s26  ;;  %p3657_p1 = scmp.lt.u32.totalorder %s3653_s26, %s4356_s10 }
  0x13   :  { %p3659_p2 = pnand %p3657_p1, %p3654_p0 }
  0x15   :  { %3662 = shalt.err (!%p3659_p2)
}
  0x16   :  { %s3663_s28 = scalar_lea.vmem %s70_s30, 8192  ;;  %p3668_p4 = scmp.lt.s32.totalorder %s70_s30, %s70_s30 }
  0x17   :  { %p3664_p3 = scmp.ne.s32.totalorder %s70_s30, %s3663_s28  ;;  %p3669_p5 = scmp.lt.s32.totalorder %s3663_s28, %s3663_s28 }
  0x19   :  { %p3670_p6 = por %p3669_p5, %p3668_p4 }
  0x1b   :  { %p3671_p7 = pnand %p3670_p6, %p3664_p3 }
  0x1d   :  { %3674 = shalt.err (!%p3671_p7)
}
  0x1e   :  { %s3865_s29 = smov 256   ;;  %s3866_s3 = smov 16  }
  0x1f   :  { %75 = dma.hbm_to_vmem [thread:$0]  %s4356_s10, 8192, %s70_s30, [#allocation6], %s3865_s29, %s3865_s29, %s3866_s3  }
  0x20   :  { %s3675_s1 = scalar_lea.hbm %s4359_s13, 8192 }
  0x21   :  { %p3676_p8 = scmp.ne.s32.totalorder %s4359_s13, %s3675_s1  ;;  %p3679_p9 = scmp.lt.u32.totalorder %s3675_s1, %s4359_s13 }
  0x23   :  { %p3681_p10 = pnand %p3679_p9, %p3676_p8 }
  0x25   :  { %3684 = shalt.err (!%p3681_p10)
}
  0x26   :  { %s3685_s7 = scalar_lea.vmem %s3999_s25, 8192  ;;  %p3690_p12 = scmp.lt.s32.totalorder %s3999_s25, %s3999_s25 }
  0x27   :  { %p3686_p11 = scmp.ne.s32.totalorder %s3999_s25, %s3685_s7  ;;  %p3691_p13 = scmp.lt.s32.totalorder %s3685_s7, %s3685_s7 }
  0x29   :  { %p3692_p0 = por %p3691_p13, %p3690_p12 }
  0x2b   :  { %p3693_p1 = pnand %p3692_p0, %p3686_p11 }
  0x2d   :  { %3696 = shalt.err (!%p3693_p1)
}
  0x2e   :  { %101 = dma.hbm_to_vmem [thread:$0]  %s4359_s13, 8192, %s3999_s25, [#allocation9], %s3865_s29, %s3865_s29, %s3866_s3  }
  0x2f   :  { %s3867_s28 = smov [#allocation11]   ;;  %s3868_s4 = smov [#allocation2]  }
  0x30   :  { %s123_s0 = sshll.u32 %s3867_s28, 4  ;;  %s55_s24 = sshll.u32 %s3868_s4, 4  ;;  %s124_s0 = int_to_ptr.vmem [resolvable:$true] %s123_s0  ;;  %s4036_s24 = int_to_ptr.vmem [resolvable:$true] %s55_s24 }
  0x31   :  { %s3697_s26 = scalar_lea.hbm %s4363_s17, 8192 }
  0x32   :  { %p3698_p2 = scmp.ne.s32.totalorder %s4363_s17, %s3697_s26  ;;  %p3701_p3 = scmp.lt.u32.totalorder %s3697_s26, %s4363_s17 }
  0x34   :  { %p3703_p4 = pnand %p3701_p3, %p3698_p2 }
  0x36   :  { %3706 = shalt.err (!%p3703_p4)
}
  0x37   :  { %s3707_s13 = scalar_lea.vmem %s124_s0, 8192  ;;  %p3712_p6 = scmp.lt.s32.totalorder %s124_s0, %s124_s0 }
  0x38   :  { %p3708_p5 = scmp.ne.s32.totalorder %s124_s0, %s3707_s13  ;;  %p3713_p7 = scmp.lt.s32.totalorder %s3707_s13, %s3707_s13 }
  0x3a   :  { %p3714_p8 = por %p3713_p7, %p3712_p6 }
  0x3c   :  { %p3715_p9 = pnand %p3714_p8, %p3708_p5 }
  0x3e   :  { %3718 = shalt.err (!%p3715_p9)
}
  0x3f   :  { %129 = dma.hbm_to_vmem [thread:$0]  %s4363_s17, 8192, %s124_s0, [#allocation12], %s3865_s29, %s3865_s29, %s3866_s3  }
  0x40   :  { %s3719_s4 = scalar_lea.hbm %s4354_s8, 16384 }
  0x41   :  { %p3720_p10 = scmp.ne.s32.totalorder %s4354_s8, %s3719_s4  ;;  %p3723_p11 = scmp.lt.u32.totalorder %s3719_s4, %s4354_s8 }
  0x43   :  { %p3725_p12 = pnand %p3723_p11, %p3720_p10 }
  0x45   :  { %3728 = shalt.err (!%p3725_p12)
}
  0x46   :  { %s3729_s6 = scalar_lea.vmem %s4036_s24, 16384  ;;  %p3734_p0 = scmp.lt.s32.totalorder %s4036_s24, %s4036_s24 }
  0x47   :  { %p3730_p13 = scmp.ne.s32.totalorder %s4036_s24, %s3729_s6  ;;  %p3735_p1 = scmp.lt.s32.totalorder %s3729_s6, %s3729_s6 }
  0x49   :  { %p3736_p2 = por %p3735_p1, %p3734_p0 }
  0x4b   :  { %p3737_p3 = pnand %p3736_p2, %p3730_p13 }
  0x4d   :  { %3740 = shalt.err (!%p3737_p3)
}
  0x4e   :  { %61 = dma.hbm_to_vmem [thread:$0]  %s4354_s8, 16384, %s4036_s24, [#allocation3], %s3865_s29, %s3865_s29, %s3866_s3  }
  0x4f   :  { %s3869_s27 = smov [#allocation7]   ;;  %s3870_s13 = smov [#allocation10]  }
  0x50   :  { %s83_s7 = sshll.u32 %s3869_s27, 4  ;;  %s109_s25 = sshll.u32 %s3870_s13, 4  ;;  %s84_s7 = int_to_ptr.vmem [resolvable:$true] %s83_s7  ;;  %s4073_s25 = int_to_ptr.vmem [resolvable:$true] %s109_s25 }
  0x51   :  { %s3741_s28 = scalar_lea.hbm %s4358_s12, 8192 }
  0x52   :  { %p3742_p4 = scmp.ne.s32.totalorder %s4358_s12, %s3741_s28  ;;  %p3745_p5 = scmp.lt.u32.totalorder %s3741_s28, %s4358_s12 }
  0x54   :  { %p3747_p6 = pnand %p3745_p5, %p3742_p4 }
  0x56   :  { %3750 = shalt.err (!%p3747_p6)
}
  0x57   :  { %s3751_s8 = scalar_lea.vmem %s84_s7, 8192  ;;  %p3756_p8 = scmp.lt.s32.totalorder %s84_s7, %s84_s7 }
  0x58   :  { %p3752_p7 = scmp.ne.s32.totalorder %s84_s7, %s3751_s8  ;;  %p3757_p9 = scmp.lt.s32.totalorder %s3751_s8, %s3751_s8 }
  0x5a   :  { %p3758_p10 = por %p3757_p9, %p3756_p8 }
  0x5c   :  { %p3759_p11 = pnand %p3758_p10, %p3752_p7 }
  0x5e   :  { %3762 = shalt.err (!%p3759_p11)
}
  0x5f   :  { %89 = dma.hbm_to_vmem [thread:$0]  %s4358_s12, 8192, %s84_s7, [#allocation6], %s3865_s29, %s3865_s29, %s3866_s3  }
  0x60   :  { %s3763_s0 = scalar_lea.hbm %s4361_s15, 16384 }
  0x61   :  { %p3764_p12 = scmp.ne.s32.totalorder %s4361_s15, %s3763_s0  ;;  %p3767_p13 = scmp.lt.u32.totalorder %s3763_s0, %s4361_s15 }
  0x63   :  { %p3769_p0 = pnand %p3767_p13, %p3764_p12 }
  0x65   :  { %3772 = shalt.err (!%p3769_p0)
}
  0x66   :  { %s3773_s28 = scalar_lea.vmem %s4073_s25, 16384  ;;  %p3778_p2 = scmp.lt.s32.totalorder %s4073_s25, %s4073_s25 }
  0x67   :  { %p3774_p1 = scmp.ne.s32.totalorder %s4073_s25, %s3773_s28  ;;  %p3779_p3 = scmp.lt.s32.totalorder %s3773_s28, %s3773_s28 }
  0x69   :  { %p3780_p4 = por %p3779_p3, %p3778_p2 }
  0x6b   :  { %p3781_p5 = pnand %p3780_p4, %p3774_p1 }
  0x6d   :  { %3784 = shalt.err (!%p3781_p5)
}
  0x6e   :  { %115 = dma.hbm_to_vmem [thread:$0]  %s4361_s15, 16384, %s4073_s25, [#allocation9], %s3865_s29, %s3865_s29, %s3866_s3  }
  0x6f   :  { %s3871_s4 = smov [#allocation13]   ;;  %s3872_s1 = smov [#allocation14]  }
  0x70   :  { %s137_s5 = sshll.u32 %s3871_s4, 4  ;;  %s151_s26 = sshll.u32 %s3872_s1, 4  ;;  %s138_s5 = int_to_ptr.vmem [resolvable:$true] %s137_s5  ;;  %s4110_s26 = int_to_ptr.vmem [resolvable:$true] %s151_s26 }
  0x71   :  { %s3785_s2 = scalar_lea.hbm %s4365_s19, 16384 }
  0x72   :  { %p3786_p6 = scmp.ne.s32.totalorder %s4365_s19, %s3785_s2  ;;  %p3789_p7 = scmp.lt.u32.totalorder %s3785_s2, %s4365_s19 }
  0x74   :  { %p3791_p8 = pnand %p3789_p7, %p3786_p6 }
  0x76   :  { %3794 = shalt.err (!%p3791_p8)
}
  0x77   :  { %s3795_s15 = scalar_lea.vmem %s138_s5, 16384  ;;  %p3800_p10 = scmp.lt.s32.totalorder %s138_s5, %s138_s5 }
  0x78   :  { %p3796_p9 = scmp.ne.s32.totalorder %s138_s5, %s3795_s15  ;;  %p3801_p11 = scmp.lt.s32.totalorder %s3795_s15, %s3795_s15 }
  0x7a   :  { %p3802_p12 = por %p3801_p11, %p3800_p10 }
  0x7c   :  { %p3803_p13 = pnand %p3802_p12, %p3796_p9 }
  0x7e   :  { %3806 = shalt.err (!%p3803_p13)
}
  0x7f   :  { %143 = dma.hbm_to_vmem [thread:$0]  %s4365_s19, 16384, %s138_s5, [#allocation12], %s3865_s29, %s3865_s29, %s3866_s3  }
  0x80   :  { %s3807_s28 = scalar_lea.hbm %s4367_s21, 4096 }
  0x81   :  { %p3808_p0 = scmp.ne.s32.totalorder %s4367_s21, %s3807_s28  ;;  %p3811_p1 = scmp.lt.u32.totalorder %s3807_s28, %s4367_s21 }
  0x83   :  { %p3813_p2 = pnand %p3811_p1, %p3808_p0 }
  0x85   :  { %3816 = shalt.err (!%p3813_p2)
}
  0x86   :  { %s3817_s8 = scalar_lea.vmem %s4110_s26, 4096  ;;  %p3822_p4 = scmp.lt.s32.totalorder %s4110_s26, %s4110_s26 }
  0x87   :  { %p3818_p3 = scmp.ne.s32.totalorder %s4110_s26, %s3817_s8  ;;  %p3823_p5 = scmp.lt.s32.totalorder %s3817_s8, %s3817_s8 }
  0x89   :  { %p3824_p6 = por %p3823_p5, %p3822_p4 }
  0x8b   :  { %p3825_p7 = pnand %p3824_p6, %p3818_p3 }
  0x8d   :  { %3828 = shalt.err (!%p3825_p7)
}
  0x8e   :  { %s3873_s19 = smov 128   ;;  %s3874_s29 = smov 8  }
  0x8f   :  { %157 = dma.hbm_to_vmem [thread:$0]  %s4367_s21, 4096, %s4110_s26, [#allocation15], %s3873_s19, %s3873_s19, %s3874_s29  }
  0x90   :  { %3851 = dma.done.wait [#allocation3], 16384  }
  0x91   :  { %3852 = vsyncadd [#allocation3], 4294950912 }
  0x92   :  { %3853 = dma.done.wait [#allocation6], 16384  }
  0x93   :  { %3854 = vsyncadd [#allocation6], 4294950912 }
  0x94   :  { %3855 = dma.done.wait [#allocation9], 24576  }
  0x95   :  { %3856 = vsyncadd [#allocation9], 4294942720 }
  0x96   :  { %3857 = dma.done.wait [#allocation12], 24576  }
  0x97   :  { %3858 = vsyncadd [#allocation12], 4294942720 }
  0x98   :  { %3859 = dma.done.wait [#allocation15], 4096  }
  0x99   :  { %3860 = vsyncadd [#allocation15], 4294963200  ;;  %v185_v0 = vlaneseq  ;;  %s4381_s24 = sld [smem:[#allocation24_spill]]  ;;  %s4382_s17 = sld [smem:[#allocation25_spill]]  ;;  %v3875_v10 = vmov 1.0   ;;  %v3877_v14 = vmov 0.0  }
  0x9a   :  { %v3876_v11 = vmov 1.0|1.0   ;;  %vm287_vm12 = vcmask 130048   ;;  %s4383_s15 = sld [smem:[#allocation23_spill]]  ;;  %s4384_s28 = sld [smem:[#allocation28_spill]] }
  0x9b   :  { %v4144_v1 = vshrl.u32 %v185_v0, 7  ;;  %v280_v13 = vand.u32 127, %v185_v0  ;;  %s4385_s8 = sld [smem:[#allocation29_spill]]  ;;  %s4386_s21 = sld [smem:[#allocation30_spill]] }
  0x9c   :  { %s4387_s0 = sld [smem:[#allocation26_spill]]  ;;  %s4388_s25 = sld [smem:[#allocation27_spill]] }
  0x9d   :  { %v4147_v2 = vsub.s32 0, %v4144_v1  ;;  %v4150_v3 = vsub.s32 1, %v4144_v1  ;;  %v187_v4 = vadd.s32 8, %v4144_v1  ;;  %vm281_vm10 = vcmp.eq.s32.totalorder %v4144_v1, %v280_v13 }
  0x9e   :  { %v283_v15 = vsel %vm281_vm10, 1.0, %v3877_v14 }
  0x9f   :  { %v184_v5 = vld [vmem:[%s4381_s24] sm:$0x3]  ;;  %vm282_vm11 = vcmp.eq.s32.totalorder %v187_v4, %v280_v13  ;;  %v440_v13 = vld [vmem:[#allocation2 + $0x18] sm:$0xff] }
  0xa0   :  { %v312_v6 = vld [vmem:[%s4382_s17] sm:$0x3]  ;;  %v199_v7 = vrot.slane %v184_v5, %v4147_v2  ;;  %v191_v8 = vrot.slane %v184_v5, %v4150_v3  ;;  %v284_v17 = vsel %vm282_vm11, 1.0, %v3877_v14  ;;  %v431_v56 = vld [vmem:[%s4383_s15 + $0x8] sm:$0xff] }
  0xa1   :  { %v324_v9 = vrot.slane %v312_v6, %v4147_v2  ;;  %v316_v12 = vrot.slane %v312_v6, %v4150_v3  ;;  %v430_v55 = vld [vmem:[%s4383_s15] sm:$0xff] }
  0xa2   :  { %vm200_vm0 = vcmp.eq.s32.totalorder %v199_v7, %v4144_v1  ;;  %vm201_vm1 = vcmp.eq.s32.totalorder %v199_v7, %v187_v4  ;;  %vm192_vm2 = vcmp.eq.s32.totalorder %v191_v8, %v4144_v1  ;;  %vm193_vm7 = vcmp.eq.s32.totalorder %v191_v8, %v187_v4  ;;  %v433_v8 = vld [vmem:[%s4384_s28 + $0x8] sm:$0xff] }
  0xa3   :  { %vm2897_vm3 = vmpackc.low %vm201_vm1, %vm200_vm0  ;;  %2873 = vmatprep.mubr.msk.f32.mxu0 %vm192_vm2, %v3875_v10  ;;  %vm325_vm4 = vcmp.eq.s32.totalorder %v324_v9, %v4144_v1  ;;  %vm326_vm5 = vcmp.eq.s32.totalorder %v324_v9, %v187_v4  ;;  %vm317_vm8 = vcmp.eq.s32.totalorder %v316_v12, %v4144_v1  ;;  %vm318_vm9 = vcmp.eq.s32.totalorder %v316_v12, %v187_v4  ;;  %v432_v9 = vld [vmem:[%s4384_s28] sm:$0xff]  ;;  %v438_v12 = vld [vmem:[#allocation2 + $0x8] sm:$0xff] }
  0xa4   :  { %2898 = vmatprep.subr.msk.bf16.mxu0 %vm2897_vm3, %v3876_v11  ;;  %vm2901_vm6 = vmpackc.low %vm326_vm5, %vm325_vm4  ;;  %vm797_vm1 = vcmask 64512   ;;  %vm2198_vm2 = vcmask 125952   ;;  %vm2759_vm5 = vcmask 1043456  }
  0xa5   :  { %2900 = vmatpush3.bf16.xpose.msk.msra.mxu0 %vm2897_vm3, %v3876_v11 }
  0xa6   :  { %2902 = vmatprep.subr.msk.bf16.mxu0 %vm2901_vm6, %v3876_v11 }
  0xac   :  { %2874 = vmatmul.mubr.msk.f32.vlgmr.msra.gmra.mrb[0].mxu0 %vm193_vm7, %v3875_v10 }
  0xad   :  { %2904 = vmatpush3.bf16.xpose.msk.msra.mxu0 %vm2901_vm6, %v3876_v11  ;;  %2880 = vmatprep.mubr.msk.f32.mxu0 %vm317_vm8, %v3875_v10  ;;  %v434_v11 = vld [vmem:[%s4385_s8] sm:$0xff] }
  0xb4   :  { %2881 = vmatmul.mubr.msk.f32.vlgmr.msra.gmra.mrb[2].mxu0 %vm318_vm9, %v3875_v10 }
 0x17f   :  { %v2875_v16 = vpop.f32.mrb[0].mxu0 }
 0x180   :  { %v270_v18 = vpop.f32.mrb[1].mxu0  ;;  %v286_v20 = vmul.f32 %v2875_v16, %v284_v17 }
 0x181   :  { %v285_v19 = vmul.f32 %v283_v15, %v270_v18 }
 0x182   :  { %v291_v23 = vsel %vm287_vm12, %v286_v20, 0.0  ;;  %v503_v20 = vld [vmem:[#allocation2 + $0x210] sm:$0xff] }
 0x183   :  { %v288_v21 = vsel %vm287_vm12, %v285_v19, 0.0  ;;  %v501_v19 = vld [vmem:[#allocation2 + $0x200] sm:$0xff] }
 0x184   :  { %289 = vadd.xlane.f32.xlu0 %v288_v21  ;;  %v506_v21 = vld [vmem:[#allocation2 + $0x228] sm:$0xff] }
 0x187   :  { %v2882_v22 = vpop.f32.mrb[2].mxu0 }
 0x188   :  { %v395_v24 = vpop.f32.mrb[3].mxu0  ;;  %292 = vadd.xlane.f32.xlu0 %v291_v23  ;;  %v405_v26 = vmul.f32 %v2882_v22, %v284_v17  ;;  %v2979_v23 = vpack.c.bf16 %v503_v20, %v501_v19  ;;  %v454_v19 = vld [vmem:[#allocation2 + $0x88] sm:$0xff] }
 0x189   :  { %v404_v25 = vmul.f32 %v395_v24, %v283_v15 }
 0x18a   :  { %v409_v28 = vsel %vm287_vm12, %v405_v26, 0.0  ;;  %v505_v26 = vld [vmem:[#allocation2 + $0x220] sm:$0xff] }
 0x18b   :  { %v406_v27 = vsel %vm287_vm12, %v404_v25, 0.0 }
 0x18c   :  { %407 = vadd.xlane.f32.xlu1 %v406_v27  ;;  %v507_v27 = vld [vmem:[#allocation2 + $0x230] sm:$0xff] }
 0x190   :  { %410 = vadd.xlane.f32.xlu1 %v409_v28 }
 0x211   :  { %v290_v29 = vpop.xlane.xlu0 %289 }
 0x212   :  { %vm294_vm13 = vcmp.gt.f32.partialorder %v290_v29, 0.0  ;;  %v510_v29 = vld [vmem:[#allocation2 + $0x248] sm:$0xff] }
 0x213   :  { %v296_v30 = vsel %vm294_vm13, 0.0, %v3875_v10 }
 0x214   :  { %v298_v31 = vmul.f32 %v296_v30, %v283_v15  ;;  %v512_v30 = vld [vmem:[#allocation2 + $0x258] sm:$0xff] }
 0x215   :  { %v293_v32 = vpop.xlane.xlu0 %292 }
 0x216   :  { %vm295_vm14 = vcmp.gt.f32.partialorder %v293_v32, 0.0  ;;  %v300_v33 = vadd.f32 %v298_v31, %v270_v18  ;;  %v2983_v31 = vpack.c.bf16 %v507_v27, %v505_v26  ;;  %v437_v32 = vld [vmem:[#allocation2] sm:$0xff]  ;;  %v528_v26 = vld [vmem:[#allocation2 + $0x2d8] sm:$0xff] }
 0x217   :  { %v297_v34 = vsel %vm295_vm14, 0.0, %v3875_v10 }
 0x218   :  { %v299_v35 = vmul.f32 %v297_v34, %v284_v17  ;;  %v302_v36 = vsel %vm287_vm12, %v300_v33, 0.0  ;;  %v442_v34 = vld [vmem:[#allocation2 + $0x28] sm:$0xff] }
 0x219   :  { %v408_v37 = vpop.xlane.xlu1 %407  ;;  %303 = vadd.xlane.f32.xlu0 %v302_v36  ;;  %v444_v36 = vld [vmem:[#allocation2 + $0x38] sm:$0xff] }
 0x21a   :  { %vm412_vm15 = vcmp.gt.f32.partialorder %v408_v37, 0.0  ;;  %v301_v38 = vadd.f32 %v2875_v16, %v299_v35  ;;  %v502_v16 = vld [vmem:[#allocation2 + $0x208] sm:$0xff]  ;;  %v2985_v35 = vpack.c.bf16 %v512_v30, %v510_v29  ;;  %v509_v37 = vld [vmem:[#allocation2 + $0x240] sm:$0xff]  ;;  %v455_v30 = vld [vmem:[#allocation2 + $0x90] sm:$0xff] }
 0x21b   :  { %v414_v39 = vsel %vm412_vm15, 0.0, %v3875_v10  ;;  %v453_v29 = vld [vmem:[#allocation2 + $0x80] sm:$0xff] }
 0x21c   :  { %v416_v40 = vmul.f32 %v414_v39, %v283_v15  ;;  %v305_v41 = vsel %vm287_vm12, %v301_v38, 0.0  ;;  %v2913_v15 = vpack.c.bf16 %v440_v13, %v438_v12  ;;  %v514_v39 = vld [vmem:[#allocation2 + $0x268] sm:$0xff]  ;;  %v524_v13 = vld [vmem:[#allocation2 + $0x2b8] sm:$0xff] }
 0x21d   :  { %v411_v42 = vpop.xlane.xlu1 %410  ;;  %306 = vadd.xlane.f32.xlu1 %v305_v41  ;;  %v522_v12 = vld [vmem:[#allocation2 + $0x2a8] sm:$0xff] }
 0x21e   :  { %vm413_vm0 = vcmp.gt.f32.partialorder %v411_v42, 0.0  ;;  %v418_v43 = vadd.f32 %v416_v40, %v395_v24  ;;  %v516_v40 = vld [vmem:[#allocation2 + $0x278] sm:$0xff] }
 0x21f   :  { %v415_v44 = vsel %vm413_vm0, 0.0, %v3875_v10  ;;  %v435_v10 = vld [vmem:[%s4385_s8 + $0x8] sm:$0xff] }
 0x220   :  { %v417_v45 = vmul.f32 %v415_v44, %v284_v17  ;;  %v420_v46 = vsel %vm287_vm12, %v418_v43, 0.0  ;;  %v504_v17 = vld [vmem:[#allocation2 + $0x218] sm:$0xff]  ;;  %v441_v44 = vld [vmem:[#allocation2 + $0x20] sm:$0xff] }
 0x221   :  { %421 = vadd.xlane.f32.xlu0 %v420_v46  ;;  %v2977_v18 = vpack.c.bf16 %v504_v17, %v502_v16  ;;  %v446_v46 = vld [vmem:[#allocation2 + $0x48] sm:$0xff]  ;;  %v449_v17 = vld [vmem:[#allocation2 + $0x60] sm:$0xff] }
 0x222   :  { %v419_v47 = vadd.f32 %v2882_v22, %v417_v45  ;;  %v508_v22 = vld [vmem:[#allocation2 + $0x238] sm:$0xff]  ;;  %v443_v45 = vld [vmem:[#allocation2 + $0x30] sm:$0xff] }
 0x223   :  { %v2981_v25 = vpack.c.bf16 %v508_v22, %v506_v21  ;;  %v456_v21 = vld [vmem:[#allocation2 + $0x98] sm:$0xff]  ;;  %v2997_v22 = vpack.c.bf16 %v524_v13, %v522_v12  ;;  %v465_v12 = vld [vmem:[#allocation2 + $0xe0] sm:$0xff]  ;;  %v467_v13 = vld [vmem:[#allocation2 + $0xf0] sm:$0xff] }
 0x224   :  { %v423_v48 = vsel %vm287_vm12, %v419_v47, 0.0 }
 0x225   :  { %424 = vadd.xlane.f32.xlu1 %v423_v48 }
 0x2a6   :  { %v304_v49 = vpop.xlane.xlu0 %303 }
 0x2a7   :  { %3637 = vrsqrt.f32 %v304_v49  ;;  %v448_v49 = vld [vmem:[#allocation2 + $0x58] sm:$0xff] }
 0x2aa   :  { %v307_v50 = vpop.xlane.xlu1 %306 }
 0x2ab   :  { %3639 = vrsqrt.f32 %v307_v50  ;;  %v2989_v50 = vpack.c.bf16 %v516_v40, %v514_v39  ;;  %v2931_v39 = vpack.c.bf16 %v455_v30, %v453_v29  ;;  %v476_v29 = vld [vmem:[#allocation2 + $0x138] sm:$0xff] }
 0x2ae   :  { %v422_v51 = vpop.xlane.xlu0 %421 }
 0x2af   :  { %3641 = vrsqrt.f32 %v422_v51  ;;  %v513_v51 = vld [vmem:[#allocation2 + $0x260] sm:$0xff] }
 0x2b1   :  { %v4178_v52 = vpop.eup %3637 }
 0x2b2   :  { %v425_v53 = vpop.xlane.xlu1 %424  ;;  %v4181_v54 = vmul.f32 %v4178_v52, %v300_v33  ;;  %v631_v58 = vmul.f32 %v4178_v52, %v430_v55  ;;  %v439_v33 = vld [vmem:[#allocation2 + $0x10] sm:$0xff] }
 0x2b3   :  { %3643 = vrsqrt.f32 %v425_v53  ;;  %v2915_v41 = vpack.c.bf16 %v439_v33, %v437_v32  ;;  %v515_v53 = vld [vmem:[#allocation2 + $0x270] sm:$0xff]  ;;  %v460_v33 = vld [vmem:[#allocation2 + $0xb8] sm:$0xff] }
 0x2b4   :  { %2887 = vmatprep.mubr.msk.f32.mxu0 %vm287_vm12, %v4181_v54 }
 0x2b5   :  { %v4191_v57 = vpop.eup %3639 }
 0x2b6   :  { %v632_v59 = vmul.f32 %v4191_v57, %v431_v56  ;;  %v4203_v63 = vmul.f32 %v4191_v57, %v301_v38  ;;  %v511_v38 = vld [vmem:[#allocation2 + $0x250] sm:$0xff] }
 0x2b8   :  { %v2905_v60 = vpack.c.bf16 %v632_v59, %v631_v58  ;;  %v2919_v58 = vpack.c.bf16 %v443_v45, %v441_v44  ;;  %v2921_v59 = vpack.c.bf16 %v448_v49, %v446_v46  ;;  %v464_v45 = vld [vmem:[#allocation2 + $0xd8] sm:$0xff]  ;;  %v534_v49 = vld [vmem:[#allocation2 + $0x308] sm:$0xff] }
 0x2b9   :  { %v4195_v61 = vpop.eup %3641 }
 0x2ba   :  { %2906 = vmatprep.subr.bf16.mxu0 %v2905_v60  ;;  %v4198_v62 = vmul.f32 %v4195_v61, %v418_v43  ;;  %v714_v4 = vmul.f32 %v4195_v61, %v430_v55  ;;  %v2917_v43 = vpack.c.bf16 %v444_v36, %v442_v34  ;;  %v518_v55 = vld [vmem:[#allocation2 + $0x288] sm:$0xff]  ;;  %v527_v36 = vld [vmem:[#allocation2 + $0x2d0] sm:$0xff] }
 0x2bb   :  { %2908 = vmatpush3.bf16.msra.mxu0 %v2905_v60  ;;  %v445_v60 = vld [vmem:[#allocation2 + $0x40] sm:$0xff] }
 0x2bc   :  { %2894 = vmatprep.mubr.msk.f32.mxu1 %vm287_vm12, %v4198_v62  ;;  %804 = vmatprep.subr.mxu0 %v433_v8  ;;  %v452_v8 = vld [vmem:[#allocation2 + $0x78] sm:$0xff] }
 0x2bd   :  { %v4205_v0 = vpop.eup %3643 }
 0x2be   :  { %2888 = vmatmul.mubr.msk.f32.vlgmr.msra.gmra.mrb[4].mxu0 %vm287_vm12, %v4203_v63  ;;  %v715_v5 = vmul.f32 %v4205_v0, %v431_v56  ;;  %v4213_v7 = vmul.f32 %v4205_v0, %v419_v47  ;;  %v2987_v47 = vpack.c.bf16 %v511_v38, %v509_v37  ;;  %v520_v56 = vld [vmem:[#allocation2 + $0x298] sm:$0xff]  ;;  %v530_v37 = vld [vmem:[#allocation2 + $0x2e8] sm:$0xff] }
 0x2bf   :  { %868 = vmatprep.mubr.f32.mxu0 %v3877_v14  ;;  %805 = vmatpush1.msra.mxu0 %v432_v9  ;;  %v2993_v9 = vpack.c.bf16 %v520_v56, %v518_v55  ;;  %v532_v38 = vld [vmem:[#allocation2 + $0x2f8] sm:$0xff]  ;;  %v461_v55 = vld [vmem:[#allocation2 + $0xc0] sm:$0xff]  ;;  %v463_v56 = vld [vmem:[#allocation2 + $0xd0] sm:$0xff] }
 0x2c0   :  { %v2909_v6 = vpack.c.bf16 %v715_v5, %v714_v4  ;;  %2978 = vmatprep.subr.bf16.mxu0 %v2977_v18  ;;  %v447_v4 = vld [vmem:[#allocation2 + $0x50] sm:$0xff]  ;;  %v450_v5 = vld [vmem:[#allocation2 + $0x68] sm:$0xff]  ;;  %v3005_v46 = vpack.c.bf16 %v532_v38, %v530_v37  ;;  %v473_v37 = vld [vmem:[#allocation2 + $0x120] sm:$0xff] }
 0x2c1   :  { %v2925_v16 = vpack.c.bf16 %v452_v8, %v450_v5  ;;  %v451_v18 = vld [vmem:[#allocation2 + $0x70] sm:$0xff]  ;;  %v533_v5 = vld [vmem:[#allocation2 + $0x300] sm:$0xff]  ;;  %v538_v8 = vld [vmem:[#allocation2 + $0x328] sm:$0xff] }
 0x2c2   :  { %2910 = vmatprep.subr.bf16.mxu1 %v2909_v6  ;;  %v2927_v27 = vpack.c.bf16 %v451_v18, %v449_v17  ;;  %v472_v17 = vld [vmem:[#allocation2 + $0x118] sm:$0xff]  ;;  %v475_v38 = vld [vmem:[#allocation2 + $0x130] sm:$0xff] }
 0x2c3   :  { %2912 = vmatpush3.bf16.msra.mxu1 %v2909_v6  ;;  %v2991_v6 = vpack.c.bf16 %v515_v53, %v513_v51 }
 0x2c4   :  { %887 = vmatprep.subr.mxu1 %v435_v10  ;;  %v517_v10 = vld [vmem:[#allocation2 + $0x280] sm:$0xff] }
 0x2c6   :  { %2895 = vmatmul.mubr.msk.f32.vlgmr.msra.gmra.mrb[0].mxu1 %vm287_vm12, %v4213_v7 }
 0x2c7   :  { %951 = vmatprep.mubr.f32.mxu1 %v3877_v14  ;;  %888 = vmatpush1.msra.mxu1 %v434_v11  ;;  %v519_v11 = vld [vmem:[#allocation2 + $0x290] sm:$0xff] }
 0x2c8   :  { %2914 = vmatprep.subr.bf16.mxu1 %v2913_v15  ;;  %v2923_v15 = vpack.c.bf16 %v447_v4, %v445_v60  ;;  %v2995_v20 = vpack.c.bf16 %v519_v11, %v517_v10  ;;  %v468_v60 = vld [vmem:[#allocation2 + $0xf8] sm:$0xff]  ;;  %v2939_v10 = vpack.c.bf16 %v463_v56, %v461_v55 }
 0x2c9   :  { %v484_v55 = vld [vmem:[#allocation2 + $0x178] sm:$0xff] }
 0x391   :  { %v2889_v24 = vpop.f32.mrb[4].mxu0 }
 0x392   :  { %v705_v28 = vpop.f32.mrb[5].mxu0 }
 0x393   :  { %2805 = vmatmul.mubr.msk.f32.vlgmr.msra.gmra.mrb[6].mxu0 %vm797_vm1, %v705_v28  ;;  %v2929_v28 = vpack.c.bf16 %v456_v21, %v454_v19  ;;  %v537_v19 = vld [vmem:[#allocation2 + $0x320] sm:$0xff]  ;;  %v542_v21 = vld [vmem:[#allocation2 + $0x348] sm:$0xff] }
 0x394   :  { %874 = vmatprep.mubr.f32.mxu0 %v3877_v14  ;;  %2980 = vmatpush1.bf16.msra.mxu0 %v2979_v23  ;;  %v521_v23 = vld [vmem:[#allocation2 + $0x2a0] sm:$0xff] }
 0x395   :  { %2982 = vmatprep.subr.bf16.mxu0 %v2981_v25  ;;  %v526_v25 = vld [vmem:[#allocation2 + $0x2c8] sm:$0xff] }
 0x396   :  { %v3001_v34 = vpack.c.bf16 %v528_v26, %v526_v25  ;;  %v469_v25 = vld [vmem:[#allocation2 + $0x100] sm:$0xff]  ;;  %v471_v26 = vld [vmem:[#allocation2 + $0x110] sm:$0xff] }
 0x397   :  { %2806 = vmatmul.mubr.msk.f32.gmra.mrb[8].mxu0 %vm797_vm1, %v2889_v24  ;;  %v523_v24 = vld [vmem:[#allocation2 + $0x2b0] sm:$0xff] }
 0x398   :  { %2984 = vmatpush1.bf16.msra.mxu0 %v2983_v31  ;;  %v458_v31 = vld [vmem:[#allocation2 + $0xa8] sm:$0xff]  ;;  %v2999_v32 = vpack.c.bf16 %v523_v24, %v521_v23  ;;  %v2943_v23 = vpack.c.bf16 %v467_v13, %v465_v12  ;;  %v492_v13 = vld [vmem:[#allocation2 + $0x1b8] sm:$0xff] }
 0x399   :  { %v2896_v42 = vpop.f32.mrb[0].mxu1  ;;  %2986 = vmatprep.subr.bf16.mxu0 %v2985_v35  ;;  %v525_v35 = vld [vmem:[#allocation2 + $0x2c0] sm:$0xff]  ;;  %v2933_v40 = vpack.c.bf16 %v460_v33, %v458_v31  ;;  %v546_v33 = vld [vmem:[#allocation2 + $0x368] sm:$0xff] }
 0x39a   :  { %v788_v48 = vpop.f32.mrb[1].mxu1  ;;  %v3003_v44 = vpack.c.bf16 %v527_v36, %v525_v35  ;;  %v541_v31 = vld [vmem:[#allocation2 + $0x340] sm:$0xff]  ;;  %v2947_v35 = vpack.c.bf16 %v471_v26, %v469_v25  ;;  %v490_v12 = vld [vmem:[#allocation2 + $0x1a8] sm:$0xff] }
 0x39b   :  { %2807 = vmatmul.mubr.msk.f32.vlgmr.msra.gmra.mrb[2].mxu1 %vm797_vm1, %v788_v48  ;;  %v531_v48 = vld [vmem:[#allocation2 + $0x2f0] sm:$0xff]  ;;  %v549_v25 = vld [vmem:[#allocation2 + $0x380] sm:$0xff] }
 0x39c   :  { %957 = vmatprep.mubr.f32.mxu1 %v3877_v14  ;;  %2916 = vmatpush1.bf16.msra.mxu1 %v2915_v41  ;;  %v457_v41 = vld [vmem:[#allocation2 + $0xa0] sm:$0xff] }
 0x39d   :  { %2918 = vmatprep.subr.bf16.mxu1 %v2917_v43  ;;  %2988 = vmatpush1.bf16.msra.mxu0 %v2987_v47  ;;  %v462_v43 = vld [vmem:[#allocation2 + $0xc8] sm:$0xff]  ;;  %v529_v47 = vld [vmem:[#allocation2 + $0x2e0] sm:$0xff] }
 0x39e   :  { %2990 = vmatprep.subr.bf16.mxu0 %v2989_v50  ;;  %v536_v50 = vld [vmem:[#allocation2 + $0x318] sm:$0xff]  ;;  %v2937_v53 = vpack.c.bf16 %v464_v45, %v462_v43  ;;  %v545_v43 = vld [vmem:[#allocation2 + $0x360] sm:$0xff]  ;;  %v550_v45 = vld [vmem:[#allocation2 + $0x388] sm:$0xff] }
 0x39f   :  { %2808 = vmatmul.mubr.msk.f32.gmra.mrb[4].mxu1 %vm797_vm1, %v2896_v42  ;;  %v459_v42 = vld [vmem:[#allocation2 + $0xb0] sm:$0xff]  ;;  %v3009_v4 = vpack.c.bf16 %v536_v50, %v534_v49  ;;  %v477_v49 = vld [vmem:[#allocation2 + $0x140] sm:$0xff] }
 0x3a0   :  { %2920 = vmatpush1.bf16.msra.mxu1 %v2919_v58  ;;  %v2935_v51 = vpack.c.bf16 %v459_v42, %v457_v41  ;;  %v466_v58 = vld [vmem:[#allocation2 + $0xe8] sm:$0xff]  ;;  %v480_v41 = vld [vmem:[#allocation2 + $0x158] sm:$0xff]  ;;  %v479_v50 = vld [vmem:[#allocation2 + $0x150] sm:$0xff] }
 0x3a1   :  { %2922 = vmatprep.subr.bf16.mxu1 %v2921_v59  ;;  %2992 = vmatpush1.bf16.msra.mxu0 %v2991_v6  ;;  %v3007_v59 = vpack.c.bf16 %v531_v48, %v529_v47  ;;  %v535_v6 = vld [vmem:[#allocation2 + $0x310] sm:$0xff]  ;;  %v2941_v11 = vpack.c.bf16 %v468_v60, %v466_v58  ;;  %v2951_v47 = vpack.c.bf16 %v475_v38, %v473_v37  ;;  %v481_v60 = vld [vmem:[#allocation2 + $0x160] sm:$0xff] }
 0x3a2   :  { %2994 = vmatprep.subr.bf16.mxu0 %v2993_v9  ;;  %v540_v9 = vld [vmem:[#allocation2 + $0x338] sm:$0xff]  ;;  %v2955_v58 = vpack.c.bf16 %v479_v50, %v477_v49  ;;  %v553_v38 = vld [vmem:[#allocation2 + $0x3a0] sm:$0xff] }
 0x3a3   :  { %v3013_v18 = vpack.c.bf16 %v540_v9, %v538_v8  ;;  %v561_v50 = vld [vmem:[#allocation2 + $0x3e0] sm:$0xff] }
 0x3a4   :  { %2924 = vmatpush1.bf16.msra.mxu1 %v2923_v15  ;;  %v470_v15 = vld [vmem:[#allocation2 + $0x108] sm:$0xff] }
 0x3a5   :  { %2926 = vmatprep.subr.bf16.mxu1 %v2925_v16  ;;  %2996 = vmatpush1.bf16.msra.mxu0 %v2995_v20  ;;  %v3011_v16 = vpack.c.bf16 %v535_v6, %v533_v5  ;;  %v539_v20 = vld [vmem:[#allocation2 + $0x330] sm:$0xff]  ;;  %v2945_v24 = vpack.c.bf16 %v472_v17, %v470_v15  ;;  %v486_v5 = vld [vmem:[#allocation2 + $0x188] sm:$0xff]  ;;  %v488_v6 = vld [vmem:[#allocation2 + $0x198] sm:$0xff] }
 0x3a6   :  { %2998 = vmatprep.subr.bf16.mxu0 %v2997_v22  ;;  %v544_v22 = vld [vmem:[#allocation2 + $0x358] sm:$0xff]  ;;  %v2961_v9 = vpack.c.bf16 %v488_v6, %v486_v5  ;;  %v489_v17 = vld [vmem:[#allocation2 + $0x1a0] sm:$0xff] }
 0x3a7   :  { %v3017_v30 = vpack.c.bf16 %v544_v22, %v542_v21 }
 0x3a8   :  { %2928 = vmatpush1.bf16.msra.mxu1 %v2927_v27  ;;  %v474_v27 = vld [vmem:[#allocation2 + $0x128] sm:$0xff] }
 0x3a9   :  { %2930 = vmatprep.subr.bf16.mxu1 %v2929_v28  ;;  %3000 = vmatpush1.bf16.msra.mxu0 %v2999_v32  ;;  %v3015_v28 = vpack.c.bf16 %v539_v20, %v537_v19  ;;  %v543_v32 = vld [vmem:[#allocation2 + $0x350] sm:$0xff]  ;;  %v2949_v36 = vpack.c.bf16 %v476_v29, %v474_v27  ;;  %v494_v19 = vld [vmem:[#allocation2 + $0x1c8] sm:$0xff]  ;;  %v496_v20 = vld [vmem:[#allocation2 + $0x1d8] sm:$0xff] }
 0x3aa   :  { %3002 = vmatprep.subr.bf16.mxu0 %v3001_v34  ;;  %v548_v34 = vld [vmem:[#allocation2 + $0x378] sm:$0xff]  ;;  %v2969_v22 = vpack.c.bf16 %v496_v20, %v494_v19  ;;  %v551_v27 = vld [vmem:[#allocation2 + $0x390] sm:$0xff]  ;;  %v498_v29 = vld [vmem:[#allocation2 + $0x1e8] sm:$0xff] }
 0x3ab   :  { %v3021_v42 = vpack.c.bf16 %v548_v34, %v546_v33  ;;  %v556_v33 = vld [vmem:[#allocation2 + $0x3b8] sm:$0xff]  ;;  %v497_v34 = vld [vmem:[#allocation2 + $0x1e0] sm:$0xff] }
 0x3ac   :  { %2932 = vmatpush1.bf16.msra.mxu1 %v2931_v39  ;;  %v478_v39 = vld [vmem:[#allocation2 + $0x148] sm:$0xff] }
 0x3ad   :  { %2934 = vmatprep.subr.bf16.mxu1 %v2933_v40  ;;  %3004 = vmatpush1.bf16.msra.mxu0 %v3003_v44  ;;  %v3019_v40 = vpack.c.bf16 %v543_v32, %v541_v31  ;;  %v547_v44 = vld [vmem:[#allocation2 + $0x370] sm:$0xff]  ;;  %v2953_v48 = vpack.c.bf16 %v480_v41, %v478_v39  ;;  %v554_v31 = vld [vmem:[#allocation2 + $0x3a8] sm:$0xff] }
 0x3ae   :  { %3006 = vmatprep.subr.bf16.mxu0 %v3005_v46  ;;  %v552_v46 = vld [vmem:[#allocation2 + $0x398] sm:$0xff]  ;;  %v555_v39 = vld [vmem:[#allocation2 + $0x3b0] sm:$0xff]  ;;  %v558_v41 = vld [vmem:[#allocation2 + $0x3c8] sm:$0xff] }
 0x3af   :  { %v3025_v56 = vpack.c.bf16 %v552_v46, %v550_v45  ;;  %v559_v45 = vld [vmem:[#allocation2 + $0x3d0] sm:$0xff] }
 0x3b0   :  { %2936 = vmatpush1.bf16.msra.mxu1 %v2935_v51  ;;  %v3023_v51 = vpack.c.bf16 %v547_v44, %v545_v43  ;;  %v557_v44 = vld [vmem:[#allocation2 + $0x3c0] sm:$0xff] }
 0x3b1   :  { %2938 = vmatprep.subr.bf16.mxu1 %v2937_v53  ;;  %3008 = vmatpush1.bf16.msra.mxu0 %v3007_v59  ;;  %v482_v53 = vld [vmem:[#allocation2 + $0x168] sm:$0xff]  ;;  %v3035_v46 = vpack.c.bf16 %v559_v45, %v557_v44 }
 0x3b2   :  { %3010 = vmatprep.subr.bf16.mxu0 %v3009_v4  ;;  %v2957_v59 = vpack.c.bf16 %v484_v55, %v482_v53  ;;  %v483_v4 = vld [vmem:[#allocation2 + $0x170] sm:$0xff]  ;;  %v567_v55 = vld [vmem:[#allocation5 + $0x8] sm:$0xff] }
 0x3b3   :  { %v2959_v8 = vpack.c.bf16 %v483_v4, %v481_v60 }
 0x3b4   :  { %2940 = vmatpush1.bf16.msra.mxu1 %v2939_v10  ;;  %v485_v10 = vld [vmem:[#allocation2 + $0x180] sm:$0xff] }
 0x3b5   :  { %2942 = vmatprep.subr.bf16.mxu1 %v2941_v11  ;;  %3012 = vmatpush1.bf16.msra.mxu0 %v3011_v16  ;;  %v487_v11 = vld [vmem:[#allocation2 + $0x190] sm:$0xff]  ;;  %v2965_v16 = vpack.c.bf16 %v492_v13, %v490_v12  ;;  %v979_v13 = vsub.s32 3, %v4144_v1 }
 0x3b6   :  { %3014 = vmatprep.subr.bf16.mxu0 %v3013_v18  ;;  %v2963_v15 = vpack.c.bf16 %v487_v11, %v485_v10  ;;  %v491_v18 = vld [vmem:[#allocation2 + $0x1b0] sm:$0xff]  ;;  %v566_v10 = vld [vmem:[#allocation5] sm:$0xff] }
 0x3b7   :  { %v2967_v21 = vpack.c.bf16 %v491_v18, %v489_v17  ;;  %v568_v11 = vld [vmem:[#allocation5 + $0x10] sm:$0xff] }
 0x3b8   :  { %2944 = vmatpush1.bf16.msra.mxu1 %v2943_v23  ;;  %v493_v23 = vld [vmem:[#allocation2 + $0x1c0] sm:$0xff]  ;;  %v3043_v19 = vpack.c.bf16 %v568_v11, %v566_v10  ;;  %v589_v10 = vld [vmem:[#allocation5 + $0xb8] sm:$0xff] }
 0x3b9   :  { %2946 = vmatprep.subr.bf16.mxu1 %v2945_v24  ;;  %3016 = vmatpush1.bf16.msra.mxu0 %v3015_v28  ;;  %v495_v24 = vld [vmem:[#allocation2 + $0x1d0] sm:$0xff]  ;;  %v3027_v28 = vpack.c.bf16 %v551_v27, %v549_v25  ;;  %v570_v25 = vld [vmem:[#allocation5 + $0x20] sm:$0xff] }
 0x3ba   :  { %3018 = vmatprep.subr.bf16.mxu0 %v3017_v30  ;;  %v2971_v26 = vpack.c.bf16 %v495_v24, %v493_v23  ;;  %v500_v30 = vld [vmem:[#allocation2 + $0x1f8] sm:$0xff] }
 0x3bb   :  { %v2973_v32 = vpack.c.bf16 %v500_v30, %v498_v29  ;;  %v575_v29 = vld [vmem:[#allocation5 + $0x48] sm:$0xff]  ;;  %v577_v30 = vld [vmem:[#allocation5 + $0x58] sm:$0xff] }
 0x3bc   :  { %2948 = vmatpush1.bf16.msra.mxu1 %v2947_v35  ;;  %v499_v35 = vld [vmem:[#allocation2 + $0x1f0] sm:$0xff] }
 0x3bd   :  { %2950 = vmatprep.subr.bf16.mxu1 %v2949_v36  ;;  %3020 = vmatpush1.bf16.msra.mxu0 %v3019_v40  ;;  %v3029_v36 = vpack.c.bf16 %v556_v33, %v554_v31  ;;  %v2975_v37 = vpack.c.bf16 %v499_v35, %v497_v34  ;;  %v3031_v40 = vpack.c.bf16 %v555_v39, %v553_v38  ;;  %v574_v38 = vld [vmem:[#allocation5 + $0x40] sm:$0xff]  ;;  %v576_v39 = vld [vmem:[#allocation5 + $0x50] sm:$0xff] }
 0x3be   :  { %3022 = vmatprep.subr.bf16.mxu0 %v3021_v42  ;;  %v560_v42 = vld [vmem:[#allocation2 + $0x3d8] sm:$0xff]  ;;  %v3051_v45 = vpack.c.bf16 %v576_v39, %v574_v38  ;;  %v602_v39 = vld [vmem:[#allocation5 + $0x120] sm:$0xff] }
 0x3bf   :  { %v3033_v43 = vpack.c.bf16 %v560_v42, %v558_v41  ;;  %v579_v41 = vld [vmem:[#allocation5 + $0x68] sm:$0xff]  ;;  %v581_v42 = vld [vmem:[#allocation5 + $0x78] sm:$0xff] }
 0x3c0   :  { %2952 = vmatpush1.bf16.msra.mxu1 %v2951_v47  ;;  %v562_v47 = vld [vmem:[#allocation2 + $0x3e8] sm:$0xff] }
 0x3c1   :  { %2954 = vmatprep.subr.bf16.mxu1 %v2953_v48  ;;  %3024 = vmatpush1.bf16.msra.mxu0 %v3023_v51  ;;  %v564_v48 = vld [vmem:[#allocation2 + $0x3f8] sm:$0xff]  ;;  %v563_v51 = vld [vmem:[#allocation2 + $0x3f0] sm:$0xff] }
 0x3c2   :  { %3026 = vmatprep.subr.bf16.mxu0 %v3025_v56  ;;  %v3037_v49 = vpack.c.bf16 %v564_v48, %v562_v47  ;;  %v3039_v53 = vpack.c.bf16 %v563_v51, %v561_v50  ;;  %v569_v56 = vld [vmem:[#allocation5 + $0x18] sm:$0xff]  ;;  %v578_v50 = vld [vmem:[#allocation5 + $0x60] sm:$0xff]  ;;  %v580_v51 = vld [vmem:[#allocation5 + $0x70] sm:$0xff] }
 0x3c4   :  { %2956 = vmatpush1.bf16.msra.mxu1 %v2955_v58  ;;  %v3041_v58 = vpack.c.bf16 %v569_v56, %v567_v55  ;;  %v583_v55 = vld [vmem:[#allocation5 + $0x88] sm:$0xff]  ;;  %v585_v56 = vld [vmem:[#allocation5 + $0x98] sm:$0xff] }
 0x3c5   :  { %2958 = vmatprep.subr.bf16.mxu1 %v2957_v59  ;;  %3028 = vmatpush1.bf16.msra.mxu0 %v3027_v28  ;;  %v436_v59 = vld [vmem:[%s4386_s21] sm:$0xf] }
 0x3c6   :  { %3030 = vmatprep.subr.bf16.mxu0 %v3029_v36  ;;  %v968_v60 = vrot.slane %v436_v59, %v4147_v2  ;;  %v972_v4 = vrot.slane %v436_v59, %v4150_v3  ;;  %v980_v28 = vrot.slane %v436_v59, %v979_v13 }
 0x3c8   :  { %2960 = vmatpush1.bf16.msra.mxu1 %v2959_v8 }
 0x3c9   :  { %2962 = vmatprep.subr.bf16.mxu1 %v2961_v9  ;;  %3032 = vmatpush1.bf16.msra.mxu0 %v3031_v40  ;;  %v975_v9 = vsub.s32 2, %v4144_v1 }
 0x3ca   :  { %3034 = vmatprep.subr.bf16.mxu0 %v3033_v43 }
 0x3cb   :  { %v976_v23 = vrot.slane %v436_v59, %v975_v9  ;;  %v3055_v59 = vpack.c.bf16 %v580_v51, %v578_v50  ;;  %v610_v51 = vld [vmem:[#allocation5 + $0x160] sm:$0xff] }
 0x3cc   :  { %2964 = vmatpush1.bf16.msra.mxu1 %v2963_v15  ;;  %v571_v15 = vld [vmem:[#allocation5 + $0x28] sm:$0xff] }
 0x3cd   :  { %2966 = vmatprep.subr.bf16.mxu1 %v2965_v16  ;;  %3036 = vmatpush1.bf16.msra.mxu0 %v3035_v46  ;;  %v573_v16 = vld [vmem:[#allocation5 + $0x38] sm:$0xff] }
 0x3ce   :  { %3038 = vmatprep.subr.bf16.mxu0 %v3037_v49  ;;  %v3045_v24 = vpack.c.bf16 %v573_v16, %v571_v15  ;;  %v3053_v49 = vpack.c.bf16 %v581_v42, %v579_v41  ;;  %v586_v15 = vld [vmem:[#allocation5 + $0xa0] sm:$0xff]  ;;  %v588_v16 = vld [vmem:[#allocation5 + $0xb0] sm:$0xff]  ;;  %v607_v41 = vld [vmem:[#allocation5 + $0x148] sm:$0xff] }
 0x3cf   :  { %v609_v42 = vld [vmem:[#allocation5 + $0x158] sm:$0xff] }
 0x3d0   :  { %2968 = vmatpush1.bf16.msra.mxu1 %v2967_v21 }
 0x3d1   :  { %2970 = vmatprep.subr.bf16.mxu1 %v2969_v22  ;;  %3040 = vmatpush1.bf16.msra.mxu0 %v3039_v53 }
 0x3d4   :  { %2972 = vmatpush1.bf16.msra.mxu1 %v2971_v26  ;;  %v572_v26 = vld [vmem:[#allocation5 + $0x30] sm:$0xff] }
 0x3d5   :  { %2974 = vmatprep.subr.bf16.mxu1 %v2973_v32  ;;  %v3047_v33 = vpack.c.bf16 %v572_v26, %v570_v25 }
 0x3d8   :  { %2976 = vmatpush1.bf16.msra.mxu1 %v2975_v37  ;;  %v3049_v37 = vpack.c.bf16 %v577_v30, %v575_v29  ;;  %v599_v29 = vld [vmem:[#allocation5 + $0x108] sm:$0xff]  ;;  %v601_v30 = vld [vmem:[#allocation5 + $0x118] sm:$0xff] }
 0x3d9   :  { %3042 = vmatprep.subr.bf16.mxu1 %v3041_v58 }
 0x466   :  { %v870_v5 = vpop.f32.mrb[6].mxu0 }
 0x467   :  { %v985_v6 = vadd.f32 %v968_v60, %v870_v5  ;;  %v872_v8 = vpop.f32.mrb[7].mxu0  ;;  %v582_v5 = vld [vmem:[#allocation5 + $0x80] sm:$0xff] }
 0x468   :  { %v986_v12 = vadd.f32 %v972_v4, %v872_v8  ;;  %v587_v8 = vld [vmem:[#allocation5 + $0xa8] sm:$0xff] }
 0x469   :  { %v993_v20 = vmax.f32 %v985_v6, 0.0  ;;  %v584_v6 = vld [vmem:[#allocation5 + $0x90] sm:$0xff] }
 0x46a   :  { %v994_v17 = vmax.f32 %v986_v12, 0.0  ;;  %v876_v18 = vpop.f32.mrb[8].mxu0  ;;  %v3059_v11 = vpack.c.bf16 %v584_v6, %v582_v5  ;;  %v3061_v12 = vpack.c.bf16 %v589_v10, %v587_v8  ;;  %v619_v6 = vld [vmem:[#allocation5 + $0x1a8] sm:$0xff]  ;;  %v621_v8 = vld [vmem:[#allocation5 + $0x1b8] sm:$0xff] }
 0x46b   :  { %v989_v21 = vadd.f32 %v968_v60, %v876_v18  ;;  %v878_v22 = vpop.f32.mrb[9].mxu0  ;;  %v593_v18 = vld [vmem:[#allocation5 + $0xd8] sm:$0xff]  ;;  %v3093_v10 = vpack.c.bf16 %v621_v8, %v619_v6 }
 0x46c   :  { %v990_v27 = vadd.f32 %v972_v4, %v878_v22  ;;  %1076 = vmatprep.mubr.f32.mxu1 %v994_v17  ;;  %v3057_v4 = vpack.c.bf16 %v585_v56, %v583_v55  ;;  %v591_v17 = vld [vmem:[#allocation5 + $0xc8] sm:$0xff]  ;;  %v592_v22 = vld [vmem:[#allocation5 + $0xd0] sm:$0xff]  ;;  %v617_v56 = vld [vmem:[#allocation5 + $0x198] sm:$0xff] }
 0x46d   :  { %1077 = vmatmul.mubr.f32.vlgmr.msra.gmra.mrb[6].mxu1 %v993_v20  ;;  %v997_v34 = vmax.f32 %v989_v21, 0.0  ;;  %v3065_v20 = vpack.c.bf16 %v593_v18, %v591_v17  ;;  %v590_v21 = vld [vmem:[#allocation5 + $0xc0] sm:$0xff]  ;;  %v615_v55 = vld [vmem:[#allocation5 + $0x188] sm:$0xff]  ;;  %v625_v17 = vld [vmem:[#allocation5 + $0x1d8] sm:$0xff] }
 0x46e   :  { %v998_v31 = vmax.f32 %v990_v27, 0.0  ;;  %v953_v32 = vpop.f32.mrb[2].mxu1  ;;  %3044 = vmatpush1.bf16.msra.mxu1 %v3043_v19  ;;  %v3063_v19 = vpack.c.bf16 %v588_v16, %v586_v15  ;;  %v3067_v25 = vpack.c.bf16 %v592_v22, %v590_v21  ;;  %v594_v27 = vld [vmem:[#allocation5 + $0xe0] sm:$0xff]  ;;  %v623_v16 = vld [vmem:[#allocation5 + $0x1c8] sm:$0xff] }
 0x46f   :  { %v987_v35 = vadd.f32 %v976_v23, %v953_v32  ;;  %v955_v36 = vpop.f32.mrb[3].mxu1  ;;  %3046 = vmatprep.subr.bf16.mxu1 %v3045_v24  ;;  %v597_v24 = vld [vmem:[#allocation5 + $0xf8] sm:$0xff]  ;;  %v3073_v32 = vpack.c.bf16 %v601_v30, %v599_v29  ;;  %v3097_v18 = vpack.c.bf16 %v625_v17, %v623_v16  ;;  %v627_v22 = vld [vmem:[#allocation5 + $0x1e8] sm:$0xff] }
 0x470   :  { %v988_v40 = vadd.f32 %v980_v28, %v955_v36  ;;  %1082 = vmatprep.mubr.f32.mxu1 %v998_v31  ;;  %v605_v36 = vld [vmem:[#allocation5 + $0x138] sm:$0xff] }
 0x471   :  { %1083 = vmatmul.mubr.f32.gmra.mrb[8].mxu1 %v997_v34  ;;  %v995_v46 = vmax.f32 %v987_v35, 0.0  ;;  %v600_v34 = vld [vmem:[#allocation5 + $0x110] sm:$0xff]  ;;  %v603_v35 = vld [vmem:[#allocation5 + $0x128] sm:$0xff]  ;;  %v1261_v17 = vld [vmem:[#allocation7 + $0x18] sm:$0xff] }
 0x472   :  { %v996_v43 = vmax.f32 %v988_v40, 0.0  ;;  %v959_v44 = vpop.f32.mrb[4].mxu1  ;;  %3048 = vmatpush1.bf16.msra.mxu1 %v3047_v33  ;;  %v598_v33 = vld [vmem:[#allocation5 + $0x100] sm:$0xff]  ;;  %v3077_v38 = vpack.c.bf16 %v605_v36, %v603_v35  ;;  %v604_v40 = vld [vmem:[#allocation5 + $0x130] sm:$0xff] }
 0x473   :  { %v991_v47 = vadd.f32 %v976_v23, %v959_v44  ;;  %v961_v48 = vpop.f32.mrb[5].mxu1  ;;  %3050 = vmatprep.subr.bf16.mxu1 %v3049_v37  ;;  %v595_v23 = vld [vmem:[#allocation5 + $0xe8] sm:$0xff]  ;;  %v3075_v37 = vpack.c.bf16 %v600_v34, %v598_v33  ;;  %v3081_v44 = vpack.c.bf16 %v609_v42, %v607_v41 }
 0x474   :  { %v992_v53 = vadd.f32 %v980_v28, %v961_v48  ;;  %1153 = vmatprep.mubr.f32.mxu0 %v996_v43  ;;  %v3069_v26 = vpack.c.bf16 %v597_v24, %v595_v23  ;;  %v596_v28 = vld [vmem:[#allocation5 + $0xf0] sm:$0xff]  ;;  %v3079_v43 = vpack.c.bf16 %v604_v40, %v602_v39  ;;  %v613_v48 = vld [vmem:[#allocation5 + $0x178] sm:$0xff] }
 0x475   :  { %1154 = vmatmul.mubr.f32.vlgmr.msra.gmra.mrb[10].mxu0 %v995_v46  ;;  %v999_v60 = vmax.f32 %v991_v47, 0.0  ;;  %v3071_v31 = vpack.c.bf16 %v596_v28, %v594_v27  ;;  %v608_v46 = vld [vmem:[#allocation5 + $0x150] sm:$0xff]  ;;  %v611_v47 = vld [vmem:[#allocation5 + $0x168] sm:$0xff]  ;;  %v629_v23 = vld [vmem:[#allocation5 + $0x1f8] sm:$0xff] }
 0x476   :  { %v1000_v58 = vmax.f32 %v992_v53, 0.0  ;;  %3052 = vmatpush1.bf16.msra.mxu1 %v3051_v45  ;;  %v606_v45 = vld [vmem:[#allocation5 + $0x140] sm:$0xff]  ;;  %v3085_v50 = vpack.c.bf16 %v613_v48, %v611_v47  ;;  %v612_v53 = vld [vmem:[#allocation5 + $0x170] sm:$0xff]  ;;  %v3101_v24 = vpack.c.bf16 %v629_v23, %v627_v22 }
 0x477   :  { %3054 = vmatprep.subr.bf16.mxu1 %v3053_v49  ;;  %v3083_v49 = vpack.c.bf16 %v608_v46, %v606_v45  ;;  %v565_v28 = vld [vmem:[%s4355_s9] sm:$0x3] }
 0x478   :  { %1159 = vmatprep.mubr.f32.mxu0 %v1000_v58  ;;  %v3087_v58 = vpack.c.bf16 %v612_v53, %v610_v51  ;;  %v630_v51 = vld [vmem:[%s4357_s11] sm:$0x3] }
 0x479   :  { %1160 = vmatmul.mubr.f32.gmra.mrb[12].mxu0 %v999_v60  ;;  %v614_v60 = vld [vmem:[#allocation5 + $0x180] sm:$0xff]  ;;  %v1174_v53 = vrot.slane %v630_v51, %v4147_v2 }
 0x47a   :  { %3056 = vmatpush1.bf16.msra.mxu1 %v3055_v59  ;;  %1649 = vmatprep.mubr.f32.mxu0 %v3877_v14  ;;  %v3089_v59 = vpack.c.bf16 %v617_v56, %v615_v55  ;;  %v1178_v56 = vrot.slane %v630_v51, %v4150_v3  ;;  %v1330_v51 = vld [vmem:[#allocation8 + $0x40] sm:$0xff] }
 0x47b   :  { %3058 = vmatprep.subr.bf16.mxu1 %v3057_v4  ;;  %v616_v4 = vld [vmem:[#allocation5 + $0x190] sm:$0xff] }
 0x47c   :  { %v3091_v5 = vpack.c.bf16 %v616_v4, %v614_v60 }
 0x47e   :  { %3060 = vmatpush1.bf16.msra.mxu1 %v3059_v11  ;;  %v618_v11 = vld [vmem:[#allocation5 + $0x1a0] sm:$0xff] }
 0x47f   :  { %3062 = vmatprep.subr.bf16.mxu1 %v3061_v12  ;;  %v620_v12 = vld [vmem:[#allocation5 + $0x1b0] sm:$0xff] }
 0x480   :  { %v3095_v15 = vpack.c.bf16 %v620_v12, %v618_v11 }
 0x482   :  { %3064 = vmatpush1.bf16.msra.mxu1 %v3063_v19  ;;  %v622_v19 = vld [vmem:[#allocation5 + $0x1c0] sm:$0xff] }
 0x483   :  { %3066 = vmatprep.subr.bf16.mxu1 %v3065_v20  ;;  %v624_v20 = vld [vmem:[#allocation5 + $0x1d0] sm:$0xff] }
 0x484   :  { %v3099_v21 = vpack.c.bf16 %v624_v20, %v622_v19  ;;  %v1325_v19 = vld [vmem:[#allocation8 + $0x18] sm:$0xff] }
 0x486   :  { %3068 = vmatpush1.bf16.msra.mxu1 %v3067_v25  ;;  %v626_v25 = vld [vmem:[#allocation5 + $0x1e0] sm:$0xff] }
 0x487   :  { %3070 = vmatprep.subr.bf16.mxu1 %v3069_v26  ;;  %v628_v26 = vld [vmem:[#allocation5 + $0x1f0] sm:$0xff] }
 0x488   :  { %v3103_v27 = vpack.c.bf16 %v628_v26, %v626_v25 }
 0x48a   :  { %3072 = vmatpush1.bf16.msra.mxu1 %v3071_v31  ;;  %v1005_v31 = vrot.slane %v565_v28, %v4147_v2 }
 0x48b   :  { %3074 = vmatprep.subr.bf16.mxu1 %v3073_v32  ;;  %v1009_v32 = vrot.slane %v565_v28, %v4150_v3 }
 0x48e   :  { %3076 = vmatpush1.bf16.msra.mxu1 %v3075_v37 }
 0x48f   :  { %3078 = vmatprep.subr.bf16.mxu1 %v3077_v38 }
 0x492   :  { %3080 = vmatpush1.bf16.msra.mxu1 %v3079_v43 }
 0x493   :  { %3082 = vmatprep.subr.bf16.mxu1 %v3081_v44 }
 0x496   :  { %3084 = vmatpush1.bf16.msra.mxu1 %v3083_v49 }
 0x497   :  { %3086 = vmatprep.subr.bf16.mxu1 %v3085_v50 }
 0x49a   :  { %3088 = vmatpush1.bf16.msra.mxu1 %v3087_v58 }
 0x49b   :  { %3090 = vmatprep.subr.bf16.mxu1 %v3089_v59 }
 0x49e   :  { %3092 = vmatpush1.bf16.msra.mxu1 %v3091_v5 }
 0x49f   :  { %3094 = vmatprep.subr.bf16.mxu1 %v3093_v10  ;;  %v1259_v10 = vld [vmem:[#allocation7 + $0x8] sm:$0xff] }
 0x4a0   :  { %v3113_v28 = vpack.c.bf16 %v1261_v17, %v1259_v10  ;;  %v1334_v10 = vld [vmem:[#allocation8 + $0x60] sm:$0xff] }
 0x4a2   :  { %3096 = vmatpush1.bf16.msra.mxu1 %v3095_v15 }
 0x4a3   :  { %3098 = vmatprep.subr.bf16.mxu1 %v3097_v18  ;;  %v1323_v18 = vld [vmem:[#allocation8 + $0x8] sm:$0xff] }
 0x4a6   :  { %3100 = vmatpush1.bf16.msra.mxu1 %v3099_v21 }
 0x4a7   :  { %3102 = vmatprep.subr.bf16.mxu1 %v3101_v24 }
 0x4aa   :  { %3104 = vmatpush1.bf16.msra.mxu1 %v3103_v27 }
 0x540   :  { %v1078_v29 = vpop.f32.mrb[6].mxu1 }
 0x541   :  { %v1080_v30 = vpop.f32.mrb[7].mxu1  ;;  %v1079_v35 = vadd.f32 %v1078_v29, %v1005_v31  ;;  %v3177_v29 = vpack.c.bf16 %v1325_v19, %v1323_v18  ;;  %v1274_v18 = vld [vmem:[#allocation7 + $0x80] sm:$0xff]  ;;  %v1276_v19 = vld [vmem:[#allocation7 + $0x90] sm:$0xff] }
 0x542   :  { %v1081_v36 = vadd.f32 %v1080_v30, %v1009_v32  ;;  %v1258_v30 = vld [vmem:[#allocation7] sm:$0xff] }
 0x544   :  { %v1084_v33 = vpop.f32.mrb[8].mxu1 }
 0x545   :  { %v1086_v34 = vpop.f32.mrb[9].mxu1  ;;  %v1085_v41 = vadd.f32 %v1084_v33, %v1005_v31  ;;  %v1260_v31 = vld [vmem:[#allocation7 + $0x10] sm:$0xff] }
 0x546   :  { %v1087_v42 = vadd.f32 %v1086_v34, %v1009_v32  ;;  %v1322_v32 = vld [vmem:[#allocation8] sm:$0xff]  ;;  %v1324_v33 = vld [vmem:[#allocation8 + $0x10] sm:$0xff]  ;;  %v1263_v34 = vld [vmem:[#allocation7 + $0x28] sm:$0xff] }
 0x548   :  { %v1155_v37 = vpop.f32.mrb[10].mxu0 }
 0x549   :  { %v1156_v38 = vadd.f32 %v1155_v37, %v1079_v35  ;;  %v1157_v39 = vpop.f32.mrb[11].mxu0  ;;  %v1327_v35 = vld [vmem:[#allocation8 + $0x28] sm:$0xff]  ;;  %v1264_v37 = vld [vmem:[#allocation7 + $0x30] sm:$0xff] }
 0x54a   :  { %v1158_v40 = vadd.f32 %v1157_v39, %v1081_v36  ;;  %v1262_v36 = vld [vmem:[#allocation7 + $0x20] sm:$0xff] }
 0x54b   :  { %v1166_v45 = vmax.f32 %v1156_v38, 0.0 }
 0x54c   :  { %v1167_v43 = vmax.f32 %v1158_v40, 0.0  ;;  %v1161_v44 = vpop.f32.mrb[12].mxu0  ;;  %v1326_v40 = vld [vmem:[#allocation8 + $0x20] sm:$0xff] }
 0x54d   :  { %v1162_v46 = vadd.f32 %v1161_v44, %v1085_v41  ;;  %v1163_v47 = vpop.f32.mrb[13].mxu0  ;;  %v1328_v41 = vld [vmem:[#allocation8 + $0x30] sm:$0xff]  ;;  %v1331_v44 = vld [vmem:[#allocation8 + $0x48] sm:$0xff] }
 0x54e   :  { %v1164_v48 = vadd.f32 %v1163_v47, %v1087_v42  ;;  %1245 = vmatprep.mubr.f32.mxu1 %v1167_v43  ;;  %v1267_v42 = vld [vmem:[#allocation7 + $0x48] sm:$0xff]  ;;  %v1269_v43 = vld [vmem:[#allocation7 + $0x58] sm:$0xff]  ;;  %v3183_v47 = vpack.c.bf16 %v1328_v41, %v1326_v40 }
 0x54f   :  { %1246 = vmatmul.mubr.f32.vlgmr.msra.gmra.mrb[10].mxu1 %v1166_v45  ;;  %v1168_v50 = vmax.f32 %v1162_v46, 0.0  ;;  %v1333_v45 = vld [vmem:[#allocation8 + $0x58] sm:$0xff]  ;;  %v3119_v46 = vpack.c.bf16 %v1264_v37, %v1262_v36 }
 0x550   :  { %v1169_v49 = vmax.f32 %v1164_v48, 0.0  ;;  %v1266_v48 = vld [vmem:[#allocation7 + $0x40] sm:$0xff] }
 0x552   :  { %1251 = vmatprep.mubr.f32.mxu1 %v1169_v49  ;;  %v1268_v49 = vld [vmem:[#allocation7 + $0x50] sm:$0xff] }
 0x553   :  { %1252 = vmatmul.mubr.f32.gmra.mrb[12].mxu1 %v1168_v50  ;;  %v3121_v50 = vpack.c.bf16 %v1269_v43, %v1267_v42  ;;  %v1346_v42 = vld [vmem:[#allocation8 + $0xc0] sm:$0xff]  ;;  %v1348_v43 = vld [vmem:[#allocation8 + $0xd0] sm:$0xff] }
 0x554   :  { %1730 = vmatprep.mubr.f32.mxu1 %v3877_v14 }
 0x622   :  { %v1247_v55 = vpop.f32.mrb[10].mxu1 }
 0x623   :  { %v1249_v58 = vpop.f32.mrb[11].mxu1  ;;  %v1248_v59 = vadd.f32 %v1247_v55, %v1174_v53  ;;  %v1273_v55 = vld [vmem:[#allocation7 + $0x78] sm:$0xff] }
 0x624   :  { %v1250_v60 = vadd.f32 %v1249_v58, %v1178_v56  ;;  %v1337_v58 = vld [vmem:[#allocation8 + $0x78] sm:$0xff] }
 0x625   :  { %v1581_v11 = vmul.f32 %v4178_v52, %v1248_v59  ;;  %v1662_v12 = vmul.f32 %v4195_v61, %v1248_v59  ;;  %v3123_v59 = vpack.c.bf16 %v1268_v49, %v1266_v48  ;;  %v3203_v49 = vpack.c.bf16 %v1348_v43, %v1346_v42 }
 0x626   :  { %v1253_v4 = vpop.f32.mrb[12].mxu1  ;;  %v1582_v20 = vmul.f32 %v4178_v52, %v1250_v60  ;;  %v1663_v21 = vmul.f32 %v4195_v61, %v1250_v60  ;;  %v1265_v52 = vld [vmem:[#allocation7 + $0x38] sm:$0xff] }
 0x627   :  { %v1254_v5 = vadd.f32 %v1253_v4, %v1174_v53  ;;  %v1255_v6 = vpop.f32.mrb[13].mxu1  ;;  %v1329_v61 = vld [vmem:[#allocation8 + $0x38] sm:$0xff]  ;;  %v3117_v38 = vpack.c.bf16 %v1265_v52, %v1263_v34  ;;  %v1332_v53 = vld [vmem:[#allocation8 + $0x50] sm:$0xff]  ;;  %v1270_v4 = vld [vmem:[#allocation7 + $0x60] sm:$0xff] }
 0x628   :  { %v1256_v8 = vadd.f32 %v1255_v6, %v1178_v56  ;;  %v3181_v39 = vpack.c.bf16 %v1329_v61, %v1327_v35  ;;  %v1335_v56 = vld [vmem:[#allocation8 + $0x68] sm:$0xff]  ;;  %v3187_v60 = vpack.c.bf16 %v1332_v53, %v1330_v51  ;;  %v1342_v34 = vld [vmem:[#allocation8 + $0xa0] sm:$0xff]  ;;  %v1344_v52 = vld [vmem:[#allocation8 + $0xb0] sm:$0xff] }
 0x629   :  { %v1583_v15 = vmul.f32 %v4191_v57, %v1254_v5  ;;  %v1664_v16 = vmul.f32 %v4205_v0, %v1254_v5  ;;  %v1272_v5 = vld [vmem:[#allocation7 + $0x70] sm:$0xff]  ;;  %v1283_v35 = vld [vmem:[#allocation7 + $0xc8] sm:$0xff]  ;;  %v1285_v61 = vld [vmem:[#allocation7 + $0xd8] sm:$0xff]  ;;  %v3199_v37 = vpack.c.bf16 %v1344_v52, %v1342_v34 }
 0x62a   :  { %v1584_v22 = vmul.f32 %v4191_v57, %v1256_v8  ;;  %v1665_v23 = vmul.f32 %v4205_v0, %v1256_v8  ;;  %v3115_v57 = vpack.c.bf16 %v1260_v31, %v1258_v30  ;;  %v3179_v0 = vpack.c.bf16 %v1324_v33, %v1322_v32  ;;  %v1278_v30 = vld [vmem:[#allocation7 + $0xa0] sm:$0xff]  ;;  %v1280_v31 = vld [vmem:[#allocation7 + $0xb0] sm:$0xff] }
 0x62b   :  { %v3107_v24 = vpack.c.bf16 %v1583_v15, %v1581_v11  ;;  %v3111_v25 = vpack.c.bf16 %v1664_v16, %v1662_v12  ;;  %v3189_v8 = vpack.c.bf16 %v1337_v58, %v1335_v56  ;;  %v1336_v11 = vld [vmem:[#allocation8 + $0x70] sm:$0xff]  ;;  %v1275_v12 = vld [vmem:[#allocation7 + $0x88] sm:$0xff]  ;;  %v1341_v16 = vld [vmem:[#allocation8 + $0x98] sm:$0xff]  ;;  %v3135_v36 = vpack.c.bf16 %v1280_v31, %v1278_v30 }
 0x62c   :  { %v3105_v26 = vpack.c.bf16 %v1584_v22, %v1582_v20  ;;  %v3109_v27 = vpack.c.bf16 %v1665_v23, %v1663_v21  ;;  %v1339_v15 = vld [vmem:[#allocation8 + $0x88] sm:$0xff]  ;;  %v3191_v17 = vpack.c.bf16 %v1336_v11, %v1334_v10  ;;  %v1338_v22 = vld [vmem:[#allocation8 + $0x80] sm:$0xff]  ;;  %v1340_v23 = vld [vmem:[#allocation8 + $0x90] sm:$0xff]  ;;  %v3137_v40 = vpack.c.bf16 %v1285_v61, %v1283_v35 }
 0x62d   :  { %v3193_v21 = vpack.c.bf16 %v1341_v16, %v1339_v15  ;;  %v1291_v56 = vld [vmem:[#allocation7 + $0x108] sm:$0xff]  ;;  %v1293_v58 = vld [vmem:[#allocation7 + $0x118] sm:$0xff]  ;;  %v1362_v35 = vld [vmem:[#allocation8 + $0x140] sm:$0xff] }
 0x62e   :  { %3106 = vmatprep.subr.bf16.mxu0 %v3105_v26  ;;  %3110 = vmatprep.subr.bf16.mxu1 %v3109_v27  ;;  %v1343_v26 = vld [vmem:[#allocation8 + $0xa8] sm:$0xff]  ;;  %v1345_v27 = vld [vmem:[#allocation8 + $0xb8] sm:$0xff]  ;;  %v3145_v10 = vpack.c.bf16 %v1293_v58, %v1291_v56  ;;  %v1364_v61 = vld [vmem:[#allocation8 + $0x150] sm:$0xff] }
 0x62f   :  { %3108 = vmatpush1.bf16.msra.mxu0 %v3107_v24  ;;  %3112 = vmatpush1.bf16.msra.mxu1 %v3111_v25  ;;  %v1279_v24 = vld [vmem:[#allocation7 + $0xa8] sm:$0xff]  ;;  %v1281_v25 = vld [vmem:[#allocation7 + $0xb8] sm:$0xff]  ;;  %v3197_v33 = vpack.c.bf16 %v1345_v27, %v1343_v26  ;;  %v1370_v56 = vld [vmem:[#allocation8 + $0x180] sm:$0xff] }
 0x630   :  { %3114 = vmatprep.subr.bf16.mxu1 %v3113_v28  ;;  %3178 = vmatprep.subr.bf16.mxu0 %v3177_v29  ;;  %v3131_v28 = vpack.c.bf16 %v1276_v19, %v1274_v18  ;;  %v3195_v29 = vpack.c.bf16 %v1340_v23, %v1338_v22  ;;  %v3133_v32 = vpack.c.bf16 %v1281_v25, %v1279_v24  ;;  %v1295_v15 = vld [vmem:[#allocation7 + $0x128] sm:$0xff]  ;;  %v1297_v16 = vld [vmem:[#allocation7 + $0x138] sm:$0xff]  ;;  %v1358_v24 = vld [vmem:[#allocation8 + $0x120] sm:$0xff] }
 0x631   :  { %v3149_v22 = vpack.c.bf16 %v1297_v16, %v1295_v15  ;;  %v1360_v25 = vld [vmem:[#allocation8 + $0x130] sm:$0xff]  ;;  %v1299_v26 = vld [vmem:[#allocation7 + $0x148] sm:$0xff]  ;;  %v1301_v27 = vld [vmem:[#allocation7 + $0x158] sm:$0xff] }
 0x632   :  { %2809 = vmatmul.mubr.msk.f32.vlgmr.msra.gmra.mrb[14].mxu0 %vm287_vm12, %v4181_v54  ;;  %2811 = vmatmul.mubr.msk.f32.vlgmr.msra.gmra.mrb[14].mxu1 %vm287_vm12, %v4198_v62  ;;  %v3185_v54 = vpack.c.bf16 %v1333_v45, %v1331_v44  ;;  %v1271_v62 = vld [vmem:[#allocation7 + $0x68] sm:$0xff]  ;;  %v1289_v45 = vld [vmem:[#allocation7 + $0xf8] sm:$0xff]  ;;  %v3215_v31 = vpack.c.bf16 %v1360_v25, %v1358_v24  ;;  %v3153_v34 = vpack.c.bf16 %v1301_v27, %v1299_v26  ;;  %v1372_v58 = vld [vmem:[#allocation8 + $0x190] sm:$0xff] }
 0x633   :  { %1655 = vmatprep.mubr.f32.mxu0 %v3877_v14  ;;  %1736 = vmatprep.mubr.f32.mxu1 %v3877_v14  ;;  %v3125_v6 = vpack.c.bf16 %v1273_v55, %v1271_v62  ;;  %v1287_v44 = vld [vmem:[#allocation7 + $0xe8] sm:$0xff]  ;;  %v1350_v62 = vld [vmem:[#allocation8 + $0xe0] sm:$0xff]  ;;  %v1352_v55 = vld [vmem:[#allocation8 + $0xf0] sm:$0xff] }
 0x634   :  { %3116 = vmatpush1.bf16.msra.mxu1 %v3115_v57  ;;  %3180 = vmatpush1.bf16.msra.mxu0 %v3179_v0  ;;  %v1347_v57 = vld [vmem:[#allocation8 + $0xc8] sm:$0xff]  ;;  %v1349_v0 = vld [vmem:[#allocation8 + $0xd8] sm:$0xff]  ;;  %v3141_v51 = vpack.c.bf16 %v1289_v45, %v1287_v44  ;;  %v1366_v44 = vld [vmem:[#allocation8 + $0x160] sm:$0xff] }
 0x635   :  { %3118 = vmatprep.subr.bf16.mxu1 %v3117_v38  ;;  %3182 = vmatprep.subr.bf16.mxu0 %v3181_v39  ;;  %v1282_v38 = vld [vmem:[#allocation7 + $0xc0] sm:$0xff]  ;;  %v1284_v39 = vld [vmem:[#allocation7 + $0xd0] sm:$0xff]  ;;  %v3201_v41 = vpack.c.bf16 %v1349_v0, %v1347_v57  ;;  %v1303_v57 = vld [vmem:[#allocation7 + $0x168] sm:$0xff] }
 0x636   :  { %2810 = vmatmul.mubr.msk.f32.gmra.mrb[16].mxu0 %vm287_vm12, %v4203_v63  ;;  %2812 = vmatmul.mubr.msk.f32.gmra.mrb[16].mxu1 %vm287_vm12, %v4213_v7  ;;  %v1277_v63 = vld [vmem:[#allocation7 + $0x98] sm:$0xff]  ;;  %v3127_v7 = vpack.c.bf16 %v1272_v5, %v1270_v4  ;;  %v3139_v48 = vpack.c.bf16 %v1284_v39, %v1282_v38  ;;  %v3207_v5 = vpack.c.bf16 %v1352_v55, %v1350_v62  ;;  %v1368_v45 = vld [vmem:[#allocation8 + $0x170] sm:$0xff]  ;;  %v1374_v15 = vld [vmem:[#allocation8 + $0x1a0] sm:$0xff] }
 0x637   :  { %v3129_v20 = vpack.c.bf16 %v1277_v63, %v1275_v12  ;;  %v1354_v12 = vld [vmem:[#allocation8 + $0x100] sm:$0xff]  ;;  %v1356_v63 = vld [vmem:[#allocation8 + $0x110] sm:$0xff]  ;;  %v1305_v0 = vld [vmem:[#allocation7 + $0x178] sm:$0xff]  ;;  %v3219_v39 = vpack.c.bf16 %v1364_v61, %v1362_v35 }
 0x638   :  { %3120 = vmatpush1.bf16.msra.mxu1 %v3119_v46  ;;  %3184 = vmatpush1.bf16.msra.mxu0 %v3183_v47  ;;  %v1351_v46 = vld [vmem:[#allocation8 + $0xe8] sm:$0xff]  ;;  %v1353_v47 = vld [vmem:[#allocation8 + $0xf8] sm:$0xff]  ;;  %v3211_v19 = vpack.c.bf16 %v1356_v63, %v1354_v12  ;;  %v3157_v42 = vpack.c.bf16 %v1305_v0, %v1303_v57  ;;  %v1376_v16 = vld [vmem:[#allocation8 + $0x1b0] sm:$0xff] }
 0x639   :  { %3122 = vmatprep.subr.bf16.mxu1 %v3121_v50  ;;  %3186 = vmatprep.subr.bf16.mxu0 %v3185_v54  ;;  %v1286_v50 = vld [vmem:[#allocation7 + $0xe0] sm:$0xff]  ;;  %v1288_v54 = vld [vmem:[#allocation7 + $0xf0] sm:$0xff]  ;;  %v3205_v53 = vpack.c.bf16 %v1353_v47, %v1351_v46  ;;  %v1307_v46 = vld [vmem:[#allocation7 + $0x188] sm:$0xff] }
 0x63a   :  { %v3143_v4 = vpack.c.bf16 %v1288_v54, %v1286_v50  ;;  %v1309_v47 = vld [vmem:[#allocation7 + $0x198] sm:$0xff]  ;;  %v3223_v54 = vpack.c.bf16 %v1368_v45, %v1366_v44  ;;  %v1378_v26 = vld [vmem:[#allocation8 + $0x1c0] sm:$0xff]  ;;  %v1380_v27 = vld [vmem:[#allocation8 + $0x1d0] sm:$0xff] }
 0x63b   :  { %v3161_v62 = vpack.c.bf16 %v1309_v47, %v1307_v46  ;;  %v1318_v35 = vld [vmem:[#allocation7 + $0x1e0] sm:$0xff]  ;;  %v1320_v61 = vld [vmem:[#allocation7 + $0x1f0] sm:$0xff]  ;;  %v1394_v44 = vld [vmem:[#allocation10 + $0x38] sm:$0xff] }
 0x63c   :  { %3124 = vmatpush1.bf16.msra.mxu1 %v3123_v59  ;;  %3188 = vmatpush1.bf16.msra.mxu0 %v3187_v60  ;;  %v1355_v59 = vld [vmem:[#allocation8 + $0x108] sm:$0xff]  ;;  %v1357_v60 = vld [vmem:[#allocation8 + $0x118] sm:$0xff]  ;;  %v1382_v57 = vld [vmem:[#allocation8 + $0x1e0] sm:$0xff]  ;;  %v3175_v0 = vpack.c.bf16 %v1320_v61, %v1318_v35 }
 0x63d   :  { %3126 = vmatprep.subr.bf16.mxu1 %v3125_v6  ;;  %3190 = vmatprep.subr.bf16.mxu0 %v3189_v8  ;;  %v1290_v6 = vld [vmem:[#allocation7 + $0x100] sm:$0xff]  ;;  %v1292_v8 = vld [vmem:[#allocation7 + $0x110] sm:$0xff]  ;;  %v3209_v11 = vpack.c.bf16 %v1357_v60, %v1355_v59  ;;  %v1311_v59 = vld [vmem:[#allocation7 + $0x1a8] sm:$0xff] }
 0x63e   :  { %v3147_v18 = vpack.c.bf16 %v1292_v8, %v1290_v6  ;;  %v1313_v60 = vld [vmem:[#allocation7 + $0x1b8] sm:$0xff]  ;;  %v3227_v8 = vpack.c.bf16 %v1372_v58, %v1370_v56  ;;  %v1415_v61 = vld [vmem:[#allocation10 + $0xe0] sm:$0xff] }
 0x63f   :  { %v3165_v12 = vpack.c.bf16 %v1313_v60, %v1311_v59 }
 0x640   :  { %3128 = vmatpush1.bf16.msra.mxu1 %v3127_v7  ;;  %3192 = vmatpush1.bf16.msra.mxu0 %v3191_v17  ;;  %v1359_v7 = vld [vmem:[#allocation8 + $0x128] sm:$0xff]  ;;  %v1361_v17 = vld [vmem:[#allocation8 + $0x138] sm:$0xff] }
 0x641   :  { %3130 = vmatprep.subr.bf16.mxu1 %v3129_v20  ;;  %3194 = vmatprep.subr.bf16.mxu0 %v3193_v21  ;;  %v1294_v20 = vld [vmem:[#allocation7 + $0x120] sm:$0xff]  ;;  %v1296_v21 = vld [vmem:[#allocation7 + $0x130] sm:$0xff]  ;;  %v3213_v23 = vpack.c.bf16 %v1361_v17, %v1359_v7  ;;  %v1315_v7 = vld [vmem:[#allocation7 + $0x1c8] sm:$0xff] }
 0x642   :  { %v3151_v30 = vpack.c.bf16 %v1296_v21, %v1294_v20  ;;  %v1317_v17 = vld [vmem:[#allocation7 + $0x1d8] sm:$0xff]  ;;  %v3231_v21 = vpack.c.bf16 %v1376_v16, %v1374_v15  ;;  %v1401_v15 = vld [vmem:[#allocation10 + $0x70] sm:$0xff]  ;;  %v1404_v16 = vld [vmem:[#allocation10 + $0x88] sm:$0xff] }
 0x643   :  { %v3169_v24 = vpack.c.bf16 %v1317_v17, %v1315_v7  ;;  %v1406_v7 = vld [vmem:[#allocation10 + $0x98] sm:$0xff] }
 0x644   :  { %3132 = vmatpush1.bf16.msra.mxu1 %v3131_v28  ;;  %3196 = vmatpush1.bf16.msra.mxu0 %v3195_v29  ;;  %v1363_v28 = vld [vmem:[#allocation8 + $0x148] sm:$0xff]  ;;  %v1365_v29 = vld [vmem:[#allocation8 + $0x158] sm:$0xff] }
 0x645   :  { %3134 = vmatprep.subr.bf16.mxu1 %v3133_v32  ;;  %3198 = vmatprep.subr.bf16.mxu0 %v3197_v33  ;;  %v1298_v32 = vld [vmem:[#allocation7 + $0x140] sm:$0xff]  ;;  %v1300_v33 = vld [vmem:[#allocation7 + $0x150] sm:$0xff]  ;;  %v3217_v52 = vpack.c.bf16 %v1365_v29, %v1363_v28  ;;  %v1319_v28 = vld [vmem:[#allocation7 + $0x1e8] sm:$0xff] }
 0x646   :  { %v3155_v38 = vpack.c.bf16 %v1300_v33, %v1298_v32  ;;  %v1321_v29 = vld [vmem:[#allocation7 + $0x1f8] sm:$0xff]  ;;  %v3235_v33 = vpack.c.bf16 %v1380_v27, %v1378_v26  ;;  %v1409_v26 = vld [vmem:[#allocation10 + $0xb0] sm:$0xff]  ;;  %v1412_v27 = vld [vmem:[#allocation10 + $0xc8] sm:$0xff] }
 0x648   :  { %3136 = vmatpush1.bf16.msra.mxu1 %v3135_v36  ;;  %3200 = vmatpush1.bf16.msra.mxu0 %v3199_v37  ;;  %v1367_v36 = vld [vmem:[#allocation8 + $0x168] sm:$0xff]  ;;  %v1369_v37 = vld [vmem:[#allocation8 + $0x178] sm:$0xff] }
 0x649   :  { %3138 = vmatprep.subr.bf16.mxu1 %v3137_v40  ;;  %3202 = vmatprep.subr.bf16.mxu0 %v3201_v41  ;;  %v1302_v40 = vld [vmem:[#allocation7 + $0x160] sm:$0xff]  ;;  %v1304_v41 = vld [vmem:[#allocation7 + $0x170] sm:$0xff]  ;;  %v3221_v43 = vpack.c.bf16 %v1369_v37, %v1367_v36 }
 0x64a   :  { %v3159_v50 = vpack.c.bf16 %v1304_v41, %v1302_v40  ;;  %v1384_v36 = vld [vmem:[#allocation8 + $0x1f0] sm:$0xff]  ;;  %v1387_v41 = vld [vmem:[#allocation10] sm:$0xff] }
 0x64b   :  { %v3239_v37 = vpack.c.bf16 %v1384_v36, %v1382_v57  ;;  %v1417_v57 = vld [vmem:[#allocation10 + $0xf0] sm:$0xff]  ;;  %v1422_v36 = vld [vmem:[#allocation10 + $0x118] sm:$0xff] }
 0x64c   :  { %3140 = vmatpush1.bf16.msra.mxu1 %v3139_v48  ;;  %3204 = vmatpush1.bf16.msra.mxu0 %v3203_v49  ;;  %v1371_v48 = vld [vmem:[#allocation8 + $0x188] sm:$0xff]  ;;  %v1373_v49 = vld [vmem:[#allocation8 + $0x198] sm:$0xff] }
 0x64d   :  { %3142 = vmatprep.subr.bf16.mxu1 %v3141_v51  ;;  %3206 = vmatprep.subr.bf16.mxu0 %v3205_v53  ;;  %v1306_v51 = vld [vmem:[#allocation7 + $0x180] sm:$0xff]  ;;  %v1308_v53 = vld [vmem:[#allocation7 + $0x190] sm:$0xff]  ;;  %v3225_v55 = vpack.c.bf16 %v1373_v49, %v1371_v48 }
 0x64e   :  { %v3163_v6 = vpack.c.bf16 %v1308_v53, %v1306_v51  ;;  %v1393_v51 = vld [vmem:[#allocation10 + $0x30] sm:$0xff]  ;;  %v1396_v53 = vld [vmem:[#allocation10 + $0x48] sm:$0xff] }
 0x650   :  { %3144 = vmatpush1.bf16.msra.mxu1 %v3143_v4  ;;  %3208 = vmatpush1.bf16.msra.mxu0 %v3207_v5  ;;  %v1375_v4 = vld [vmem:[#allocation8 + $0x1a8] sm:$0xff]  ;;  %v1377_v5 = vld [vmem:[#allocation8 + $0x1b8] sm:$0xff] }
 0x651   :  { %3146 = vmatprep.subr.bf16.mxu1 %v3145_v10  ;;  %3210 = vmatprep.subr.bf16.mxu0 %v3209_v11  ;;  %v1310_v10 = vld [vmem:[#allocation7 + $0x1a0] sm:$0xff]  ;;  %v1312_v11 = vld [vmem:[#allocation7 + $0x1b0] sm:$0xff]  ;;  %v3229_v63 = vpack.c.bf16 %v1377_v5, %v1375_v4 }
 0x652   :  { %v3167_v20 = vpack.c.bf16 %v1312_v11, %v1310_v10  ;;  %v1395_v5 = vld [vmem:[#allocation10 + $0x40] sm:$0xff]  ;;  %v1402_v10 = vld [vmem:[#allocation10 + $0x78] sm:$0xff] }
 0x654   :  { %3148 = vmatpush1.bf16.msra.mxu1 %v3147_v18  ;;  %3212 = vmatpush1.bf16.msra.mxu0 %v3211_v19  ;;  %v1379_v18 = vld [vmem:[#allocation8 + $0x1c8] sm:$0xff]  ;;  %v1381_v19 = vld [vmem:[#allocation8 + $0x1d8] sm:$0xff] }
 0x655   :  { %3150 = vmatprep.subr.bf16.mxu1 %v3149_v22  ;;  %3214 = vmatprep.subr.bf16.mxu0 %v3213_v23  ;;  %v1314_v22 = vld [vmem:[#allocation7 + $0x1c0] sm:$0xff]  ;;  %v1316_v23 = vld [vmem:[#allocation7 + $0x1d0] sm:$0xff]  ;;  %v3233_v25 = vpack.c.bf16 %v1381_v19, %v1379_v18  ;;  %v3257_v18 = vpack.c.bf16 %v1406_v7, %v1404_v16 }
 0x656   :  { %v3171_v32 = vpack.c.bf16 %v1316_v23, %v1314_v22  ;;  %v1403_v19 = vld [vmem:[#allocation10 + $0x80] sm:$0xff]  ;;  %v1410_v22 = vld [vmem:[#allocation10 + $0xb8] sm:$0xff]  ;;  %v1441_v7 = vld [vmem:[#allocation10 + $0x1b0] sm:$0xff] }
 0x657   :  { %v1439_v16 = vld [vmem:[#allocation10 + $0x1a0] sm:$0xff] }
 0x658   :  { %3152 = vmatpush1.bf16.msra.mxu1 %v3151_v30  ;;  %3216 = vmatpush1.bf16.msra.mxu0 %v3215_v31  ;;  %v1383_v30 = vld [vmem:[#allocation8 + $0x1e8] sm:$0xff]  ;;  %v1385_v31 = vld [vmem:[#allocation8 + $0x1f8] sm:$0xff] }
 0x659   :  { %3154 = vmatprep.subr.bf16.mxu1 %v3153_v34  ;;  %3218 = vmatprep.subr.bf16.mxu0 %v3217_v52  ;;  %v3173_v34 = vpack.c.bf16 %v1321_v29, %v1319_v28  ;;  %v3237_v52 = vpack.c.bf16 %v1385_v31, %v1383_v30  ;;  %v1414_v28 = vld [vmem:[#allocation10 + $0xd8] sm:$0xff]  ;;  %v1411_v31 = vld [vmem:[#allocation10 + $0xc0] sm:$0xff] }
 0x65a   :  { %v3265_v30 = vpack.c.bf16 %v1414_v28, %v1412_v27  ;;  %v1447_v27 = vld [vmem:[#allocation10 + $0x1e0] sm:$0xff]  ;;  %v1449_v28 = vld [vmem:[#allocation10 + $0x1f0] sm:$0xff] }
 0x65c   :  { %3156 = vmatpush1.bf16.msra.mxu1 %v3155_v38  ;;  %3220 = vmatpush1.bf16.msra.mxu0 %v3219_v39  ;;  %v1388_v38 = vld [vmem:[#allocation10 + $0x8] sm:$0xff]  ;;  %v1390_v39 = vld [vmem:[#allocation10 + $0x18] sm:$0xff] }
 0x65d   :  { %3158 = vmatprep.subr.bf16.mxu1 %v3157_v42  ;;  %3222 = vmatprep.subr.bf16.mxu0 %v3221_v43  ;;  %v3241_v40 = vpack.c.bf16 %v1390_v39, %v1388_v38  ;;  %v1389_v42 = vld [vmem:[#allocation10 + $0x10] sm:$0xff]  ;;  %v1392_v43 = vld [vmem:[#allocation10 + $0x28] sm:$0xff]  ;;  %v1419_v39 = vld [vmem:[#allocation10 + $0x100] sm:$0xff] }
 0x65e   :  { %v3243_v47 = vpack.c.bf16 %v1389_v42, %v1387_v41  ;;  %v1424_v41 = vld [vmem:[#allocation10 + $0x128] sm:$0xff]  ;;  %v1426_v42 = vld [vmem:[#allocation10 + $0x138] sm:$0xff] }
 0x660   :  { %3160 = vmatpush1.bf16.msra.mxu1 %v3159_v50  ;;  %3224 = vmatpush1.bf16.msra.mxu0 %v3223_v54  ;;  %v3245_v50 = vpack.c.bf16 %v1394_v44, %v1392_v43  ;;  %v1391_v54 = vld [vmem:[#allocation10 + $0x20] sm:$0xff]  ;;  %v3277_v44 = vpack.c.bf16 %v1426_v42, %v1424_v41  ;;  %v1527_v41 = vld [vmem:[#allocation11 + $0x58] sm:$0xff] }
 0x661   :  { %3162 = vmatprep.subr.bf16.mxu1 %v3161_v62  ;;  %3226 = vmatprep.subr.bf16.mxu0 %v3225_v55  ;;  %v1398_v62 = vld [vmem:[#allocation10 + $0x58] sm:$0xff]  ;;  %v3247_v58 = vpack.c.bf16 %v1393_v51, %v1391_v54  ;;  %v1427_v54 = vld [vmem:[#allocation10 + $0x140] sm:$0xff]  ;;  %v1429_v51 = vld [vmem:[#allocation10 + $0x150] sm:$0xff] }
 0x662   :  { %v3249_v4 = vpack.c.bf16 %v1398_v62, %v1396_v53  ;;  %v1432_v53 = vld [vmem:[#allocation10 + $0x168] sm:$0xff]  ;;  %v1434_v62 = vld [vmem:[#allocation10 + $0x178] sm:$0xff] }
 0x664   :  { %3164 = vmatpush1.bf16.msra.mxu1 %v3163_v6  ;;  %3228 = vmatpush1.bf16.msra.mxu0 %v3227_v8  ;;  %v1397_v6 = vld [vmem:[#allocation10 + $0x50] sm:$0xff]  ;;  %v1400_v8 = vld [vmem:[#allocation10 + $0x68] sm:$0xff] }
 0x665   :  { %3166 = vmatprep.subr.bf16.mxu1 %v3165_v12  ;;  %3230 = vmatprep.subr.bf16.mxu0 %v3229_v63  ;;  %v3251_v11 = vpack.c.bf16 %v1397_v6, %v1395_v5  ;;  %v3253_v12 = vpack.c.bf16 %v1402_v10, %v1400_v8  ;;  %v1399_v63 = vld [vmem:[#allocation10 + $0x60] sm:$0xff]  ;;  %v1437_v10 = vld [vmem:[#allocation10 + $0x190] sm:$0xff] }
 0x666   :  { %v3255_v17 = vpack.c.bf16 %v1401_v15, %v1399_v63  ;;  %v1435_v8 = vld [vmem:[#allocation10 + $0x180] sm:$0xff] }
 0x667   :  { %v3291_v63 = vpack.c.bf16 %v1437_v10, %v1435_v8  ;;  %v1538_v8 = vld [vmem:[#allocation11 + $0xb0] sm:$0xff]  ;;  %v1541_v10 = vld [vmem:[#allocation11 + $0xc8] sm:$0xff] }
 0x668   :  { %3168 = vmatpush1.bf16.msra.mxu1 %v3167_v20  ;;  %3232 = vmatpush1.bf16.msra.mxu0 %v3231_v21  ;;  %v1405_v20 = vld [vmem:[#allocation10 + $0x90] sm:$0xff]  ;;  %v1408_v21 = vld [vmem:[#allocation10 + $0xa8] sm:$0xff] }
 0x669   :  { %3170 = vmatprep.subr.bf16.mxu1 %v3169_v24  ;;  %3234 = vmatprep.subr.bf16.mxu0 %v3233_v25  ;;  %v3259_v23 = vpack.c.bf16 %v1405_v20, %v1403_v19  ;;  %v3261_v24 = vpack.c.bf16 %v1410_v22, %v1408_v21  ;;  %v1407_v25 = vld [vmem:[#allocation10 + $0xa0] sm:$0xff]  ;;  %v3295_v19 = vpack.c.bf16 %v1441_v7, %v1439_v16  ;;  %v1445_v22 = vld [vmem:[#allocation10 + $0x1d0] sm:$0xff]  ;;  %v1545_v7 = vld [vmem:[#allocation11 + $0xe8] sm:$0xff] }
 0x66a   :  { %v3263_v29 = vpack.c.bf16 %v1409_v26, %v1407_v25  ;;  %v1443_v21 = vld [vmem:[#allocation10 + $0x1c0] sm:$0xff]  ;;  %v1450_v25 = vld [vmem:[#allocation10 + $0x1f8] sm:$0xff]  ;;  %v1542_v16 = vld [vmem:[#allocation11 + $0xd0] sm:$0xff] }
 0x66c   :  { %3172 = vmatpush1.bf16.msra.mxu1 %v3171_v32  ;;  %3236 = vmatpush1.bf16.msra.mxu0 %v3235_v33  ;;  %v1413_v32 = vld [vmem:[#allocation10 + $0xd0] sm:$0xff]  ;;  %v1416_v33 = vld [vmem:[#allocation10 + $0xe8] sm:$0xff] }
 0x66d   :  { %3174 = vmatprep.subr.bf16.mxu1 %v3173_v34  ;;  %3238 = vmatprep.subr.bf16.mxu0 %v3237_v52  ;;  %v1418_v34 = vld [vmem:[#allocation10 + $0xf8] sm:$0xff]  ;;  %v3267_v52 = vpack.c.bf16 %v1413_v32, %v1411_v31 }
 0x66e   :  { %v3269_v35 = vpack.c.bf16 %v1418_v34, %v1416_v33  ;;  %v1454_v31 = vld [vmem:[#allocation10 + $0x218] sm:$0xff]  ;;  %v1517_v33 = vld [vmem:[#allocation11 + $0x8] sm:$0xff] }
 0x66f   :  { %v1519_v34 = vld [vmem:[#allocation11 + $0x18] sm:$0xff] }
 0x670   :  { %3176 = vmatpush1.bf16.msra.mxu1 %v3175_v0  ;;  %3240 = vmatpush1.bf16.msra.mxu0 %v3239_v37  ;;  %v1420_v0 = vld [vmem:[#allocation10 + $0x108] sm:$0xff]  ;;  %v3271_v37 = vpack.c.bf16 %v1417_v57, %v1415_v61  ;;  %v1518_v61 = vld [vmem:[#allocation11 + $0x10] sm:$0xff] }
 0x671   :  { %3242 = vmatprep.subr.bf16.mxu1 %v3241_v40  ;;  %v3273_v38 = vpack.c.bf16 %v1422_v36, %v1420_v0  ;;  %v1421_v40 = vld [vmem:[#allocation10 + $0x110] sm:$0xff]  ;;  %v1521_v57 = vld [vmem:[#allocation11 + $0x28] sm:$0xff]  ;;  %v1523_v0 = vld [vmem:[#allocation11 + $0x38] sm:$0xff] }
 0x672   :  { %v3275_v43 = vpack.c.bf16 %v1421_v40, %v1419_v39  ;;  %v1522_v39 = vld [vmem:[#allocation11 + $0x30] sm:$0xff]  ;;  %v1525_v40 = vld [vmem:[#allocation11 + $0x48] sm:$0xff] }
 0x705   :  { %v1651_v45 = vpop.f32.mrb[14].mxu0  ;;  %v1732_v46 = vpop.f32.mrb[14].mxu1 }
 0x706   :  { %v1653_v48 = vpop.f32.mrb[15].mxu0  ;;  %v1734_v49 = vpop.f32.mrb[15].mxu1 }
 0x707   :  { %1807 = vmatprep.mubr.f32.mxu1 %v1653_v48  ;;  %1884 = vmatprep.mubr.f32.mxu0 %v1734_v49  ;;  %v1430_v48 = vld [vmem:[#allocation10 + $0x158] sm:$0xff] }
 0x708   :  { %1808 = vmatmul.mubr.f32.vlgmr.msra.gmra.mrb[18].mxu1 %v1651_v45  ;;  %1885 = vmatmul.mubr.f32.vlgmr.msra.gmra.mrb[18].mxu0 %v1732_v46  ;;  %v1423_v45 = vld [vmem:[#allocation10 + $0x120] sm:$0xff]  ;;  %v1425_v46 = vld [vmem:[#allocation10 + $0x130] sm:$0xff] }
 0x709   :  { %v1657_v55 = vpop.f32.mrb[16].mxu0  ;;  %v1738_v56 = vpop.f32.mrb[16].mxu1  ;;  %3244 = vmatpush1.bf16.msra.mxu1 %v3243_v47  ;;  %v1428_v47 = vld [vmem:[#allocation10 + $0x148] sm:$0xff]  ;;  %v3279_v49 = vpack.c.bf16 %v1425_v46, %v1423_v45  ;;  %v1526_v45 = vld [vmem:[#allocation11 + $0x50] sm:$0xff] }
 0x70a   :  { %v1659_v59 = vpop.f32.mrb[17].mxu0  ;;  %v1740_v60 = vpop.f32.mrb[17].mxu1  ;;  %3246 = vmatprep.subr.bf16.mxu1 %v3245_v50  ;;  %v3281_v50 = vpack.c.bf16 %v1430_v48, %v1428_v47  ;;  %v1529_v46 = vld [vmem:[#allocation11 + $0x68] sm:$0xff]  ;;  %v1531_v47 = vld [vmem:[#allocation11 + $0x78] sm:$0xff] }
 0x70b   :  { %1813 = vmatprep.mubr.f32.mxu1 %v1659_v59  ;;  %1890 = vmatprep.mubr.f32.mxu0 %v1740_v60  ;;  %v1433_v59 = vld [vmem:[#allocation10 + $0x170] sm:$0xff]  ;;  %v1436_v60 = vld [vmem:[#allocation10 + $0x188] sm:$0xff] }
 0x70c   :  { %1814 = vmatmul.mubr.f32.gmra.mrb[20].mxu1 %v1657_v55  ;;  %1891 = vmatmul.mubr.f32.gmra.mrb[20].mxu0 %v1738_v56  ;;  %v3283_v55 = vpack.c.bf16 %v1429_v51, %v1427_v54  ;;  %v3285_v56 = vpack.c.bf16 %v1434_v62, %v1432_v53  ;;  %v1530_v54 = vld [vmem:[#allocation11 + $0x70] sm:$0xff]  ;;  %v1533_v51 = vld [vmem:[#allocation11 + $0x88] sm:$0xff]  ;;  %v1535_v53 = vld [vmem:[#allocation11 + $0x98] sm:$0xff] }
 0x70d   :  { %3248 = vmatpush1.bf16.msra.mxu1 %v3247_v58  ;;  %v1431_v58 = vld [vmem:[#allocation10 + $0x160] sm:$0xff] }
 0x70e   :  { %3250 = vmatprep.subr.bf16.mxu1 %v3249_v4  ;;  %v1438_v4 = vld [vmem:[#allocation10 + $0x198] sm:$0xff]  ;;  %v3287_v5 = vpack.c.bf16 %v1433_v59, %v1431_v58  ;;  %v1534_v58 = vld [vmem:[#allocation11 + $0x90] sm:$0xff]  ;;  %v1537_v59 = vld [vmem:[#allocation11 + $0xa8] sm:$0xff] }
 0x70f   :  { %v3289_v6 = vpack.c.bf16 %v1438_v4, %v1436_v60  ;;  %v1539_v60 = vld [vmem:[#allocation11 + $0xb8] sm:$0xff] }
 0x711   :  { %3252 = vmatpush1.bf16.msra.mxu1 %v3251_v11  ;;  %v1440_v11 = vld [vmem:[#allocation10 + $0x1a8] sm:$0xff] }
 0x712   :  { %3254 = vmatprep.subr.bf16.mxu1 %v3253_v12  ;;  %v1442_v12 = vld [vmem:[#allocation10 + $0x1b8] sm:$0xff] }
 0x713   :  { %v3293_v15 = vpack.c.bf16 %v1442_v12, %v1440_v11  ;;  %v1543_v11 = vld [vmem:[#allocation11 + $0xd8] sm:$0xff] }
 0x715   :  { %3256 = vmatpush1.bf16.msra.mxu1 %v3255_v17  ;;  %v1444_v17 = vld [vmem:[#allocation10 + $0x1c8] sm:$0xff] }
 0x716   :  { %3258 = vmatprep.subr.bf16.mxu1 %v3257_v18  ;;  %v1446_v18 = vld [vmem:[#allocation10 + $0x1d8] sm:$0xff] }
 0x717   :  { %v3297_v20 = vpack.c.bf16 %v1446_v18, %v1444_v17  ;;  %v1547_v17 = vld [vmem:[#allocation11 + $0xf8] sm:$0xff] }
 0x719   :  { %3260 = vmatpush1.bf16.msra.mxu1 %v3259_v23  ;;  %v3299_v23 = vpack.c.bf16 %v1445_v22, %v1443_v21  ;;  %v1546_v21 = vld [vmem:[#allocation11 + $0xf0] sm:$0xff]  ;;  %v1549_v22 = vld [vmem:[#allocation11 + $0x108] sm:$0xff] }
 0x71a   :  { %3262 = vmatprep.subr.bf16.mxu1 %v3261_v24  ;;  %v1448_v24 = vld [vmem:[#allocation10 + $0x1e8] sm:$0xff] }
 0x71b   :  { %v3301_v26 = vpack.c.bf16 %v1450_v25, %v1448_v24 }
 0x71d   :  { %3264 = vmatpush1.bf16.msra.mxu1 %v3263_v29  ;;  %v3303_v29 = vpack.c.bf16 %v1449_v28, %v1447_v27  ;;  %v1550_v27 = vld [vmem:[#allocation11 + $0x110] sm:$0xff]  ;;  %v1553_v28 = vld [vmem:[#allocation11 + $0x128] sm:$0xff] }
 0x71e   :  { %3266 = vmatprep.subr.bf16.mxu1 %v3265_v30  ;;  %v1452_v30 = vld [vmem:[#allocation10 + $0x208] sm:$0xff] }
 0x71f   :  { %v3305_v32 = vpack.c.bf16 %v1454_v31, %v1452_v30 }
 0x721   :  { %3268 = vmatpush1.bf16.msra.mxu1 %v3267_v52  ;;  %v1516_v52 = vld [vmem:[#allocation11] sm:$0xff] }
 0x722   :  { %3270 = vmatprep.subr.bf16.mxu1 %v3269_v35  ;;  %v3369_v35 = vpack.c.bf16 %v1519_v34, %v1517_v33  ;;  %v3371_v36 = vpack.c.bf16 %v1518_v61, %v1516_v52  ;;  %v1554_v33 = vld [vmem:[#allocation11 + $0x130] sm:$0xff]  ;;  %v1557_v34 = vld [vmem:[#allocation11 + $0x148] sm:$0xff]  ;;  %v1559_v52 = vld [vmem:[#allocation11 + $0x158] sm:$0xff] }
 0x723   :  { %v3409_v61 = vpack.c.bf16 %v1559_v52, %v1557_v34 }
 0x724   :  { %3370 = vmatprep.subr.bf16.mxu0 %v3369_v35 }
 0x725   :  { %3272 = vmatpush1.bf16.msra.mxu1 %v3271_v37  ;;  %v3373_v37 = vpack.c.bf16 %v1523_v0, %v1521_v57  ;;  %3372 = vmatpush1.bf16.msra.mxu0 %v3371_v36  ;;  %v1556_v57 = vld [vmem:[#allocation11 + $0x140] sm:$0xff]  ;;  %v1558_v0 = vld [vmem:[#allocation11 + $0x150] sm:$0xff]  ;;  %v1561_v36 = vld [vmem:[#allocation11 + $0x168] sm:$0xff] }
 0x726   :  { %3274 = vmatprep.subr.bf16.mxu1 %v3273_v38  ;;  %v1520_v38 = vld [vmem:[#allocation11 + $0x20] sm:$0xff] }
 0x727   :  { %v3375_v42 = vpack.c.bf16 %v1522_v39, %v1520_v38  ;;  %3374 = vmatprep.subr.bf16.mxu0 %v3373_v37  ;;  %v1563_v37 = vld [vmem:[#allocation11 + $0x178] sm:$0xff]  ;;  %v3411_v38 = vpack.c.bf16 %v1558_v0, %v1556_v57  ;;  %v1459_v57 = vld [vmem:[#allocation10 + $0x240] sm:$0xff]  ;;  %v1461_v0 = vld [vmem:[#allocation10 + $0x250] sm:$0xff] }
 0x728   :  { %v3413_v39 = vpack.c.bf16 %v1563_v37, %v1561_v36  ;;  %v1464_v37 = vld [vmem:[#allocation10 + $0x268] sm:$0xff] }
 0x729   :  { %3276 = vmatpush1.bf16.msra.mxu1 %v3275_v43  ;;  %v3377_v43 = vpack.c.bf16 %v1527_v41, %v1525_v40  ;;  %3376 = vmatpush1.bf16.msra.mxu0 %v3375_v42  ;;  %v1560_v40 = vld [vmem:[#allocation11 + $0x160] sm:$0xff]  ;;  %v1562_v41 = vld [vmem:[#allocation11 + $0x170] sm:$0xff]  ;;  %v1565_v42 = vld [vmem:[#allocation11 + $0x188] sm:$0xff] }
 0x72a   :  { %3278 = vmatprep.subr.bf16.mxu1 %v3277_v44  ;;  %v1524_v44 = vld [vmem:[#allocation11 + $0x40] sm:$0xff] }
 0x72b   :  { %v3379_v48 = vpack.c.bf16 %v1526_v45, %v1524_v44  ;;  %3378 = vmatprep.subr.bf16.mxu0 %v3377_v43  ;;  %v1567_v43 = vld [vmem:[#allocation11 + $0x198] sm:$0xff]  ;;  %v3415_v44 = vpack.c.bf16 %v1562_v41, %v1560_v40  ;;  %v1463_v41 = vld [vmem:[#allocation10 + $0x260] sm:$0xff] }
 0x72c   :  { %v3417_v45 = vpack.c.bf16 %v1567_v43, %v1565_v42  ;;  %v1465_v42 = vld [vmem:[#allocation10 + $0x270] sm:$0xff]  ;;  %v1468_v43 = vld [vmem:[#allocation10 + $0x288] sm:$0xff] }
 0x72d   :  { %3280 = vmatpush1.bf16.msra.mxu1 %v3279_v49  ;;  %v3381_v49 = vpack.c.bf16 %v1531_v47, %v1529_v46  ;;  %3380 = vmatpush1.bf16.msra.mxu0 %v3379_v48  ;;  %v1564_v46 = vld [vmem:[#allocation11 + $0x180] sm:$0xff]  ;;  %v1566_v47 = vld [vmem:[#allocation11 + $0x190] sm:$0xff]  ;;  %v1569_v48 = vld [vmem:[#allocation11 + $0x1a8] sm:$0xff] }
 0x72e   :  { %3282 = vmatprep.subr.bf16.mxu1 %v3281_v50  ;;  %v1528_v50 = vld [vmem:[#allocation11 + $0x60] sm:$0xff] }
 0x72f   :  { %v3383_v62 = vpack.c.bf16 %v1530_v54, %v1528_v50  ;;  %3382 = vmatprep.subr.bf16.mxu0 %v3381_v49  ;;  %v1571_v49 = vld [vmem:[#allocation11 + $0x1b8] sm:$0xff]  ;;  %v1386_v50 = vld [vmem:[%s4360_s14] sm:$0xf]  ;;  %v3419_v54 = vpack.c.bf16 %v1566_v47, %v1564_v46 }
 0x730   :  { %v1467_v47 = vld [vmem:[#allocation10 + $0x280] sm:$0xff] }
 0x731   :  { %3284 = vmatpush1.bf16.msra.mxu1 %v3283_v55  ;;  %v3385_v55 = vpack.c.bf16 %v1535_v53, %v1533_v51  ;;  %3384 = vmatpush1.bf16.msra.mxu0 %v3383_v62  ;;  %v3421_v51 = vpack.c.bf16 %v1571_v49, %v1569_v48  ;;  %v1568_v53 = vld [vmem:[#allocation11 + $0x1a0] sm:$0xff]  ;;  %v1570_v62 = vld [vmem:[#allocation11 + $0x1b0] sm:$0xff]  ;;  %v1472_v49 = vld [vmem:[#allocation10 + $0x2a8] sm:$0xff] }
 0x732   :  { %3286 = vmatprep.subr.bf16.mxu1 %v3285_v56  ;;  %v1532_v56 = vld [vmem:[#allocation11 + $0x80] sm:$0xff]  ;;  %v1469_v48 = vld [vmem:[#allocation10 + $0x290] sm:$0xff] }
 0x733   :  { %v3387_v4 = vpack.c.bf16 %v1534_v58, %v1532_v56  ;;  %3386 = vmatprep.subr.bf16.mxu0 %v3385_v55  ;;  %v1901_v55 = vrot.slane %v1386_v50, %v4147_v2  ;;  %v1909_v56 = vrot.slane %v1386_v50, %v975_v9  ;;  %v1573_v58 = vld [vmem:[#allocation11 + $0x1c8] sm:$0xff]  ;;  %v4288_v9 = vrot.slane %v1386_v50, %v979_v13 }
 0x735   :  { %3288 = vmatpush1.bf16.msra.mxu1 %v3287_v5  ;;  %v3389_v5 = vpack.c.bf16 %v1539_v60, %v1537_v59  ;;  %3388 = vmatpush1.bf16.msra.mxu0 %v3387_v4  ;;  %v1575_v59 = vld [vmem:[#allocation11 + $0x1d8] sm:$0xff]  ;;  %v1905_v60 = vrot.slane %v1386_v50, %v4150_v3  ;;  %v3423_v4 = vpack.c.bf16 %v1570_v62, %v1568_v53  ;;  %v1471_v53 = vld [vmem:[#allocation10 + $0x2a0] sm:$0xff]  ;;  %v1473_v62 = vld [vmem:[#allocation10 + $0x2b0] sm:$0xff] }
 0x736   :  { %3290 = vmatprep.subr.bf16.mxu1 %v3289_v6  ;;  %v1536_v6 = vld [vmem:[#allocation11 + $0xa0] sm:$0xff]  ;;  %v1474_v50 = vld [vmem:[#allocation10 + $0x2b8] sm:$0xff] }
 0x737   :  { %v3391_v12 = vpack.c.bf16 %v1538_v8, %v1536_v6  ;;  %3390 = vmatprep.subr.bf16.mxu0 %v3389_v5  ;;  %v3425_v8 = vpack.c.bf16 %v1575_v59, %v1573_v58  ;;  %v3327_v58 = vpack.c.bf16 %v1473_v62, %v1471_v53  ;;  %v1512_v53 = vld [vmem:[#allocation10 + $0x3e8] sm:$0xff]  ;;  %v1514_v62 = vld [vmem:[#allocation10 + $0x3f8] sm:$0xff] }
 0x739   :  { %3292 = vmatpush1.bf16.msra.mxu1 %v3291_v63  ;;  %v3393_v63 = vpack.c.bf16 %v1543_v11, %v1541_v10  ;;  %3392 = vmatpush1.bf16.msra.mxu0 %v3391_v12 }
 0x73a   :  { %3294 = vmatprep.subr.bf16.mxu1 %v3293_v15  ;;  %v1540_v15 = vld [vmem:[#allocation11 + $0xc0] sm:$0xff] }
 0x73b   :  { %v3395_v18 = vpack.c.bf16 %v1542_v16, %v1540_v15  ;;  %3394 = vmatprep.subr.bf16.mxu0 %v3393_v63  ;;  %v1451_v15 = vld [vmem:[#allocation10 + $0x200] sm:$0xff]  ;;  %v1453_v16 = vld [vmem:[#allocation10 + $0x210] sm:$0xff] }
 0x73d   :  { %3296 = vmatpush1.bf16.msra.mxu1 %v3295_v19  ;;  %v3397_v19 = vpack.c.bf16 %v1547_v17, %v1545_v7  ;;  %3396 = vmatpush1.bf16.msra.mxu0 %v3395_v18  ;;  %v1456_v17 = vld [vmem:[#allocation10 + $0x228] sm:$0xff]  ;;  %v1458_v18 = vld [vmem:[#allocation10 + $0x238] sm:$0xff] }
 0x73e   :  { %3298 = vmatprep.subr.bf16.mxu1 %v3297_v20  ;;  %v1544_v20 = vld [vmem:[#allocation11 + $0xe0] sm:$0xff] }
 0x73f   :  { %v3399_v24 = vpack.c.bf16 %v1546_v21, %v1544_v20  ;;  %3398 = vmatprep.subr.bf16.mxu0 %v3397_v19 }
 0x741   :  { %3300 = vmatpush1.bf16.msra.mxu1 %v3299_v23  ;;  %v1551_v23 = vld [vmem:[#allocation11 + $0x118] sm:$0xff]  ;;  %3400 = vmatpush1.bf16.msra.mxu0 %v3399_v24 }
 0x742   :  { %3302 = vmatprep.subr.bf16.mxu1 %v3301_v26  ;;  %v3401_v25 = vpack.c.bf16 %v1551_v23, %v1549_v22  ;;  %v1548_v26 = vld [vmem:[#allocation11 + $0x100] sm:$0xff]  ;;  %v3307_v22 = vpack.c.bf16 %v1453_v16, %v1451_v15  ;;  %v1484_v15 = vld [vmem:[#allocation10 + $0x308] sm:$0xff]  ;;  %v1486_v16 = vld [vmem:[#allocation10 + $0x318] sm:$0xff] }
 0x743   :  { %v3403_v30 = vpack.c.bf16 %v1550_v27, %v1548_v26 }
 0x744   :  { %3402 = vmatprep.subr.bf16.mxu0 %v3401_v25 }
 0x745   :  { %3304 = vmatpush1.bf16.msra.mxu1 %v3303_v29  ;;  %v1555_v29 = vld [vmem:[#allocation11 + $0x138] sm:$0xff]  ;;  %3404 = vmatpush1.bf16.msra.mxu0 %v3403_v30  ;;  %v1457_v30 = vld [vmem:[#allocation10 + $0x230] sm:$0xff] }
 0x746   :  { %3306 = vmatprep.subr.bf16.mxu1 %v3305_v32  ;;  %v3405_v31 = vpack.c.bf16 %v1555_v29, %v1553_v28  ;;  %v1552_v32 = vld [vmem:[#allocation11 + $0x120] sm:$0xff]  ;;  %v3309_v28 = vpack.c.bf16 %v1458_v18, %v1456_v17  ;;  %v3337_v17 = vpack.c.bf16 %v1486_v16, %v1484_v15  ;;  %v1577_v15 = vld [vmem:[#allocation11 + $0x1e8] sm:$0xff]  ;;  %v1579_v16 = vld [vmem:[#allocation11 + $0x1f8] sm:$0xff] }
 0x747   :  { %v3407_v35 = vpack.c.bf16 %v1554_v33, %v1552_v32  ;;  %v1455_v29 = vld [vmem:[#allocation10 + $0x220] sm:$0xff]  ;;  %v1460_v32 = vld [vmem:[#allocation10 + $0x248] sm:$0xff]  ;;  %v1462_v33 = vld [vmem:[#allocation10 + $0x258] sm:$0xff] }
 0x748   :  { %3406 = vmatprep.subr.bf16.mxu0 %v3405_v31  ;;  %v3311_v52 = vpack.c.bf16 %v1457_v30, %v1455_v29  ;;  %v1483_v18 = vld [vmem:[#allocation10 + $0x300] sm:$0xff]  ;;  %v1494_v29 = vld [vmem:[#allocation10 + $0x358] sm:$0xff] }
 0x749   :  { %3408 = vmatpush1.bf16.msra.mxu0 %v3407_v35 }
 0x74a   :  { %3410 = vmatprep.subr.bf16.mxu0 %v3409_v61  ;;  %v3313_v61 = vpack.c.bf16 %v1462_v33, %v1460_v32  ;;  %v1493_v32 = vld [vmem:[#allocation10 + $0x350] sm:$0xff]  ;;  %v1496_v33 = vld [vmem:[#allocation10 + $0x368] sm:$0xff] }
 0x74d   :  { %3412 = vmatpush1.bf16.msra.mxu0 %v3411_v38  ;;  %v1466_v38 = vld [vmem:[#allocation10 + $0x278] sm:$0xff] }
 0x74e   :  { %3414 = vmatprep.subr.bf16.mxu0 %v3413_v39  ;;  %v3315_v39 = vpack.c.bf16 %v1461_v0, %v1459_v57  ;;  %v3317_v40 = vpack.c.bf16 %v1466_v38, %v1464_v37  ;;  %v1497_v57 = vld [vmem:[#allocation10 + $0x370] sm:$0xff]  ;;  %v1500_v0 = vld [vmem:[#allocation10 + $0x388] sm:$0xff] }
 0x751   :  { %3416 = vmatpush1.bf16.msra.mxu0 %v3415_v44  ;;  %v1470_v44 = vld [vmem:[#allocation10 + $0x298] sm:$0xff] }
 0x752   :  { %3418 = vmatprep.subr.bf16.mxu0 %v3417_v45  ;;  %v3319_v45 = vpack.c.bf16 %v1465_v42, %v1463_v41  ;;  %v3321_v46 = vpack.c.bf16 %v1470_v44, %v1468_v43  ;;  %v1504_v41 = vld [vmem:[#allocation10 + $0x3a8] sm:$0xff]  ;;  %v1506_v42 = vld [vmem:[#allocation10 + $0x3b8] sm:$0xff] }
 0x753   :  { %v3357_v44 = vpack.c.bf16 %v1506_v42, %v1504_v41 }
 0x755   :  { %3420 = vmatpush1.bf16.msra.mxu0 %v3419_v54  ;;  %v3323_v54 = vpack.c.bf16 %v1469_v48, %v1467_v47  ;;  %v1508_v47 = vld [vmem:[#allocation10 + $0x3c8] sm:$0xff]  ;;  %v1510_v48 = vld [vmem:[#allocation10 + $0x3d8] sm:$0xff] }
 0x756   :  { %3422 = vmatprep.subr.bf16.mxu0 %v3421_v51  ;;  %v3325_v51 = vpack.c.bf16 %v1474_v50, %v1472_v49  ;;  %v3361_v50 = vpack.c.bf16 %v1510_v48, %v1508_v47 }
 0x759   :  { %3424 = vmatpush1.bf16.msra.mxu0 %v3423_v4  ;;  %v1477_v4 = vld [vmem:[#allocation10 + $0x2d0] sm:$0xff] }
 0x75a   :  { %3426 = vmatprep.subr.bf16.mxu0 %v3425_v8 }
 0x7db   :  { %v1809_v5 = vpop.f32.mrb[18].mxu1  ;;  %v1886_v6 = vpop.f32.mrb[18].mxu0 }
 0x7dc   :  { %v1918_v10 = vadd.f32 %v1901_v55, %v1809_v5  ;;  %v4284_v11 = vadd.f32 %v1909_v56, %v1886_v6  ;;  %v1811_v12 = vpop.f32.mrb[19].mxu1  ;;  %v1888_v63 = vpop.f32.mrb[19].mxu0  ;;  %v1480_v5 = vld [vmem:[#allocation10 + $0x2e8] sm:$0xff]  ;;  %v1482_v6 = vld [vmem:[#allocation10 + $0x2f8] sm:$0xff] }
 0x7dd   :  { %v1919_v7 = vadd.f32 %v1905_v60, %v1811_v12  ;;  %v1921_v13 = vadd.f32 %v4288_v9, %v1888_v63  ;;  %v1479_v12 = vld [vmem:[#allocation10 + $0x2e0] sm:$0xff]  ;;  %v1481_v63 = vld [vmem:[#allocation10 + $0x2f0] sm:$0xff] }
 0x7de   :  { %v1926_v23 = vmax.f32 %v1918_v10, 0.0  ;;  %v3333_v10 = vpack.c.bf16 %v1482_v6, %v1480_v5  ;;  %v1928_v5 = vmax.f32 %v4284_v11, 0.0  ;;  %v2813_v11 = vld [vmem:[%s4387_s0] ss:$0 sm:$0xff] }
 0x7df   :  { %v1927_v19 = vmax.f32 %v1919_v7, 0.0  ;;  %v1815_v20 = vpop.f32.mrb[20].mxu1  ;;  %v1892_v21 = vpop.f32.mrb[20].mxu0  ;;  %v1929_v36 = vmax.f32 %v1921_v13, 0.0  ;;  %v3335_v7 = vpack.c.bf16 %v1481_v63, %v1479_v12  ;;  %v1574_v12 = vld [vmem:[#allocation11 + $0x1d0] sm:$0xff]  ;;  %vm2196_vm3 = vcmp.eq.s32.totalorder %v2813_v11, %v4144_v1 }
 0x7e0   :  { %v1922_v24 = vadd.f32 %v1901_v55, %v1815_v20  ;;  %v4290_v25 = vadd.f32 %v1909_v56, %v1892_v21  ;;  %v1817_v26 = vpop.f32.mrb[21].mxu1  ;;  %v4292_v27 = vpop.f32.mrb[21].mxu0  ;;  %v1476_v55 = vld [vmem:[#allocation10 + $0x2c8] sm:$0xff]  ;;  %v1478_v56 = vld [vmem:[#allocation10 + $0x2d8] sm:$0xff] }
 0x7e1   :  { %v1923_v31 = vadd.f32 %v1905_v60, %v1817_v26  ;;  %2009 = vmatprep.mubr.f32.mxu1 %v1927_v19  ;;  %v3329_v59 = vpack.c.bf16 %v1478_v56, %v1476_v55  ;;  %v1475_v60 = vld [vmem:[#allocation10 + $0x2c0] sm:$0xff]  ;;  %v1485_v19 = vld [vmem:[#allocation10 + $0x310] sm:$0xff]  ;;  %v1488_v20 = vld [vmem:[#allocation10 + $0x328] sm:$0xff]  ;;  %v3365_v56 = vpack.c.bf16 %v1514_v62, %v1512_v53 }
 0x7e2   :  { %2010 = vmatmul.mubr.f32.vlgmr.msra.gmra.mrb[22].mxu1 %v1926_v23  ;;  %v1930_v35 = vmax.f32 %v1922_v24, 0.0  ;;  %v3331_v8 = vpack.c.bf16 %v1477_v4, %v1475_v60  ;;  %v1490_v21 = vld [vmem:[#allocation10 + $0x338] sm:$0xff]  ;;  %v1487_v24 = vld [vmem:[#allocation10 + $0x320] sm:$0xff]  ;;  %v1489_v26 = vld [vmem:[#allocation10 + $0x330] sm:$0xff]  ;;  %v1925_v4 = vadd.f32 %v4288_v9, %v4292_v27 }
 0x7e3   :  { %v1931_v34 = vmax.f32 %v1923_v31, 0.0  ;;  %3308 = vmatpush1.bf16.msra.mxu1 %v3307_v22  ;;  %v3339_v22 = vpack.c.bf16 %v1485_v19, %v1483_v18  ;;  %v3341_v23 = vpack.c.bf16 %v1490_v21, %v1488_v20  ;;  %v3343_v30 = vpack.c.bf16 %v1489_v26, %v1487_v24  ;;  %v1491_v31 = vld [vmem:[#allocation10 + $0x340] sm:$0xff]  ;;  %v1578_v18 = vld [vmem:[#allocation11 + $0x1f0] sm:$0xff] }
 0x7e4   :  { %3310 = vmatprep.subr.bf16.mxu1 %v3309_v28  ;;  %v1492_v28 = vld [vmem:[#allocation10 + $0x348] sm:$0xff]  ;;  %v1933_v6 = vmax.f32 %v1925_v4, 0.0  ;;  %v2815_v9 = vld [vmem:[%s4388_s25] ss:$0 sm:$0xff] }
 0x7e5   :  { %2015 = vmatprep.mubr.f32.mxu1 %v1931_v34  ;;  %v3345_v13 = vpack.c.bf16 %v1494_v29, %v1492_v28  ;;  %v1498_v34 = vld [vmem:[#allocation10 + $0x378] sm:$0xff]  ;;  %vm2284_vm4 = vcmp.eq.s32.totalorder %v2815_v9, %v4144_v1  ;;  %v2378_v9 = vld [vmem:[#allocation13 + $0x60] sm:$0xff] }
 0x7e6   :  { %2016 = vmatmul.mubr.f32.gmra.mrb[24].mxu1 %v1930_v35  ;;  %v3349_v35 = vpack.c.bf16 %v1498_v34, %v1496_v33  ;;  %v2285_v27 = vsel %vm2284_vm4, 1.0, %v3877_v14 }
 0x7e7   :  { %3312 = vmatpush1.bf16.msra.mxu1 %v3311_v52  ;;  %2086 = vmatprep.mubr.f32.mxu1 %v1929_v36  ;;  %v3347_v52 = vpack.c.bf16 %v1493_v32, %v1491_v31  ;;  %v1502_v36 = vld [vmem:[#allocation10 + $0x398] sm:$0xff]  ;;  %v2286_v21 = vsel %vm2198_vm2, %v2285_v27, 0.0 }
 0x7e8   :  { %3314 = vmatprep.subr.bf16.mxu1 %v3313_v61  ;;  %v1495_v61 = vld [vmem:[#allocation10 + $0x360] sm:$0xff]  ;;  %v3353_v38 = vpack.c.bf16 %v1502_v36, %v1500_v0  ;;  %2287 = vadd.xlane.f32.xlu1 %v2286_v21 }
 0x7e9   :  { %v3351_v37 = vpack.c.bf16 %v1497_v57, %v1495_v61 }
 0x7eb   :  { %3316 = vmatpush1.bf16.msra.mxu1 %v3315_v39  ;;  %v1499_v39 = vld [vmem:[#allocation10 + $0x380] sm:$0xff] }
 0x7ec   :  { %3318 = vmatprep.subr.bf16.mxu1 %v3317_v40  ;;  %v1501_v40 = vld [vmem:[#allocation10 + $0x390] sm:$0xff] }
 0x7ed   :  { %v3355_v43 = vpack.c.bf16 %v1501_v40, %v1499_v39 }
 0x7ef   :  { %3320 = vmatpush1.bf16.msra.mxu1 %v3319_v45  ;;  %v1503_v45 = vld [vmem:[#allocation10 + $0x3a0] sm:$0xff] }
 0x7f0   :  { %3322 = vmatprep.subr.bf16.mxu1 %v3321_v46  ;;  %v1505_v46 = vld [vmem:[#allocation10 + $0x3b0] sm:$0xff] }
 0x7f1   :  { %v3359_v49 = vpack.c.bf16 %v1505_v46, %v1503_v45 }
 0x7f3   :  { %3324 = vmatpush1.bf16.msra.mxu1 %v3323_v54  ;;  %v1507_v54 = vld [vmem:[#allocation10 + $0x3c0] sm:$0xff] }
 0x7f4   :  { %3326 = vmatprep.subr.bf16.mxu1 %v3325_v51  ;;  %v1509_v51 = vld [vmem:[#allocation10 + $0x3d0] sm:$0xff] }
 0x7f5   :  { %v3363_v55 = vpack.c.bf16 %v1509_v51, %v1507_v54  ;;  %v2367_v54 = vld [vmem:[#allocation13 + $0x8] sm:$0xff]  ;;  %v2369_v51 = vld [vmem:[#allocation13 + $0x18] sm:$0xff] }
 0x7f7   :  { %3328 = vmatpush1.bf16.msra.mxu1 %v3327_v58  ;;  %v1511_v58 = vld [vmem:[#allocation10 + $0x3e0] sm:$0xff] }
 0x7f8   :  { %3330 = vmatprep.subr.bf16.mxu1 %v3329_v59  ;;  %v1513_v59 = vld [vmem:[#allocation10 + $0x3f0] sm:$0xff] }
 0x7f9   :  { %v3367_v60 = vpack.c.bf16 %v1513_v59, %v1511_v58  ;;  %v2368_v58 = vld [vmem:[#allocation13 + $0x10] sm:$0xff]  ;;  %v2371_v59 = vld [vmem:[#allocation13 + $0x28] sm:$0xff] }
 0x7fb   :  { %3332 = vmatpush1.bf16.msra.mxu1 %v3331_v8  ;;  %v1932_v8 = vmax.f32 %v4290_v25, 0.0  ;;  %v2197_v25 = vsel %vm2196_vm3, 1.0, %v3877_v14 }
 0x7fc   :  { %3334 = vmatprep.subr.bf16.mxu1 %v3333_v10  ;;  %v1572_v10 = vld [vmem:[#allocation11 + $0x1c0] sm:$0xff]  ;;  %v2199_v20 = vsel %vm2198_vm2, %v2197_v25, 0.0 }
 0x7fd   :  { %v3427_v63 = vpack.c.bf16 %v1574_v12, %v1572_v10  ;;  %2200 = vadd.xlane.f32.xlu0 %v2199_v20  ;;  %v2372_v10 = vld [vmem:[#allocation13 + $0x30] sm:$0xff]  ;;  %v2375_v12 = vld [vmem:[#allocation13 + $0x48] sm:$0xff]  ;;  %v2385_v20 = vld [vmem:[#allocation13 + $0x98] sm:$0xff] }
 0x7ff   :  { %3336 = vmatpush1.bf16.msra.mxu1 %v3335_v7  ;;  %3428 = vmatpush1.bf16.msra.mxu0 %v3427_v63  ;;  %v3429_v7 = vpack.c.bf16 %v1579_v16, %v1577_v15  ;;  %v2377_v63 = vld [vmem:[#allocation13 + $0x58] sm:$0xff] }
 0x800   :  { %3338 = vmatprep.subr.bf16.mxu1 %v3337_v17  ;;  %v1576_v17 = vld [vmem:[#allocation11 + $0x1e0] sm:$0xff]  ;;  %v3449_v16 = vpack.c.bf16 %v2377_v63, %v2375_v12 }
 0x801   :  { %v3431_v19 = vpack.c.bf16 %v1578_v18, %v1576_v17  ;;  %3430 = vmatprep.subr.bf16.mxu0 %v3429_v7  ;;  %v2374_v7 = vld [vmem:[#allocation13 + $0x40] sm:$0xff]  ;;  %v2376_v17 = vld [vmem:[#allocation13 + $0x50] sm:$0xff]  ;;  %v2379_v18 = vld [vmem:[#allocation13 + $0x68] sm:$0xff] }
 0x802   :  { %v3451_v11 = vpack.c.bf16 %v2376_v17, %v2374_v7  ;;  %v2419_v7 = vld [vmem:[#allocation13 + $0x1a8] sm:$0xff]  ;;  %v2421_v17 = vld [vmem:[#allocation13 + $0x1b8] sm:$0xff] }
 0x803   :  { %3340 = vmatpush1.bf16.msra.mxu1 %v3339_v22  ;;  %3432 = vmatpush1.bf16.msra.mxu0 %v3431_v19  ;;  %v1515_v22 = vld [vmem:[%s4362_s16] sm:$0x3]  ;;  %v2381_v19 = vld [vmem:[#allocation13 + $0x78] sm:$0xff] }
 0x804   :  { %3342 = vmatprep.subr.bf16.mxu1 %v3341_v23  ;;  %v1938_v23 = vrot.slane %v1515_v22, %v4147_v2  ;;  %v1942_v24 = vrot.slane %v1515_v22, %v4150_v3 }
 0x807   :  { %3344 = vmatpush1.bf16.msra.mxu1 %v3343_v30 }
 0x808   :  { %3346 = vmatprep.subr.bf16.mxu1 %v3345_v13 }
 0x80b   :  { %3348 = vmatpush1.bf16.msra.mxu1 %v3347_v52 }
 0x80c   :  { %3350 = vmatprep.subr.bf16.mxu1 %v3349_v35 }
 0x80f   :  { %3352 = vmatpush1.bf16.msra.mxu1 %v3351_v37  ;;  %v1580_v37 = vld [vmem:[%s4364_s18] sm:$0x3] }
 0x810   :  { %3354 = vmatprep.subr.bf16.mxu1 %v3353_v38  ;;  %v2107_v39 = vrot.slane %v1580_v37, %v4147_v2  ;;  %v2111_v41 = vrot.slane %v1580_v37, %v4150_v3  ;;  %v2394_v37 = vld [vmem:[#allocation13 + $0xe0] sm:$0xff] }
 0x813   :  { %3356 = vmatpush1.bf16.msra.mxu1 %v3355_v43 }
 0x814   :  { %3358 = vmatprep.subr.bf16.mxu1 %v3357_v44 }
 0x817   :  { %3360 = vmatpush1.bf16.msra.mxu1 %v3359_v49 }
 0x818   :  { %3362 = vmatprep.subr.bf16.mxu1 %v3361_v50 }
 0x81b   :  { %3364 = vmatpush1.bf16.msra.mxu1 %v3363_v55  ;;  %v3441_v55 = vpack.c.bf16 %v2369_v51, %v2367_v54  ;;  %v2407_v54 = vld [vmem:[#allocation13 + $0x148] sm:$0xff]  ;;  %v2409_v51 = vld [vmem:[#allocation13 + $0x158] sm:$0xff] }
 0x81c   :  { %3366 = vmatprep.subr.bf16.mxu1 %v3365_v56  ;;  %v2366_v56 = vld [vmem:[#allocation13] sm:$0xff] }
 0x81f   :  { %3368 = vmatpush1.bf16.msra.mxu1 %v3367_v60  ;;  %v2373_v60 = vld [vmem:[#allocation13 + $0x38] sm:$0xff] }
 0x822   :  { %2087 = vmatmul.mubr.f32.vlgmr.msra.gmra.mrb[22].mxu1 %v1928_v5  ;;  %v3443_v5 = vpack.c.bf16 %v2368_v58, %v2366_v56  ;;  %v2408_v56 = vld [vmem:[#allocation13 + $0x150] sm:$0xff]  ;;  %v2411_v58 = vld [vmem:[#allocation13 + $0x168] sm:$0xff] }
 0x823   :  { %2092 = vmatprep.mubr.f32.mxu1 %v1933_v6  ;;  %v3445_v6 = vpack.c.bf16 %v2373_v60, %v2371_v59  ;;  %v2413_v59 = vld [vmem:[#allocation13 + $0x178] sm:$0xff] }
 0x826   :  { %2093 = vmatmul.mubr.f32.gmra.mrb[24].mxu1 %v1932_v8  ;;  %v2370_v8 = vld [vmem:[#allocation13 + $0x20] sm:$0xff] }
 0x827   :  { %v3447_v15 = vpack.c.bf16 %v2372_v10, %v2370_v8  ;;  %v2415_v8 = vld [vmem:[#allocation13 + $0x188] sm:$0xff]  ;;  %v2417_v10 = vld [vmem:[#allocation13 + $0x198] sm:$0xff] }
 0x828   :  { %v3489_v63 = vpack.c.bf16 %v2417_v10, %v2415_v8  ;;  %v2661_v8 = vld [vmem:[#allocation14 + $0x58] sm:$0xff]  ;;  %v2678_v10 = vld [vmem:[#allocation14 + $0xe0] sm:$0xff] }
 0x875   :  { %v2288_v0 = vpop.xlane.xlu1 %2287 }
 0x876   :  { %v2289_v36 = vmax.f32 %v2288_v0, 1.0 }
 0x88a   :  { %v2201_v61 = vpop.xlane.xlu0 %2200 }
 0x88b   :  { %v2202_v57 = vmax.f32 %v2201_v61, 1.0  ;;  %v2395_v61 = vld [vmem:[#allocation13 + $0xe8] sm:$0xff] }
 0x88d   :  { %3645 = vrcp.f32 %v2202_v57  ;;  %v2397_v57 = vld [vmem:[#allocation13 + $0xf8] sm:$0xff] }
 0x88e   :  { %3647 = vrcp.f32 %v2289_v36  ;;  %v3469_v36 = vpack.c.bf16 %v2397_v57, %v2395_v61  ;;  %v2651_v61 = vld [vmem:[#allocation14 + $0x8] sm:$0xff]  ;;  %v2668_v57 = vld [vmem:[#allocation14 + $0x90] sm:$0xff] }
 0x897   :  { %v3646_v48 = vpop.eup %3645 }
 0x898   :  { %v2204_v53 = vmul.f32 %v3646_v48, %v2197_v25  ;;  %v3648_v62 = vpop.eup %3647  ;;  %v2380_v25 = vld [vmem:[#allocation13 + $0x70] sm:$0xff] }
 0x899   :  { %v2291_v4 = vmul.f32 %v3648_v62, %v2285_v27  ;;  %v2383_v27 = vld [vmem:[#allocation13 + $0x88] sm:$0xff]  ;;  %v3455_v21 = vpack.c.bf16 %v2380_v25, %v2378_v9  ;;  %v3481_v62 = vpack.c.bf16 %v2409_v51, %v2407_v54  ;;  %v2425_v25 = vld [vmem:[#allocation13 + $0x1d8] sm:$0xff]  ;;  %v2674_v51 = vld [vmem:[#allocation14 + $0xc0] sm:$0xff] }
 0x89a   :  { %v3457_v22 = vpack.c.bf16 %v2385_v20, %v2383_v27  ;;  %v2423_v9 = vld [vmem:[#allocation13 + $0x1c8] sm:$0xff]  ;;  %v2657_v54 = vld [vmem:[#allocation14 + $0x38] sm:$0xff] }
 0x89b   :  { %v3497_v20 = vpack.c.bf16 %v2425_v25, %v2423_v9  ;;  %v2434_v25 = vld [vmem:[#allocation13 + $0x220] sm:$0xff] }
 0x8f5   :  { %v2088_v26 = vpop.f32.mrb[22].mxu1 }
 0x8f6   :  { %v3609_v28 = vadd.f32 %v2088_v26, %v1938_v23  ;;  %v2090_v29 = vpop.f32.mrb[23].mxu1  ;;  %v2387_v26 = vld [vmem:[#allocation13 + $0xa8] sm:$0xff] }
 0x8f7   :  { %v3610_v1 = vadd.f32 %v2090_v29, %v1942_v24 }
 0x8f8   :  { %v2099_v31 = vmax.f32 %v3609_v28, 0.0  ;;  %v2389_v28 = vld [vmem:[#allocation13 + $0xb8] sm:$0xff] }
 0x8f9   :  { %v2100_v30 = vmax.f32 %v3610_v1, 0.0  ;;  %v2094_v13 = vpop.f32.mrb[24].mxu1  ;;  %v3461_v1 = vpack.c.bf16 %v2389_v28, %v2387_v26 }
 0x8fa   :  { %v3611_v32 = vadd.f32 %v2094_v13, %v1938_v23  ;;  %v2096_v33 = vpop.f32.mrb[25].mxu1  ;;  %v2382_v23 = vld [vmem:[#allocation13 + $0x80] sm:$0xff]  ;;  %v2388_v13 = vld [vmem:[#allocation13 + $0xb0] sm:$0xff] }
 0x8fb   :  { %v3612_v34 = vadd.f32 %v2096_v33, %v1942_v24  ;;  %2178 = vmatprep.mubr.f32.mxu0 %v2100_v30  ;;  %v2384_v24 = vld [vmem:[#allocation13 + $0x90] sm:$0xff]  ;;  %v2386_v30 = vld [vmem:[#allocation13 + $0xa0] sm:$0xff] }
 0x8fc   :  { %2179 = vmatmul.mubr.f32.vlgmr.msra.gmra.mrb[22].mxu0 %v2099_v31  ;;  %v2101_v35 = vmax.f32 %v3611_v32, 0.0  ;;  %v3459_v29 = vpack.c.bf16 %v2384_v24, %v2382_v23  ;;  %v2391_v31 = vld [vmem:[#allocation13 + $0xc8] sm:$0xff]  ;;  %v2393_v32 = vld [vmem:[#allocation13 + $0xd8] sm:$0xff]  ;;  %v3463_v33 = vpack.c.bf16 %v2388_v13, %v2386_v30 }
 0x8fd   :  { %v2102_v52 = vmax.f32 %v3612_v34, 0.0  ;;  %v3465_v34 = vpack.c.bf16 %v2393_v32, %v2391_v31  ;;  %v2427_v23 = vld [vmem:[#allocation13 + $0x1e8] sm:$0xff]  ;;  %v2429_v24 = vld [vmem:[#allocation13 + $0x1f8] sm:$0xff] }
 0x8fe   :  { %v3501_v28 = vpack.c.bf16 %v2429_v24, %v2427_v23  ;;  %v2431_v13 = vld [vmem:[#allocation13 + $0x208] sm:$0xff]  ;;  %v2433_v31 = vld [vmem:[#allocation13 + $0x218] sm:$0xff] }
 0x8ff   :  { %2184 = vmatprep.mubr.f32.mxu0 %v2102_v52  ;;  %v2390_v52 = vld [vmem:[#allocation13 + $0xc0] sm:$0xff]  ;;  %v3505_v32 = vpack.c.bf16 %v2433_v31, %v2431_v13 }
 0x900   :  { %2185 = vmatmul.mubr.f32.gmra.mrb[24].mxu0 %v2101_v35  ;;  %v2392_v35 = vld [vmem:[#allocation13 + $0xd0] sm:$0xff] }
 0x901   :  { %2272 = vmatprep.mubr.f32.mxu0 %v3877_v14  ;;  %v3467_v0 = vpack.c.bf16 %v2392_v35, %v2390_v52  ;;  %v2650_v52 = vld [vmem:[#allocation14] sm:$0xff] }
 0x9cf   :  { %v2180_v38 = vpop.f32.mrb[22].mxu0 }
 0x9d0   :  { %v2182_v40 = vpop.f32.mrb[23].mxu0  ;;  %v2181_v43 = vadd.f32 %v2180_v38, %v2107_v39  ;;  %v2396_v38 = vld [vmem:[#allocation13 + $0xf0] sm:$0xff] }
 0x9d1   :  { %v2183_v46 = vadd.f32 %v2182_v40, %v2111_v41  ;;  %v2401_v40 = vld [vmem:[#allocation13 + $0x118] sm:$0xff] }
 0x9d3   :  { %v2186_v42 = vpop.f32.mrb[24].mxu0 }
 0x9d4   :  { %v2187_v44 = vadd.f32 %v2186_v42, %v2107_v39  ;;  %v2188_v45 = vpop.f32.mrb[25].mxu0  ;;  %v2399_v39 = vld [vmem:[#allocation13 + $0x108] sm:$0xff] }
 0x9d5   :  { %v2189_v47 = vadd.f32 %v2188_v45, %v2111_v41  ;;  %v3471_v41 = vpack.c.bf16 %v2396_v38, %v2394_v37  ;;  %v3473_v42 = vpack.c.bf16 %v2401_v40, %v2399_v39  ;;  %v2403_v45 = vld [vmem:[#allocation13 + $0x128] sm:$0xff]  ;;  %v2652_v38 = vld [vmem:[#allocation14 + $0x10] sm:$0xff]  ;;  %v2653_v39 = vld [vmem:[#allocation14 + $0x18] sm:$0xff] }
 0x9d6   :  { %v3435_v49 = vpack.c.bf16 %v2187_v44, %v2181_v43  ;;  %v2398_v43 = vld [vmem:[#allocation13 + $0x100] sm:$0xff]  ;;  %v2400_v44 = vld [vmem:[#allocation13 + $0x110] sm:$0xff] }
 0x9d7   :  { %v3433_v50 = vpack.c.bf16 %v2189_v47, %v2183_v46  ;;  %v2405_v46 = vld [vmem:[#allocation13 + $0x138] sm:$0xff]  ;;  %v3475_v47 = vpack.c.bf16 %v2400_v44, %v2398_v43  ;;  %v2670_v40 = vld [vmem:[#allocation14 + $0xa0] sm:$0xff] }
 0x9d8   :  { %v3477_v48 = vpack.c.bf16 %v2405_v46, %v2403_v45  ;;  %v2654_v44 = vld [vmem:[#allocation14 + $0x20] sm:$0xff]  ;;  %v2655_v45 = vld [vmem:[#allocation14 + $0x28] sm:$0xff]  ;;  %v2672_v46 = vld [vmem:[#allocation14 + $0xb0] sm:$0xff] }
 0x9d9   :  { %3434 = vmatprep.subr.bf16.mxu0 %v3433_v50 }
 0x9da   :  { %3436 = vmatpush1.bf16.msra.mxu0 %v3435_v49 }
 0x9db   :  { %3438 = vmatprep.subr.bf16.mxu0 %v3433_v50  ;;  %v2404_v50 = vld [vmem:[#allocation13 + $0x130] sm:$0xff] }
 0x9dd   :  { %2814 = vmatmul.mubr.msk.f32.vlgmr.msra.gmra.mrb[26].mxu0 %vm287_vm12, %v2204_v53 }
 0x9de   :  { %3440 = vmatpush1.bf16.msra.mxu0 %v3435_v49  ;;  %2359 = vmatprep.mubr.f32.mxu0 %v3877_v14  ;;  %v3453_v14 = vpack.c.bf16 %v2381_v19, %v2379_v18  ;;  %v2402_v49 = vld [vmem:[#allocation13 + $0x120] sm:$0xff]  ;;  %v3493_v19 = vpack.c.bf16 %v2421_v17, %v2419_v7  ;;  %v2432_v7 = vld [vmem:[#allocation13 + $0x210] sm:$0xff]  ;;  %v2435_v17 = vld [vmem:[#allocation13 + $0x228] sm:$0xff] }
 0x9df   :  { %3442 = vmatprep.subr.bf16.mxu0 %v3441_v55  ;;  %v3479_v53 = vpack.c.bf16 %v2404_v50, %v2402_v49  ;;  %v2406_v55 = vld [vmem:[#allocation13 + $0x140] sm:$0xff]  ;;  %v2656_v50 = vld [vmem:[#allocation14 + $0x30] sm:$0xff] }
 0x9e0   :  { %v3483_v60 = vpack.c.bf16 %v2408_v56, %v2406_v55  ;;  %v2658_v56 = vld [vmem:[#allocation14 + $0x40] sm:$0xff] }
 0x9e1   :  { %2816 = vmatmul.mubr.msk.f32.vlgmr.msra.gmra.mrb[28].mxu0 %vm287_vm12, %v2291_v4  ;;  %v3485_v4 = vpack.c.bf16 %v2413_v59, %v2411_v58  ;;  %v2659_v58 = vld [vmem:[#allocation14 + $0x48] sm:$0xff]  ;;  %v2676_v59 = vld [vmem:[#allocation14 + $0xd0] sm:$0xff] }
 0x9e2   :  { %3444 = vmatpush1.bf16.msra.mxu0 %v3443_v5  ;;  %v2410_v5 = vld [vmem:[#allocation13 + $0x160] sm:$0xff] }
 0x9e3   :  { %3446 = vmatprep.subr.bf16.mxu0 %v3445_v6  ;;  %v2412_v6 = vld [vmem:[#allocation13 + $0x170] sm:$0xff] }
 0x9e4   :  { %v3487_v12 = vpack.c.bf16 %v2412_v6, %v2410_v5  ;;  %v2660_v6 = vld [vmem:[#allocation14 + $0x50] sm:$0xff] }
 0x9e6   :  { %3448 = vmatpush1.bf16.msra.mxu0 %v3447_v15  ;;  %v2414_v15 = vld [vmem:[#allocation13 + $0x180] sm:$0xff] }
 0x9e7   :  { %3450 = vmatprep.subr.bf16.mxu0 %v3449_v16  ;;  %v2416_v16 = vld [vmem:[#allocation13 + $0x190] sm:$0xff] }
 0x9e8   :  { %v3491_v18 = vpack.c.bf16 %v2416_v16, %v2414_v15  ;;  %v2430_v16 = vld [vmem:[#allocation13 + $0x200] sm:$0xff] }
 0x9ea   :  { %3452 = vmatpush1.bf16.msra.mxu0 %v3451_v11  ;;  %v2418_v11 = vld [vmem:[#allocation13 + $0x1a0] sm:$0xff] }
 0x9eb   :  { %3454 = vmatprep.subr.bf16.mxu0 %v3453_v14  ;;  %v2420_v14 = vld [vmem:[#allocation13 + $0x1b0] sm:$0xff] }
 0x9ec   :  { %v3495_v27 = vpack.c.bf16 %v2420_v14, %v2418_v11  ;;  %v3507_v11 = vpack.c.bf16 %v2432_v7, %v2430_v16 }
 0x9ee   :  { %3456 = vmatpush1.bf16.msra.mxu0 %v3455_v21  ;;  %v2422_v21 = vld [vmem:[#allocation13 + $0x1c0] sm:$0xff] }
 0x9ef   :  { %3458 = vmatprep.subr.bf16.mxu0 %v3457_v22  ;;  %v2424_v22 = vld [vmem:[#allocation13 + $0x1d0] sm:$0xff] }
 0x9f0   :  { %v3499_v26 = vpack.c.bf16 %v2424_v22, %v2422_v21  ;;  %v2441_v21 = vld [vmem:[#allocation13 + $0x258] sm:$0xff] }
 0x9f2   :  { %3460 = vmatpush1.bf16.msra.mxu0 %v3459_v29  ;;  %v2426_v29 = vld [vmem:[#allocation13 + $0x1e0] sm:$0xff] }
 0x9f3   :  { %3462 = vmatprep.subr.bf16.mxu0 %v3461_v1  ;;  %v2428_v1 = vld [vmem:[#allocation13 + $0x1f0] sm:$0xff] }
 0x9f4   :  { %v3503_v30 = vpack.c.bf16 %v2428_v1, %v2426_v29  ;;  %v2443_v1 = vld [vmem:[#allocation13 + $0x268] sm:$0xff] }
 0x9f6   :  { %3464 = vmatpush1.bf16.msra.mxu0 %v3463_v33  ;;  %v2666_v33 = vld [vmem:[#allocation14 + $0x80] sm:$0xff] }
 0x9f7   :  { %3466 = vmatprep.subr.bf16.mxu0 %v3465_v34  ;;  %v2667_v34 = vld [vmem:[#allocation14 + $0x88] sm:$0xff] }
 0x9f8   :  { %v3569_v35 = vpack.c.bf16 %v2667_v34, %v2666_v33  ;;  %v2444_v33 = vld [vmem:[#allocation13 + $0x270] sm:$0xff]  ;;  %v2447_v34 = vld [vmem:[#allocation13 + $0x288] sm:$0xff] }
 0x9fa   :  { %3468 = vmatpush1.bf16.msra.mxu0 %v3467_v0  ;;  %v2669_v0 = vld [vmem:[#allocation14 + $0x98] sm:$0xff]  ;;  %3570 = vmatprep.subr.bf16.mxu1 %v3569_v35 }
 0x9fb   :  { %3470 = vmatprep.subr.bf16.mxu0 %v3469_v36  ;;  %v3571_v36 = vpack.c.bf16 %v2651_v61, %v2650_v52  ;;  %v3573_v37 = vpack.c.bf16 %v2669_v0, %v2668_v57  ;;  %v2449_v52 = vld [vmem:[#allocation13 + $0x298] sm:$0xff]  ;;  %v2446_v57 = vld [vmem:[#allocation13 + $0x280] sm:$0xff]  ;;  %v2448_v0 = vld [vmem:[#allocation13 + $0x290] sm:$0xff] }
 0x9fc   :  { %v3521_v61 = vpack.c.bf16 %v2449_v52, %v2447_v34  ;;  %v2489_v34 = vld [vmem:[#allocation13 + $0x3d8] sm:$0xff] }
 0x9fd   :  { %3572 = vmatpush3.bf16.msra.mxu1 %v3571_v36  ;;  %v2451_v36 = vld [vmem:[#allocation13 + $0x2a8] sm:$0xff] }
 0x9fe   :  { %3472 = vmatpush1.bf16.msra.mxu0 %v3471_v41  ;;  %v2671_v41 = vld [vmem:[#allocation14 + $0xa8] sm:$0xff]  ;;  %3574 = vmatprep.subr.bf16.mxu1 %v3573_v37  ;;  %v2453_v37 = vld [vmem:[#allocation13 + $0x2b8] sm:$0xff] }
 0x9ff   :  { %3474 = vmatprep.subr.bf16.mxu0 %v3473_v42  ;;  %v3575_v42 = vpack.c.bf16 %v2653_v39, %v2652_v38  ;;  %v3577_v43 = vpack.c.bf16 %v2671_v41, %v2670_v40  ;;  %v3523_v38 = vpack.c.bf16 %v2448_v0, %v2446_v57  ;;  %v3525_v39 = vpack.c.bf16 %v2453_v37, %v2451_v36  ;;  %v2450_v40 = vld [vmem:[#allocation13 + $0x2a0] sm:$0xff]  ;;  %v2452_v41 = vld [vmem:[#allocation13 + $0x2b0] sm:$0xff]  ;;  %v2491_v0 = vld [vmem:[#allocation13 + $0x3e8] sm:$0xff] }
 0xa00   :  { %v2488_v57 = vld [vmem:[#allocation13 + $0x3d0] sm:$0xff]  ;;  %v2493_v36 = vld [vmem:[#allocation13 + $0x3f8] sm:$0xff] }
 0xa01   :  { %3576 = vmatpush3.bf16.msra.mxu1 %v3575_v42  ;;  %v2455_v42 = vld [vmem:[#allocation13 + $0x2c8] sm:$0xff] }
 0xa02   :  { %3476 = vmatpush1.bf16.msra.mxu0 %v3475_v47  ;;  %v2673_v47 = vld [vmem:[#allocation14 + $0xb8] sm:$0xff]  ;;  %3578 = vmatprep.subr.bf16.mxu1 %v3577_v43 }
 0xa03   :  { %3478 = vmatprep.subr.bf16.mxu0 %v3477_v48  ;;  %v3579_v48 = vpack.c.bf16 %v2655_v45, %v2654_v44  ;;  %v3581_v49 = vpack.c.bf16 %v2673_v47, %v2672_v46  ;;  %v2457_v43 = vld [vmem:[#allocation13 + $0x2d8] sm:$0xff]  ;;  %v3527_v44 = vpack.c.bf16 %v2452_v41, %v2450_v40  ;;  %v2454_v46 = vld [vmem:[#allocation13 + $0x2c0] sm:$0xff]  ;;  %v2456_v47 = vld [vmem:[#allocation13 + $0x2d0] sm:$0xff] }
 0xa04   :  { %v3529_v45 = vpack.c.bf16 %v2457_v43, %v2455_v42  ;;  %v2492_v40 = vld [vmem:[#allocation13 + $0x3f0] sm:$0xff]  ;;  %v2662_v42 = vld [vmem:[#allocation14 + $0x60] sm:$0xff]  ;;  %v2663_v43 = vld [vmem:[#allocation14 + $0x68] sm:$0xff] }
 0xa05   :  { %3580 = vmatpush3.bf16.msra.mxu1 %v3579_v48  ;;  %v2459_v48 = vld [vmem:[#allocation13 + $0x2e8] sm:$0xff] }
 0xa06   :  { %3480 = vmatpush1.bf16.msra.mxu0 %v3479_v53  ;;  %v2675_v53 = vld [vmem:[#allocation14 + $0xc8] sm:$0xff]  ;;  %3582 = vmatprep.subr.bf16.mxu1 %v3581_v49  ;;  %v2461_v49 = vld [vmem:[#allocation13 + $0x2f8] sm:$0xff] }
 0xa07   :  { %3482 = vmatprep.subr.bf16.mxu0 %v3481_v62  ;;  %v3583_v62 = vpack.c.bf16 %v2657_v54, %v2656_v50  ;;  %v3585_v55 = vpack.c.bf16 %v2675_v53, %v2674_v51  ;;  %v3531_v50 = vpack.c.bf16 %v2456_v47, %v2454_v46  ;;  %v3533_v54 = vpack.c.bf16 %v2461_v49, %v2459_v48  ;;  %v2458_v51 = vld [vmem:[#allocation13 + $0x2e0] sm:$0xff]  ;;  %v2460_v53 = vld [vmem:[#allocation13 + $0x2f0] sm:$0xff]  ;;  %v2681_v46 = vld [vmem:[#allocation14 + $0xf8] sm:$0xff] }
 0xa08   :  { %v2664_v48 = vld [vmem:[#allocation14 + $0x70] sm:$0xff]  ;;  %v2665_v49 = vld [vmem:[#allocation14 + $0x78] sm:$0xff] }
 0xa09   :  { %3584 = vmatpush3.bf16.msra.mxu1 %v3583_v62  ;;  %v2463_v62 = vld [vmem:[#allocation13 + $0x308] sm:$0xff] }
 0xa0a   :  { %3484 = vmatpush1.bf16.msra.mxu0 %v3483_v60  ;;  %v2677_v60 = vld [vmem:[#allocation14 + $0xd8] sm:$0xff]  ;;  %3586 = vmatprep.subr.bf16.mxu1 %v3585_v55 }
 0xa0b   :  { %3486 = vmatprep.subr.bf16.mxu0 %v3485_v4  ;;  %v3587_v4 = vpack.c.bf16 %v2659_v58, %v2658_v56  ;;  %v3589_v5 = vpack.c.bf16 %v2677_v60, %v2676_v59  ;;  %v2465_v55 = vld [vmem:[#allocation13 + $0x318] sm:$0xff]  ;;  %v3535_v56 = vpack.c.bf16 %v2460_v53, %v2458_v51  ;;  %v2462_v59 = vld [vmem:[#allocation13 + $0x300] sm:$0xff]  ;;  %v2464_v60 = vld [vmem:[#allocation13 + $0x310] sm:$0xff] }
 0xa0c   :  { %v3537_v58 = vpack.c.bf16 %v2465_v55, %v2463_v62 }
 0xa0d   :  { %3588 = vmatpush3.bf16.msra.mxu1 %v3587_v4  ;;  %v2467_v4 = vld [vmem:[#allocation13 + $0x328] sm:$0xff] }
 0xa0e   :  { %3488 = vmatpush1.bf16.msra.mxu0 %v3487_v12  ;;  %v2679_v12 = vld [vmem:[#allocation14 + $0xe8] sm:$0xff]  ;;  %3590 = vmatprep.subr.bf16.mxu1 %v3589_v5  ;;  %v2469_v5 = vld [vmem:[#allocation13 + $0x338] sm:$0xff] }
 0xa0f   :  { %3490 = vmatprep.subr.bf16.mxu0 %v3489_v63  ;;  %v3591_v63 = vpack.c.bf16 %v2661_v8, %v2660_v6  ;;  %v3593_v15 = vpack.c.bf16 %v2679_v12, %v2678_v10  ;;  %v3539_v6 = vpack.c.bf16 %v2464_v60, %v2462_v59  ;;  %v3541_v8 = vpack.c.bf16 %v2469_v5, %v2467_v4  ;;  %v2466_v10 = vld [vmem:[#allocation13 + $0x320] sm:$0xff]  ;;  %v2468_v12 = vld [vmem:[#allocation13 + $0x330] sm:$0xff] }
 0xa10   :  { %v3543_v16 = vpack.c.bf16 %v2468_v12, %v2466_v10  ;;  %v2817_v4 = vld [vmem:[%s4368_s22] ss:$0 sm:$0xff] }
 0xa11   :  { %3592 = vmatpush3.bf16.msra.mxu1 %v3591_v63  ;;  %v2471_v63 = vld [vmem:[#allocation13 + $0x348] sm:$0xff] }
 0xa12   :  { %3492 = vmatpush1.bf16.msra.mxu0 %v3491_v18  ;;  %3594 = vmatprep.subr.bf16.mxu1 %v3593_v15  ;;  %v2437_v18 = vld [vmem:[#allocation13 + $0x238] sm:$0xff] }
 0xa13   :  { %3494 = vmatprep.subr.bf16.mxu0 %v3493_v19  ;;  %v3509_v9 = vpack.c.bf16 %v2437_v18, %v2435_v17  ;;  %v2473_v15 = vld [vmem:[#allocation13 + $0x358] sm:$0xff]  ;;  %v2470_v17 = vld [vmem:[#allocation13 + $0x340] sm:$0xff]  ;;  %v2472_v18 = vld [vmem:[#allocation13 + $0x350] sm:$0xff] }
 0xa14   :  { %v3545_v7 = vpack.c.bf16 %v2473_v15, %v2471_v63 }
 0xa16   :  { %3496 = vmatpush1.bf16.msra.mxu0 %v3495_v27  ;;  %v2436_v27 = vld [vmem:[#allocation13 + $0x230] sm:$0xff] }
 0xa17   :  { %3498 = vmatprep.subr.bf16.mxu0 %v3497_v20  ;;  %v2439_v20 = vld [vmem:[#allocation13 + $0x248] sm:$0xff]  ;;  %v3511_v22 = vpack.c.bf16 %v2436_v27, %v2434_v25  ;;  %v2474_v25 = vld [vmem:[#allocation13 + $0x360] sm:$0xff]  ;;  %v2476_v27 = vld [vmem:[#allocation13 + $0x370] sm:$0xff] }
 0xa18   :  { %v3513_v24 = vpack.c.bf16 %v2441_v21, %v2439_v20  ;;  %v2479_v20 = vld [vmem:[#allocation13 + $0x388] sm:$0xff]  ;;  %v2481_v21 = vld [vmem:[#allocation13 + $0x398] sm:$0xff] }
 0xa1a   :  { %3500 = vmatpush1.bf16.msra.mxu0 %v3499_v26  ;;  %v2438_v26 = vld [vmem:[#allocation13 + $0x240] sm:$0xff] }
 0xa1b   :  { %3502 = vmatprep.subr.bf16.mxu0 %v3501_v28  ;;  %v2440_v28 = vld [vmem:[#allocation13 + $0x250] sm:$0xff] }
 0xa1c   :  { %v3515_v13 = vpack.c.bf16 %v2440_v28, %v2438_v26  ;;  %v2478_v26 = vld [vmem:[#allocation13 + $0x380] sm:$0xff]  ;;  %v2480_v28 = vld [vmem:[#allocation13 + $0x390] sm:$0xff] }
 0xa1e   :  { %3504 = vmatpush1.bf16.msra.mxu0 %v3503_v30  ;;  %v2445_v30 = vld [vmem:[#allocation13 + $0x278] sm:$0xff] }
 0xa1f   :  { %3506 = vmatprep.subr.bf16.mxu0 %v3505_v32  ;;  %v3517_v31 = vpack.c.bf16 %v2445_v30, %v2443_v1  ;;  %v2442_v32 = vld [vmem:[#allocation13 + $0x260] sm:$0xff]  ;;  %v2485_v1 = vld [vmem:[#allocation13 + $0x3b8] sm:$0xff]  ;;  %v3555_v30 = vpack.c.bf16 %v2480_v28, %v2478_v26 }
 0xa20   :  { %v3519_v35 = vpack.c.bf16 %v2444_v33, %v2442_v32  ;;  %v2484_v32 = vld [vmem:[#allocation13 + $0x3b0] sm:$0xff]  ;;  %v2487_v33 = vld [vmem:[#allocation13 + $0x3c8] sm:$0xff] }
 0xab0   :  { %v2274_v19 = vpop.f32.mrb[26].mxu0 }
 0xab1   :  { %v2276_v14 = vpop.f32.mrb[27].mxu0 }
 0xab2   :  { %2570 = vmatprep.mubr.f32.mxu0 %v2276_v14  ;;  %v3547_v14 = vpack.c.bf16 %v2472_v18, %v2470_v17 }
 0xab3   :  { %2571 = vmatmul.mubr.f32.vlgmr.msra.gmra.mrb[30].mxu0 %v2274_v19  ;;  %v2475_v19 = vld [vmem:[#allocation13 + $0x368] sm:$0xff] }
 0xab4   :  { %3508 = vmatpush1.bf16.msra.mxu0 %v3507_v11  ;;  %v4323_v23 = vpop.f32.mrb[28].mxu0  ;;  %v2477_v11 = vld [vmem:[#allocation13 + $0x378] sm:$0xff] }
 0xab5   :  { %3510 = vmatprep.subr.bf16.mxu0 %v3509_v9  ;;  %v2363_v29 = vpop.f32.mrb[29].mxu0  ;;  %v3549_v9 = vpack.c.bf16 %v2477_v11, %v2475_v19 }
 0xab6   :  { %2641 = vmatprep.mubr.f32.mxu0 %v2363_v29  ;;  %v2483_v29 = vld [vmem:[#allocation13 + $0x3a8] sm:$0xff] }
 0xab8   :  { %3512 = vmatpush1.bf16.msra.mxu0 %v3511_v22  ;;  %v3551_v22 = vpack.c.bf16 %v2476_v27, %v2474_v25 }
 0xab9   :  { %3514 = vmatprep.subr.bf16.mxu0 %v3513_v24  ;;  %v3553_v24 = vpack.c.bf16 %v2481_v21, %v2479_v20 }
 0xabc   :  { %3516 = vmatpush1.bf16.msra.mxu0 %v3515_v13  ;;  %v3557_v13 = vpack.c.bf16 %v2485_v1, %v2483_v29 }
 0xabd   :  { %3518 = vmatprep.subr.bf16.mxu0 %v3517_v31  ;;  %v2482_v31 = vld [vmem:[#allocation13 + $0x3a0] sm:$0xff] }
 0xabe   :  { %v3559_v52 = vpack.c.bf16 %v2484_v32, %v2482_v31 }
 0xac0   :  { %3520 = vmatpush1.bf16.msra.mxu0 %v3519_v35  ;;  %v3561_v35 = vpack.c.bf16 %v2489_v34, %v2487_v33 }
 0xac1   :  { %3522 = vmatprep.subr.bf16.mxu0 %v3521_v61  ;;  %v2486_v61 = vld [vmem:[#allocation13 + $0x3c0] sm:$0xff] }
 0xac2   :  { %v3563_v37 = vpack.c.bf16 %v2488_v57, %v2486_v61 }
 0xac4   :  { %3524 = vmatpush1.bf16.msra.mxu0 %v3523_v38  ;;  %v3565_v38 = vpack.c.bf16 %v2493_v36, %v2491_v0 }
 0xac5   :  { %3526 = vmatprep.subr.bf16.mxu0 %v3525_v39  ;;  %v2490_v39 = vld [vmem:[#allocation13 + $0x3e0] sm:$0xff] }
 0xac6   :  { %v3567_v41 = vpack.c.bf16 %v2492_v40, %v2490_v39 }
 0xac8   :  { %3528 = vmatpush1.bf16.msra.mxu0 %v3527_v44  ;;  %v3595_v44 = vpack.c.bf16 %v2663_v43, %v2662_v42 }
 0xac9   :  { %3530 = vmatprep.subr.bf16.mxu0 %v3529_v45  ;;  %v2680_v45 = vld [vmem:[#allocation14 + $0xf0] sm:$0xff] }
 0xaca   :  { %3596 = vmatpush3.bf16.msra.mxu1 %v3595_v44  ;;  %v3597_v47 = vpack.c.bf16 %v2681_v46, %v2680_v45 }
 0xacc   :  { %3532 = vmatpush1.bf16.msra.mxu0 %v3531_v50  ;;  %v3599_v50 = vpack.c.bf16 %v2665_v49, %v2664_v48  ;;  %3598 = vmatprep.subr.bf16.mxu1 %v3597_v47 }
 0xacd   :  { %3534 = vmatprep.subr.bf16.mxu0 %v3533_v54  ;;  %v2494_v54 = vld [vmem:[%s4366_s20] sm:$0x3]  ;;  %s3878_s20 = smov [#allocation16]  }
 0xace   :  { %3600 = vmatpush3.bf16.msra.mxu1 %v3599_v50  ;;  %v2499_v51 = vrot.slane %v2494_v54, %v4147_v2  ;;  %s2780_s4 = sshll.u32 %s3878_s20, 4  ;;  %s2781_s4 = int_to_ptr.vmem [resolvable:$true] %s2780_s4 }
 0xacf   :  { %s3829_s22 = scalar_lea.vmem %s2781_s4, 64  ;;  %p3834_p9 = scmp.lt.s32.totalorder %s2781_s4, %s2781_s4 }
 0xad0   :  { %3536 = vmatpush1.bf16.msra.mxu0 %v3535_v56  ;;  %p3830_p8 = scmp.ne.s32.totalorder %s2781_s4, %s3829_s22  ;;  %p3835_p10 = scmp.lt.s32.totalorder %s3829_s22, %s3829_s22 }
 0xad1   :  { %3538 = vmatprep.subr.bf16.mxu0 %v3537_v58 }
 0xad2   :  { %p3836_p11 = por %p3835_p10, %p3834_p9 }
 0xad4   :  { %3540 = vmatpush1.bf16.msra.mxu0 %v3539_v6  ;;  %p3837_p12 = pnand %p3836_p11, %p3830_p8 }
 0xad5   :  { %3542 = vmatprep.subr.bf16.mxu0 %v3541_v8 }
 0xad8   :  { %3544 = vmatpush1.bf16.msra.mxu0 %v3543_v16 }
 0xad9   :  { %3546 = vmatprep.subr.bf16.mxu0 %v3545_v7 }
 0xadc   :  { %3548 = vmatpush1.bf16.msra.mxu0 %v3547_v14 }
 0xadd   :  { %3550 = vmatprep.subr.bf16.mxu0 %v3549_v9 }
 0xae0   :  { %3552 = vmatpush1.bf16.msra.mxu0 %v3551_v22 }
 0xae1   :  { %3554 = vmatprep.subr.bf16.mxu0 %v3553_v24 }
 0xae4   :  { %3556 = vmatpush1.bf16.msra.mxu0 %v3555_v30 }
 0xae5   :  { %3558 = vmatprep.subr.bf16.mxu0 %v3557_v13 }
 0xae8   :  { %3560 = vmatpush1.bf16.msra.mxu0 %v3559_v52 }
 0xae9   :  { %3562 = vmatprep.subr.bf16.mxu0 %v3561_v35 }
 0xaec   :  { %3564 = vmatpush1.bf16.msra.mxu0 %v3563_v37 }
 0xaed   :  { %3566 = vmatprep.subr.bf16.mxu0 %v3565_v38 }
 0xaf0   :  { %3568 = vmatpush1.bf16.msra.mxu0 %v3567_v41 }
 0xaf3   :  { %2642 = vmatmul.mubr.f32.vlgmr.msra.gmra.mrb[30].mxu0 %v4323_v23  ;;  %v2503_v23 = vrot.slane %v2494_v54, %v4150_v3 }
 0xbc6   :  { %v2643_v53 = vpop.f32.mrb[30].mxu0 }
 0xbc7   :  { %v3613_v62 = vadd.f32 %v2643_v53, %v2499_v51  ;;  %v2645_v55 = vpop.f32.mrb[31].mxu0 }
 0xbc8   :  { %v3614_v56 = vadd.f32 %v2645_v55, %v2503_v23 }
 0xbc9   :  { %v2648_v59 = vmax.f32 %v3613_v62, 0.0 }
 0xbca   :  { %v2649_v58 = vmax.f32 %v3614_v56, 0.0 }
 0xbcc   :  { %2753 = vmatprep.mubr.f32.mxu1 %v2649_v58 }
 0xbcd   :  { %2754 = vmatmul.mubr.f32.vlgmr.msra.gmra.mrb[26].mxu1 %v2648_v59 }
 0xca0   :  { %v2866_v60 = vpop.f32.mrb[26].mxu1 }
 0xca1   :  { %v2867_v5 = vpop.f32.mrb[27].mxu1 }
 0xca2   :  { %v2868_v6 = vadd.f32 %v2867_v5, %v2866_v60 }
 0xca4   :  { %v2756_v8 = vadd.f32 %v2868_v6, %v2817_v4 }
 0xca6   :  { %v2760_v2 = vsel %vm2759_vm5, %v2756_v8, -inf }
 0xca7   :  { %2761 = vmax.xlane.f32.xlu0 %v2760_v2 }
 0xd34   :  { %v2762_v3 = vpop.xlane.xlu0 %2761 }
 0xd35   :  { %v2763_v10 = vsub.f32 %v2756_v8, %v2762_v3 }
 0xd37   :  { %v2764_v12 = vmul.f32 1.442695, %v2763_v10 }
 0xd39   :  { %3649 = vpow2.f32 %v2764_v12 }
 0xd43   :  { %v3650_v63 = vpop.eup %3649 }
 0xd44   :  { %v2766_v15 = vsel %vm2759_vm5, %v3650_v63, 0.0 }
 0xd45   :  { %2767 = vadd.xlane.f32.xlu1 %v2766_v15 }
 0xdd2   :  { %v2768_v16 = vpop.xlane.xlu1 %2767 }
 0xdd3   :  { %3651 = vlog2.f32 %v2768_v16 }
 0xddd   :  { %v3652_v7 = vpop.eup %3651 }
 0xdde   :  { %v2770_v17 = vmul.f32 0.6931472, %v3652_v7 }
 0xde0   :  { %v2771_v18 = vadd.f32 %v2770_v17, %v2762_v3 }
 0xde2   :  { %v2772_v19 = vsub.f32 %v2756_v8, %v2771_v18 }
 0xde4   :  { %2773 = vst [vmem:[#allocation16] sm:$0xf] %v2772_v19 }
 0xde5   :  { %3840 = shalt.err (!%p3837_p12)
}
 0xde6   :  { %s3841_s19 = scalar_lea.hbm %s4369_s23, 64 }
 0xde7   :  { %p3842_p13 = scmp.ne.s32.totalorder %s4369_s23, %s3841_s19  ;;  %p3845_p0 = scmp.lt.u32.totalorder %s3841_s19, %s4369_s23 }
 0xde9   :  { %p3847_p1 = pnand %p3845_p0, %p3842_p13 }
 0xdeb   :  { %3850 = shalt.err (!%p3847_p1)
}
 0xdec   :  { %2783 = dma.vmem_to_hbm [thread:$0]  %s2781_s4, 64, %s4369_s23, [#allocation4]  }
 0xded   :  { %3861 = dma.done.wait [#allocation4], 64  }
 0xdee   :  { %3862 = vsyncadd [#allocation4], 4294967232 }
 0xdef   :  { %2787 = vsyncpa [#allocation3], 1 }
 0xdf0   :  { %2788 = vsyncpa [#allocation6], 1 }
 0xdf1   :  { %2789 = vsyncpa [#allocation9], 1 }
 0xdf2   :  { %2790 = vsyncpa [#allocation12], 1 }
 0xdf3   :  { %2791 = vsyncpa [#allocation15], 1 }
 0xdf4   :  { %2792 = vsyncpa [#allocation4], 1 }

</bundles_post_ra>
